<compile_context>
chip_gen: v7x
topology: tpu7x:2x2x1
jax: 0.10.0
libtpu: 0.0.40
codegen_flags: <defaults>
</compile_context>

<pallas_src>
import functools

import jax
import jax.numpy as jnp
from jax.experimental import pallas as pl
from jax.experimental.pallas import tpu as pltpu


NUM_CLASSES = 5
C_IN = 512
C_PAD = 8  # classes padded up to one sublane group


def _disc_loss_kernel(hw_valid, tm, x_ref, w1_ref, w2_ref, lbl_ref, psum_ref):
    """One (batch, pixel-tile) grid point -> lane-dense partial loss row.

    x_ref   : (1, C_IN, tm)    bf16  activations (channels on sublanes, pixels on lanes)
    w1_ref  : (C_IN, C_IN)     bf16  conv1 weight (out, in), resident
    w2_ref  : (C_PAD, C_IN)    bf16  conv2 weight, zero-padded classes, resident
    lbl_ref : (1, 1, tm)       int32 labels
    psum_ref: (1, 1, 1, 128)   f32   this tile's CE sum, replicated across 128 lanes
    """
    j = pl.program_id(1)

    # 1x1 conv #1 (512 -> 512, no bias) on the MXU, bf16 operands, f32 accumulate.
    x = x_ref[0]                                                          # (C, tm) bf16
    h = jnp.dot(w1_ref[...], x, preferred_element_type=jnp.float32)      # (C, tm) f32
    h = jnp.maximum(h, 0.0).astype(jnp.bfloat16)                          # ReLU

    # 1x1 conv #2 (512 -> 5, padded to 8, no bias).
    logits = jnp.dot(w2_ref[...], h, preferred_element_type=jnp.float32)  # (C_PAD, tm)

    cls = jax.lax.broadcasted_iota(jnp.int32, (C_PAD, tm), 0)             # class ids
    logits = jnp.where(cls < NUM_CLASSES, logits, -1e30)                  # kill pad rows

    # Per-pixel cross entropy: logsumexp(logits) - logits[label]  (all f32, per-lane).
    m = jnp.max(logits, axis=0, keepdims=True)                            # (1, tm)
    lse = m + jnp.log(jnp.sum(jnp.exp(logits - m), axis=0, keepdims=True))
    lbl = lbl_ref[0]                                                      # (1, tm) int32
    true_logit = jnp.sum(jnp.where(cls == lbl, logits, 0.0),
                         axis=0, keepdims=True)                           # (1, tm)

    # Strictly per-lane masking of padded / out-of-bounds pixels before any
    # cross-lane reduction (garbage lanes may be NaN; where() drops them).
    lane = jax.lax.broadcasted_iota(jnp.int32, (1, tm), 1)
    valid = (j * tm + lane) < hw_valid
    loss_row = jnp.where(valid, lse - true_logit, 0.0)                    # (1, tm)

    tile_sum = jnp.sum(loss_row, axis=-1, keepdims=True)                  # (1, 1)
    # Lane-dense store: replicate the scalar across one full 128-lane row.
    psum_ref[...] = jnp.broadcast_to(tile_sum, (1, 128)).reshape(1, 1, 1, 128)


def _pick_tile(hw_arr, n, tm_max):
    """Pixel-tile size for a (possibly padded) pixel count hw_arr."""
    tm = min(tm_max, hw_arr)
    t = pl.cdiv(hw_arr, tm)
    # v7x shards "parallel" grid axes across its 2 TensorCores: keep >= 2 grid
    # points whenever the map allows it so neither core idles.
    if n * t < 2 and hw_arr > 128:
        tm = ((hw_arr // 2 + 127) // 128) * 128
        t = pl.cdiv(hw_arr, tm)
    return tm, t


def discriminator_loss_pallas(x_ncm, labels_n1m, w1, w2, *, hw_valid=None,
                              tm_max=2048):
    """x_ncm: (N, 512, HWp) bf16/f32 activations (HWp possibly lane-padded);
    labels_n1m: (N, 1, HWp) int32; w1: (512, 512) (out, in); w2: (5, 512) (out, in);
    hw_valid: number of real (unpadded) pixels per image."""
    N, C, HW_arr = x_ncm.shape
    assert C == C_IN
    assert w1.shape == (C_IN, C_IN) and w2.shape == (NUM_CLASSES, C_IN)
    if hw_valid is None:
        hw_valid = HW_arr

    x_bf = x_ncm.astype(jnp.bfloat16)   # no-op if the producer already emits bf16
    w1_bf = w1.astype(jnp.bfloat16)
    w2_bf = jnp.zeros((C_PAD, C_IN), jnp.bfloat16).at[:NUM_CLASSES].set(
        w2.astype(jnp.bfloat16))

    tm, T = _pick_tile(HW_arr, N, tm_max)
    kernel = functools.partial(_disc_loss_kernel, hw_valid, tm)

    partials = pl.pallas_call(
        kernel,
        out_shape=jax.ShapeDtypeStruct((N, T, 1, 128), jnp.float32),
        grid_spec=pltpu.PrefetchScalarGridSpec(
            num_scalar_prefetch=0,
            grid=(N, T),
            in_specs=[
                pl.BlockSpec((1, C_IN, tm), lambda n, j: (n, 0, j)),
                # Weights: constant index map -> fetched once; single-buffered.
                pl.BlockSpec((C_IN, C_IN), lambda n, j: (0, 0),
                             pipeline_mode=pl.Buffered(1)),
                pl.BlockSpec((C_PAD, C_IN), lambda n, j: (0, 0),
                             pipeline_mode=pl.Buffered(1)),
                pl.BlockSpec((1, 1, tm), lambda n, j: (n, 0, j)),
            ],
            out_specs=pl.BlockSpec((1, 1, 1, 128), lambda n, j: (n, j, 0, 0)),
        ),
        compiler_params=pltpu.CompilerParams(
            # No cross-iteration carry: both axes independent -> both TCs on v7x.
            dimension_semantics=("parallel", "parallel"),
            # x block (bf16, double-buffered) + f32/bf16 intermediates + resident
            # W1 is ~12 MiB at tm=2048; raise above v5e's 16 MiB scoped default.
            vmem_limit_bytes=32 * 1024 * 1024,
        ),
        cost_estimate=pl.CostEstimate(
            flops=2 * N * HW_arr * C_IN * (C_IN + C_PAD),
            transcendentals=N * HW_arr * C_PAD,
            bytes_accessed=(N * HW_arr * C_IN * 2          # activations (bf16)
                            + N * HW_arr * 4                # labels (int32)
                            + C_IN * C_IN * 2               # W1 (bf16)
                            + C_PAD * C_IN * 2              # W2 (bf16)
                            + N * T * 128 * 4),             # partial-sum rows
        ),
    )(x_bf, w1_bf, w2_bf, labels_n1m)

    # Final tiny reduction + 'mean' in JAX (each tile sum is lane-replicated:
    # take lane 0).
    return jnp.sum(partials[:, :, 0, 0]) / jnp.float32(N * hw_valid)


def label_resize_im(label_2d, H, W, N):
    """Emulates LabelResizeLayer_im: cv2 INTER_NEAREST resize of a 2-D label
    map to (H, W), cast to int, broadcast over batch N."""
    # TODO(synk): cv2.INTER_NEAREST's half-pixel rounding can pick a neighboring
    # source pixel on some sizes; floor(i*src/dst) is used here.
    Hl, Wl = label_2d.shape
    row = jnp.clip((jnp.arange(H) * Hl) // H, 0, Hl - 1)
    col = jnp.clip((jnp.arange(W) * Wl) // W, 0, Wl - 1)
    resized = label_2d[row[:, None], col[None, :]].astype(jnp.int32)  # (H, W)
    return jnp.broadcast_to(resized[None, :, :], (N, H, W))


def discriminator_forward(feat_nchw, label_2d, w1, w2, *, tm_max=2048):
    """feat_nchw: (N, 512, H, W) float feature map; label_2d: 2-D float label map;
    w1/w2: conv weights in (out, in) layout (optionally with trailing 1x1 dims)."""
    N, C, H, W = feat_nchw.shape
    assert C == C_IN
    if w1.ndim == 4:
        w1 = w1[:, :, 0, 0]
    if w2.ndim == 4:
        w2 = w2[:, :, 0, 0]
    HW = H * W
    # Pure reshape (view): no NCHW->NHWC transpose / extra HBM traffic.
    # TODO(synk): for zero-copy, the upstream VGG producer should emit bf16
    # directly; here the bf16 cast (inside discriminator_loss_pallas) fuses
    # with this reshape/pad into a single XLA pass.
    x = feat_nchw.reshape(N, C, HW)
    labels = label_resize_im(label_2d, H, W, N).reshape(N, 1, HW)
    if HW <= tm_max:
        # Small maps: pad pixels up to a multiple of 128 so every tile is a
        # fully lane-aligned block; the in-kernel valid mask drops the padding.
        hw_pad = ((HW + 127) // 128) * 128
        if hw_pad != HW:
            x = jnp.pad(x, ((0, 0), (0, 0), (0, hw_pad - HW)))
            labels = jnp.pad(labels, ((0, 0), (0, 0), (0, hw_pad - HW)))
    # Large maps: tm=2048 tiles are already 128-aligned; the ragged last tile's
    # out-of-bounds lanes are masked in-kernel (no extra activation copy).
    return discriminator_loss_pallas(x, labels, w1, w2, hw_valid=HW,
                                     tm_max=tm_max)


def _reference_loss(feat_nchw, label_2d, w1, w2):
    N, C, H, W = feat_nchw.shape
    x = feat_nchw.reshape(N, C, H * W)
    h = jnp.maximum(jnp.einsum("oc,ncm->nom", w1, x), 0.0)
    logits = jnp.einsum("pc,ncm->npm", w2, h)                       # (N, 5, HW)
    labels = label_resize_im(label_2d, H, W, N).reshape(N, H * W)
    logp = jax.nn.log_softmax(logits, axis=1)
    nll = -jnp.take_along_axis(logp, labels[:, None, :], axis=1)[:, 0, :]
    return jnp.mean(nll)


if __name__ == "__main__":
    key = jax.random.PRNGKey(0)
    k_feat, k_lbl, k_w1, k_w2, k_feat2 = jax.random.split(key, 5)

    # Parameter init mirroring weight.data.normal_(0, 0.001); conv (out, in) layout.
    w1 = 0.001 * jax.random.normal(k_w1, (C_IN, C_IN), dtype=jnp.float32)
    w2 = 0.001 * jax.random.normal(k_w2, (NUM_CLASSES, C_IN), dtype=jnp.float32)
    # Image-level label map (2-D, integer-valued, stored float) of a different size.
    label = jax.random.randint(k_lbl, (6, 7), 0, NUM_CLASSES).astype(jnp.float32)

    # Case 1: batch 2, 23x23 map -> HW=529 padded to 640, one lane-aligned
    # tile per image (N*T = 2 grid points).
    feat = jax.random.normal(k_feat, (2, C_IN, 23, 23), dtype=jnp.float32)
    loss = jax.block_until_ready(discriminator_forward(feat, label, w1, w2))
    ref = jax.block_until_ready(_reference_loss(feat, label, w1, w2))
    # bf16 matmul operands (f32 accumulate) -> slightly looser tolerance vs f32 ref.
    assert jnp.allclose(loss, ref, rtol=1e-3, atol=1e-3), (loss, ref)

    # Case 2: batch 1, 48x48 map -> HW=2304 > tm_max, two 2048-wide tiles with a
    # masked ragged edge; N*T = 2 keeps both v7x TensorCores busy.
    feat2 = jax.random.normal(k_feat2, (1, C_IN, 48, 48), dtype=jnp.float32)
    loss2 = jax.block_until_ready(discriminator_forward(feat2, label, w1, w2))
    ref2 = jax.block_until_ready(_reference_loss(feat2, label, w1, w2))
    assert jnp.allclose(loss2, ref2, rtol=1e-3, atol=1e-3), (loss2, ref2)

    print("KERNEL_OK")
</pallas_src>

<mosaic_0001>
module attributes {stable_mosaic.version = 11 : i64} {
  func.func @_disc_loss_kernel(%arg0: i32, %arg1: i32, %arg2: memref<1x512x640xbf16, #tpu.memory_space<vmem>>, %arg3: memref<512x512xbf16, #tpu.memory_space<vmem>>, %arg4: memref<8x512xbf16, #tpu.memory_space<vmem>>, %arg5: memref<1x1x640xi32, #tpu.memory_space<vmem>>, %arg6: memref<1x1x1x128xf32, #tpu.memory_space<vmem>>) attributes {dimension_semantics = [#tpu.dimension_semantics<parallel>, #tpu.dimension_semantics<parallel>], iteration_bounds = array<i64: 2, 1>, scalar_prefetch = 0 : i64, scratch_operands = 0 : i64, tpu.core_type = #tpu.core_type<tc>, window_params = [{transform_indices = @transform_0, window_bounds = array<i64: 1, 512, 640>}, {pipeline_mode = #tpu.pipeline_mode<synchronous>, transform_indices = @transform_1, window_bounds = array<i64: 512, 512>}, {pipeline_mode = #tpu.pipeline_mode<synchronous>, transform_indices = @transform_2, window_bounds = array<i64: 8, 512>}, {transform_indices = @transform_3, window_bounds = array<i64: 1, 1, 640>}, {transform_indices = @transform_4, window_bounds = array<i64: 1, 1, 1, 128>}]} {
    %c0 = arith.constant 0 : index
    %c0_0 = arith.constant 0 : index
    %c0_1 = arith.constant 0 : index
    %0 = vector.load %arg2[%c0, %c0_0, %c0_1] : memref<1x512x640xbf16, #tpu.memory_space<vmem>>, vector<1x512x640xbf16>
    %1 = vector.shape_cast %0 : vector<1x512x640xbf16> to vector<512x640xbf16>
    %c0_2 = arith.constant 0 : index
    %c0_3 = arith.constant 0 : index
    %2 = vector.load %arg3[%c0_2, %c0_3] : memref<512x512xbf16, #tpu.memory_space<vmem>>, vector<512x512xbf16>
    %cst = arith.constant dense<0.000000e+00> : vector<512x640xf32>
    %3 = tpu.matmul %2, %1, %cst {dimension_numbers = #tpu.dot_dimension_numbers<[1], [0], [0], [1], [0, 0, 1, 1], [], []>} : vector<512x512xbf16>, vector<512x640xbf16>, vector<512x640xf32> -> vector<512x640xf32>
    %cst_4 = arith.constant 0.000000e+00 : f32
    %4 = vector.broadcast %cst_4 : f32 to vector<512x640xf32>
    %5 = arith.maximumf %3, %4 : vector<512x640xf32>
    %6 = arith.truncf %5 : vector<512x640xf32> to vector<512x640xbf16>
    %c0_5 = arith.constant 0 : index
    %c0_6 = arith.constant 0 : index
    %7 = vector.load %arg4[%c0_5, %c0_6] : memref<8x512xbf16, #tpu.memory_space<vmem>>, vector<8x512xbf16>
    %cst_7 = arith.constant dense<0.000000e+00> : vector<8x640xf32>
    %8 = tpu.matmul %7, %6, %cst_7 {dimension_numbers = #tpu.dot_dimension_numbers<[1], [0], [0], [1], [0, 0, 1, 1], [], []>} : vector<8x512xbf16>, vector<512x640xbf16>, vector<8x640xf32> -> vector<8x640xf32>
    %9 = tpu.iota {dimensions = array<i32: 0>} : vector<8x640xi32>
    %c5_i32 = arith.constant 5 : i32
    %10 = vector.broadcast %c5_i32 : i32 to vector<8x640xi32>
    %11 = arith.cmpi slt, %9, %10 : vector<8x640xi32>
    %cst_8 = arith.constant -1.000000e+30 : f32
    %12 = vector.broadcast %cst_8 : f32 to vector<8x640xf32>
    %13 = arith.select %11, %8, %12 : vector<8x640xi1>, vector<8x640xf32>
    %cst_9 = arith.constant dense<0xFF800000> : vector<640xf32>
    %14 = vector.multi_reduction <maximumf>, %13, %cst_9 [0] : vector<8x640xf32> to vector<640xf32>
    %15 = vector.shape_cast %14 : vector<640xf32> to vector<1x640xf32>
    %16 = vector.broadcast %15 : vector<1x640xf32> to vector<8x640xf32>
    %17 = arith.subf %13, %16 : vector<8x640xf32>
    %18 = math.exp %17 : vector<8x640xf32>
    %cst_10 = arith.constant dense<0.000000e+00> : vector<640xf32>
    %19 = vector.multi_reduction <add>, %18, %cst_10 [0] : vector<8x640xf32> to vector<640xf32>
    %20 = vector.shape_cast %19 : vector<640xf32> to vector<1x640xf32>
    %21 = math.log %20 : vector<1x640xf32>
    %22 = arith.addf %15, %21 : vector<1x640xf32>
    %c0_11 = arith.constant 0 : index
    %c0_12 = arith.constant 0 : index
    %c0_13 = arith.constant 0 : index
    %23 = vector.load %arg5[%c0_11, %c0_12, %c0_13] : memref<1x1x640xi32, #tpu.memory_space<vmem>>, vector<1x1x640xi32>
    %24 = vector.shape_cast %23 : vector<1x1x640xi32> to vector<1x640xi32>
    %25 = vector.broadcast %24 : vector<1x640xi32> to vector<8x640xi32>
    %26 = arith.cmpi eq, %9, %25 : vector<8x640xi32>
    %cst_14 = arith.constant 0.000000e+00 : f32
    %27 = vector.broadcast %cst_14 : f32 to vector<8x640xf32>
    %28 = arith.select %26, %13, %27 : vector<8x640xi1>, vector<8x640xf32>
    %cst_15 = arith.constant dense<0.000000e+00> : vector<640xf32>
    %29 = vector.multi_reduction <add>, %28, %cst_15 [0] : vector<8x640xf32> to vector<640xf32>
    %30 = vector.shape_cast %29 : vector<640xf32> to vector<1x640xf32>
    %31 = tpu.iota {dimensions = array<i32: 1>} : vector<1x640xi32>
    %c640_i32 = arith.constant 640 : i32
    %32 = arith.muli %arg1, %c640_i32 : i32
    %33 = vector.broadcast %32 : i32 to vector<1x640xi32>
    %34 = arith.addi %33, %31 : vector<1x640xi32>
    %c529_i32 = arith.constant 529 : i32
    %35 = vector.broadcast %c529_i32 : i32 to vector<1x640xi32>
    %36 = arith.cmpi slt, %34, %35 : vector<1x640xi32>
    %37 = arith.subf %22, %30 : vector<1x640xf32>
    %cst_16 = arith.constant 0.000000e+00 : f32
    %38 = vector.broadcast %cst_16 : f32 to vector<1x640xf32>
    %39 = arith.select %36, %37, %38 : vector<1x640xi1>, vector<1x640xf32>
    %cst_17 = arith.constant dense<0.000000e+00> : vector<1xf32>
    %40 = vector.multi_reduction <add>, %39, %cst_17 [1] : vector<1x640xf32> to vector<1xf32>
    %41 = vector.shape_cast %40 : vector<1xf32> to vector<1x1xf32>
    %42 = vector.shape_cast %41 : vector<1x1xf32> to vector<1x1xf32>
    %43 = vector.broadcast %42 : vector<1x1xf32> to vector<1x128xf32>
    %44 = vector.shape_cast %43 : vector<1x128xf32> to vector<1x1x1x128xf32>
    %c0_18 = arith.constant 0 : index
    %c0_19 = arith.constant 0 : index
    %c0_20 = arith.constant 0 : index
    %c0_21 = arith.constant 0 : index
    %45 = vector.load %arg6[%c0_18, %c0_19, %c0_20, %c0_21] : memref<1x1x1x128xf32, #tpu.memory_space<vmem>>, vector<1x1x1x128xf32>
    tpu.vector_store %arg6[%c0_18, %c0_19, %c0_20, %c0_21], %44 {strides = array<i32>} : memref<1x1x1x128xf32, #tpu.memory_space<vmem>>, vector<1x1x1x128xf32>,
    return
  }
  func.func @transform_0(%arg0: i32, %arg1: i32) -> (i32, i32, i32) {
    %c0_i32 = arith.constant 0 : i32
    %c0_i32_0 = arith.constant 0 : i32
    return %arg0, %c0_i32, %arg1 : i32, i32, i32
  }
  func.func @transform_1(%arg0: i32, %arg1: i32) -> (i32, i32) {
    %c0_i32 = arith.constant 0 : i32
    %c0_i32_0 = arith.constant 0 : i32
    %c0_i32_1 = arith.constant 0 : i32
    return %c0_i32, %c0_i32_0 : i32, i32
  }
  func.func @transform_2(%arg0: i32, %arg1: i32) -> (i32, i32) {
    %c0_i32 = arith.constant 0 : i32
    %c0_i32_0 = arith.constant 0 : i32
    %c0_i32_1 = arith.constant 0 : i32
    return %c0_i32, %c0_i32_0 : i32, i32
  }
  func.func @transform_3(%arg0: i32, %arg1: i32) -> (i32, i32, i32) {
    %c0_i32 = arith.constant 0 : i32
    %c0_i32_0 = arith.constant 0 : i32
    return %arg0, %c0_i32, %arg1 : i32, i32, i32
  }
  func.func @transform_4(%arg0: i32, %arg1: i32) -> (i32, i32, i32, i32) {
    %c0_i32 = arith.constant 0 : i32
    %c0_i32_0 = arith.constant 0 : i32
    %c0_i32_1 = arith.constant 0 : i32
    return %arg0, %arg1, %c0_i32, %c0_i32_0 : i32, i32, i32, i32
  }
}

</mosaic_0001>

<bundles_post_ra>
// kernel: tpu_custom_call.1
= control target key start
LH: loop header
LB: loop body
LE: loop exit
PB: predicated region body
PF: predicated region fallthrough
CT: control target
= control target key end

     0   :  { %s8258_s0 = inlined_call_operand.hbm [shape: bf16[2,512,640], index: 0, kind: input, shape index: {}]   ;;  %s8259_s1 = inlined_call_operand.hbm [shape: bf16[512,512], index: 1, kind: input, shape index: {}]   ;;  %s8260_s2 = inlined_call_operand.hbm [shape: bf16[8,512], index: 2, kind: input, shape index: {}]   ;;  %s8261_s3 = inlined_call_operand.hbm [shape: s32[2,1,640], index: 3, kind: input, shape index: {}]   ;;  %s8262_s4 = inlined_call_operand.hbm [shape: f32[2,1,1,128], index: 4, kind: output, shape index: {}]  }
   0x1   :  { %8275 = sst [smem:[#allocation53_spill]] %s8258_s0 }
   0x2   :  { %8276 = sst [smem:[#allocation54_spill]] %s8259_s1 }
   0x3   :  { %8277 = sst [smem:[#allocation55_spill]] %s8260_s2 }
   0x4   :  { %9 = vsyncpa [#allocation3], 0 }
   0x5   :  { %11 = vsyncpa [#allocation3 + $0x1], 0 }
   0x6   :  { %12 = vsyncpa [#allocation6], 0 }
   0x7   :  { %13 = vsyncpa [#allocation9], 0 }
   0x8   :  { %15 = vsyncpa [#allocation9 + $0x1], 0 }
   0x9   :  { %16 = vsyncpa [#allocation4], 0 }
   0xa   :  { %18 = vsyncpa [#allocation4 + $0x1], 0  ;;  %s6878_s15 = smov 0   ;;  %s6880_s16 = smov 0  }
   0xb   :  { %s6882_s17 = smov 0   ;;  %s6884_s18 = smov 0  }
   0xc   :  { %s6886_s19 = smov 0   ;;  %s6888_s20 = smov 0  }
   0xd LB: > { %s5158_s21 = sadd.s32 4294967295, %s6841_s20   ;;  %s5159_s22 = sadd.s32 4294967294, %s6841_s20   ;;  %s6841_s20 = sphi %s6888_s20, %s24_s20   ;;  %s6837_s19 = sphi %s6886_s19, %s8379_s19   ;;  %s6833_s18 = sphi %s6884_s18, %s8378_s18   ;;  %s6829_s17 = sphi %s6882_s17, %s8377_s17   ;;  %s6825_s16 = sphi %s6880_s16, %s8376_s16   ;;  %s6821_s15 = sphi %s6878_s15, %s8375_s15  }
   0xe   : > { %p52_p0 = scmp.ne.s32.totalorder %s6829_s17, %s6825_s16  ;;  %p53_p1 = scmp.eq.s32.totalorder %s6841_s20, 0 }
   0xf   : > { %p58_p2 = scmp.ne.s32.totalorder %s6825_s16, %s6821_s15  ;;  %p6916_p3 = scmp.eq.s32.totalorder %s5158_s21, 0 }
  0x10   : > { %p154_p4 = scmp.eq.s32.totalorder %s5158_s21, 1  ;;  %p6920_p5 = por %p53_p1, %p52_p0 }
  0x11   : > { %s8278_s24 = scalar_select %p6916_p3, 1, 0 }
  0x12   : > { %p160_p6 = scmp.eq.s32.totalorder %s5159_s22, 1  ;;  %p6926_p7 = por %p6916_p3, %p58_p2 }
  0x13   : > { %p6930_p8 = por %p154_p4, %p52_p0  ;;  %p5160_p10 = scmp.ge.s32.totalorder %s6841_s20, 1 }
  0x14   : > { %s8280_s26 = scalar_select %p6926_p7, 1, 0 }
  0x15   : > { %s8281_s27 = scalar_select %p6930_p8, 1, 0 }
  0x16   : > { %p6934_p9 = por %p160_p6, %p58_p2  ;;  %p167_p11 = scmp.lt.s32.totalorder %s6841_s20, 3 }
  0x17   : > { %s6843_s30 = smov [#allocation5]   ;;  %s6844_s7 = smov [#allocation7]  }
  0x18   : > { %s8282_s28 = scalar_select %p6934_p9, 1, 0 }
  0x19   : > { %p6940_p12 = pnand %p5160_p10, %p167_p11  ;;  %s179_s5 = sshll.u32 %s6843_s30, 4  ;;  %s6944_s5 = int_to_ptr.vmem [resolvable:$true] %s179_s5 }
  0x1a   : > { %s193_s8 = sshll.u32 %s6844_s7, 4  ;;  %s8285_s1 = sld [smem:[#allocation54_spill]]  ;;  %s6955_s8 = int_to_ptr.vmem [resolvable:$true] %s193_s8 }
  0x1b   : > { %s8283_s29 = scalar_select %p6940_p12, 1, 0 }
  0x1c   : > { %p5952_p13 = pneg %p6940_p12 }
  0x1e   : > { %p6951_p1 = pnand %p5952_p13, %p6916_p3 }
  0x20   : > { %s6635_s12 = scalar_lea.hbm %s8285_s1, 16384  ;;  %p6637_p4 = pneg %p6951_p1 }
  0x21   : > { %p6636_p2 = scmp.ne.s32.totalorder %s8285_s1, %s6635_s12  ;;  %p6642_p11 = scmp.lt.u32.totalorder %s6635_s12, %s8285_s1 }
  0x23   : > { %p6638_p6 = pnand %p6637_p4, %p6636_p2 }
  0x25   : > { %p6639_p10 = pneg %p6638_p6 }
  0x27   : > { %p6644_p13 = pnand %p6642_p11, %p6639_p10 }
  0x29   : > { %6647 = shalt.err (!%p6644_p13)
}
  0x2a   : > { %s6648_s30 = scalar_lea.vmem %s6944_s5, 16384  ;;  %p6656_p3 = scmp.lt.s32.totalorder %s6944_s5, %s6944_s5 }
  0x2b   : > { %p6649_p0 = scmp.ne.s32.totalorder %s6944_s5, %s6648_s30  ;;  %p6657_p2 = scmp.lt.s32.totalorder %s6648_s30, %s6648_s30 }
  0x2d   : > { %p6651_p9 = pnand %p6649_p0, %p6637_p4  ;;  %p6658_p6 = por %p6657_p2, %p6656_p3 }
  0x2f   : > { %p6652_p8 = pneg %p6651_p9 }
  0x31   : > { %p6659_p7 = pnand %p6658_p6, %p6652_p8 }
  0x33   : > { %6662 = shalt.err (!%p6659_p7)
}
  0x34   : > { %s6845_s7 = smov 256   ;;  %s6846_s10 = smov 16  }
  0x35   : > { %5955 = dma.hbm_to_vmem [thread:$0]  (!%p6951_p1), %s8285_s1, 16384, %s6944_s5, [#allocation6], %s6845_s7, %s6845_s7, %s6846_s10  }
  0x36   : > { %s8286_s2 = sld [smem:[#allocation55_spill]] }
  0x3c   : > { %s6663_s21 = scalar_lea.hbm %s8286_s2, 256 }
  0x3d   : > { %p6664_p3 = scmp.ne.s32.totalorder %s8286_s2, %s6663_s21  ;;  %p6670_p9 = scmp.lt.u32.totalorder %s6663_s21, %s8286_s2 }
  0x3f   : > { %p6666_p7 = pnand %p6664_p3, %p6637_p4 }
  0x41   : > { %p6667_p8 = pneg %p6666_p7 }
  0x43   : > { %p6672_p0 = pnand %p6670_p9, %p6667_p8 }
  0x45   : > { %6675 = shalt.err (!%p6672_p0)
}
  0x46   : > { %s6676_s5 = scalar_lea.vmem %s6955_s8, 256  ;;  %p6684_p2 = scmp.lt.s32.totalorder %s6955_s8, %s6955_s8 }
  0x47   : > { %p6677_p10 = scmp.ne.s32.totalorder %s6955_s8, %s6676_s5  ;;  %p6685_p6 = scmp.lt.s32.totalorder %s6676_s5, %s6676_s5 }
  0x49   : > { %p6679_p11 = pnand %p6677_p10, %p6637_p4  ;;  %p6686_p3 = por %p6685_p6, %p6684_p2 }
  0x4b   : > { %p6680_p13 = pneg %p6679_p11 }
  0x4d   : > { %p6687_p7 = pnand %p6686_p3, %p6680_p13 }
  0x4f   : > { %6690 = shalt.err (!%p6687_p7)
}
  0x50   : > { %5958 = dma.hbm_to_vmem [thread:$0]  (!%p6951_p1), %s8286_s2, 256, %s6955_s8, [#allocation6]  }
  0x51   : > { %s8287_s7 = sadd.s32 1, %s6837_s19  ;;  %p5972_p8 = scmp.lt.s32.totalorder %s6841_s20, 2 }
  0x52   : > { %p38_p4 = scmp.ge.s32.totalorder %s8287_s7, 2  ;;  %s7014_s10 = sand.u32 1, %s6829_s17  }
  0x53   : > { %s5933_s6 = smul.u32 20480, %s6837_s19  ;;  %s8288_s11 = smov %s8287_s7 }
  0x54   : > { %s8381_s11 = smov (%p38_p4, %s8288_s11), 0  ;;  %s5932_s12 = smul.u32 1280, %s7014_s10 }
  0x55   : > { %s40_s13 = ssub.s32 %s6837_s19, %s8381_s11  ;;  %s8289_s0 = sld [smem:[#allocation53_spill]] }
  0x56   : > { %p43_p1 = scmp.eq.s32.totalorder %s40_s13, 0  ;;  %s208_s8 = scalar_lea.vmem [#allocation2], %s5932_s12 }
  0x57   : > { %s217_s30 = sshll.u32 %s208_s8, 4  ;;  %p7031_p9 = pnand %p5972_p8, %p6920_p5  ;;  %s7040_s30 = int_to_ptr.vmem [resolvable:$true] %s217_s30 }
  0x58   : > { %s8291_s23 = sadd.s32 1, %s6829_s17  ;;  %s205_s7 = scalar_lea.sflag [#allocation3], %s7014_s10 }
  0x59   : > { %s7038_s9 = scalar_select %p43_p1, %s6829_s17, %s8291_s23  }
  0x5a   : > { %p6693_p10 = pneg %p7031_p9 }
  0x5b   : > { %s7027_s22 = scalar_lea.hbm %s8289_s0, %s5933_s6  ;;  %s6696_s13 = scalar_lea.hbm %s8289_s0, 40960 }
  0x5c   : > { %s6691_s6 = scalar_lea.hbm %s7027_s22, 20480  ;;  %p6697_p5 = scmp.lt.u32.totalorder %s7027_s22, %s8289_s0 }
  0x5d   : > { %p6692_p0 = scmp.ne.s32.totalorder %s7027_s22, %s6691_s6  ;;  %p6698_p2 = scmp.lt.u32.totalorder %s6696_s13, %s6691_s6 }
  0x5e   : > { %p6700_p3 = scmp.lt.u32.totalorder %s6691_s6, %s7027_s22 }
  0x5f   : > { %p6694_p11 = pnand %p6693_p10, %p6692_p0  ;;  %p6699_p6 = por %p6698_p2, %p6697_p5 }
  0x61   : > { %p6695_p13 = pneg %p6694_p11  ;;  %p6701_p7 = por %p6700_p3, %p6699_p6 }
  0x63   : > { %p6702_p4 = pnand %p6701_p7, %p6695_p13 }
  0x65   : > { %6705 = shalt.err (!%p6702_p4)
}
  0x66   : > { %s6706_s8 = scalar_lea.vmem %s7040_s30, 20480  ;;  %s6847_s23 = smov [#allocation2]  }
  0x67   : > { %p6707_p8 = scmp.ne.s32.totalorder %s7040_s30, %s6706_s8  ;;  %s6711_s25 = sshll.u32 %s6847_s23, 4  ;;  %s6712_s25 = int_to_ptr.vmem [resolvable:$false] %s6711_s25 }
  0x68   : > { %s6713_s12 = scalar_lea.vmem %s6712_s25, 40960  ;;  %p6714_p11 = scmp.lt.s32.totalorder %s7040_s30, %s6712_s25 }
  0x69   : > { %p6709_p1 = pnand %p6707_p8, %p6693_p10  ;;  %p6715_p5 = scmp.lt.s32.totalorder %s6713_s12, %s6706_s8 }
  0x6b   : > { %p6710_p0 = pneg %p6709_p1  ;;  %p6716_p2 = por %p6715_p5, %p6714_p11 }
  0x6d   : > { %p6717_p6 = pnand %p6716_p2, %p6710_p0 }
  0x6f   : > { %6720 = shalt.err (!%p6717_p6)
}
  0x70   : > { %s6848_s6 = smov 320   ;;  %s6849_s13 = smov 20  }
  0x71   : > { %5962 = dma.hbm_to_vmem [thread:$0]  (!%p7031_p9), %s7027_s22, 20480, %s7040_s30, %s205_s7, %s6848_s6, %s6848_s6, %s6849_s13  }
  0x72   : > { %s5934_s14 = smul.u32 5, %s7014_s10  ;;  %s228_s1 = scalar_lea.sflag [#allocation9], %s7014_s10 }
  0x73   : > { %s5935_s21 = smul.u32 80, %s6837_s19  ;;  %s6726_s7 = scalar_lea.hbm %s8261_s3, 160 }
  0x74   : > { %s231_s12 = scalar_lea.vmem [#allocation8], %s5934_s14 }
  0x75   : > { %s7075_s25 = scalar_lea.hbm %s8261_s3, %s5935_s21  ;;  %s241_s0 = sshll.u32 %s231_s12, 4  ;;  %s242_s0 = int_to_ptr.vmem [resolvable:$true] %s241_s0 }
  0x76   : > { %s6721_s2 = scalar_lea.hbm %s7075_s25, 80  ;;  %p6727_p4 = scmp.lt.u32.totalorder %s7075_s25, %s8261_s3 }
  0x77   : > { %p6722_p13 = scmp.ne.s32.totalorder %s7075_s25, %s6721_s2  ;;  %p6728_p8 = scmp.lt.u32.totalorder %s6726_s7, %s6721_s2 }
  0x78   : > { %p6730_p0 = scmp.lt.u32.totalorder %s6721_s2, %s7075_s25 }
  0x79   : > { %p6724_p3 = pnand %p6722_p13, %p6693_p10  ;;  %p6729_p1 = por %p6728_p8, %p6727_p4 }
  0x7b   : > { %p6725_p7 = pneg %p6724_p3  ;;  %p6731_p11 = por %p6730_p0, %p6729_p1 }
  0x7d   : > { %p6732_p5 = pnand %p6731_p11, %p6725_p7 }
  0x7f   : > { %6735 = shalt.err (!%p6732_p5)
}
  0x80   : > { %s6736_s10 = scalar_lea.vmem %s242_s0, 80  ;;  %s6850_s14 = smov [#allocation8]  }
  0x81   : > { %p6737_p2 = scmp.ne.s32.totalorder %s242_s0, %s6736_s10  ;;  %s6741_s21 = sshll.u32 %s6850_s14, 4  ;;  %s6742_s21 = int_to_ptr.vmem [resolvable:$false] %s6741_s21 }
  0x82   : > { %s6743_s23 = scalar_lea.vmem %s6742_s21, 160  ;;  %p6744_p3 = scmp.lt.s32.totalorder %s242_s0, %s6742_s21 }
  0x83   : > { %p6739_p6 = pnand %p6737_p2, %p6693_p10  ;;  %p6745_p12 = scmp.lt.s32.totalorder %s6743_s23, %s6736_s10 }
  0x85   : > { %p6740_p13 = pneg %p6739_p6  ;;  %p6746_p4 = por %p6745_p12, %p6744_p3 }
  0x87   : > { %p6747_p8 = pnand %p6746_p4, %p6740_p13 }
  0x89   : > { %6750 = shalt.err (!%p6747_p8)
}
  0x8a   : > { %5965 = dma.hbm_to_vmem [thread:$0]  (!%p7031_p9), %s7075_s25, 80, %s242_s0, %s228_s1  }
  0x8b   : > { %p8292_p7 = scmp.ne.s32.totalorder %s8283_s29, 0 }
  0x8d   : > { %250 = sbr.rel (%p8292_p7) target bundleno = 1776 (0x6f0), region = 36 }
  0x94   : > { %s7100_s2 = sand.u32 1, %s6825_s16   ;;  %p8293_p12 = scmp.ne.s32.totalorder %s8280_s26, 0 }
  0x95   : > { %s5936_s8 = smul.u32 1280, %s7100_s2  ;;  %s253_s12 = scalar_lea.sflag [#allocation3], %s7100_s2 }
  0x97   : > { %s7104_s22 = scalar_lea.vmem [#allocation2], %s5936_s8 }
  0x98   : > { %6804 = dma.done.wait (%p8293_p12), %s253_s12, 20480  }
  0x99   : > { %6806 = vsyncadd (%p8293_p12), %s253_s12, 4294946816  ;;  %p8294_p9 = scmp.ne.s32.totalorder %s8278_s24, 0 }
  0x9b   : > { %6808 = dma.done.wait (%p8294_p9), [#allocation6], 16640  }
  0x9c   : > { %6810 = vsyncadd (%p8294_p9), [#allocation6], 4294950656  ;;  %s5937_s0 = smul.u32 5, %s7100_s2  ;;  %s270_s1 = scalar_lea.sflag [#allocation9], %s7100_s2 }
  0x9e   : > { %s7116_s29 = scalar_lea.vmem [#allocation8], %s5937_s0 }
  0x9f   : > { %6812 = dma.done.wait (%p8293_p12), %s270_s1, 80  }
  0xa0   : > { %6814 = vsyncadd (%p8293_p12), %s270_s1, 4294967216  ;;  %v6031_v0 = vld [vmem:[%s7104_s22 + $0x4] ss:$20 sps:$4 sm:$0xff]   ;;  %v6033_v1 = vld [vmem:[%s7104_s22] ss:$20 sps:$4 sm:$0xff]   ;;  %s301_s24 = scalar_lea.vmem [#allocation10], %s7100_s2 }
  0xa1   : > { %2097 = vmatprep.subr.bf16.mxu0 %v6031_v0  ;;  %5508 = vmatprep.subr.bf16.mxu1 %v6031_v0  ;;  %v6034_v2 = vld [vmem:[%s7104_s22 + $0x2c] ss:$20 sps:$4 sm:$0xff]   ;;  %v6036_v3 = vld [vmem:[%s7104_s22 + $0x28] ss:$20 sps:$4 sm:$0xff]   ;;  %v6039_v5 = vld [vmem:[%s7104_s22 + $0x50] ss:$20 sps:$4 sm:$0xff]  }
  0xa2   : > { %2098 = vmatpush1.bf16.msra.mxu0 %v6033_v1  ;;  %5524 = vmatpush1.bf16.msra.mxu1 %v6033_v1  ;;  %v6037_v4 = vld [vmem:[%s7104_s22 + $0x54] ss:$20 sps:$4 sm:$0xff]   ;;  %v6040_v6 = vld [vmem:[%s7104_s22 + $0x7c] ss:$20 sps:$4 sm:$0xff]   ;;  %v6042_v7 = vld [vmem:[%s7104_s22 + $0x78] ss:$20 sps:$4 sm:$0xff]  }
  0xa3   : > { %2099 = vmatprep.subr.bf16.mxu0 %v6034_v2  ;;  %5509 = vmatprep.subr.bf16.mxu1 %v6034_v2  ;;  %v6043_v8 = vld [vmem:[%s7104_s22 + $0xa4] ss:$20 sps:$4 sm:$0xff]   ;;  %v6045_v9 = vld [vmem:[%s7104_s22 + $0xa0] ss:$20 sps:$4 sm:$0xff]   ;;  %v6048_v11 = vld [vmem:[%s7104_s22 + $0xc8] ss:$20 sps:$4 sm:$0xff]  }
  0xa4   : > { %v6046_v10 = vld [vmem:[%s7104_s22 + $0xcc] ss:$20 sps:$4 sm:$0xff]   ;;  %v6049_v12 = vld [vmem:[%s7104_s22 + $0xf4] ss:$20 sps:$4 sm:$0xff]   ;;  %v6051_v14 = vld [vmem:[%s7104_s22 + $0xf0] ss:$20 sps:$4 sm:$0xff]  }
  0xa5   : > { %v6079_v13 = vld [vmem:[#allocation5 + $0x4] ss:$16 sps:$4 sm:$0xff]   ;;  %v6052_v16 = vld [vmem:[%s7104_s22 + $0x11c] ss:$20 sps:$4 sm:$0xff]   ;;  %v6054_v17 = vld [vmem:[%s7104_s22 + $0x118] ss:$20 sps:$4 sm:$0xff]  }
  0xa6   : > { %2100 = vmatpush1.bf16.msra.mxu0 %v6036_v3  ;;  %5525 = vmatpush1.bf16.msra.mxu1 %v6036_v3  ;;  %v6081_v15 = vld [vmem:[#allocation5 + $0x224] ss:$16 sps:$4 sm:$0xff]   ;;  %v6058_v20 = vld [vmem:[%s7104_s22 + $0x16c] ss:$20 sps:$4 sm:$0xff]   ;;  %v6060_v21 = vld [vmem:[%s7104_s22 + $0x168] ss:$20 sps:$4 sm:$0xff]  }
  0xa7   : > { %2101 = vmatprep.subr.bf16.mxu0 %v6037_v4  ;;  %5510 = vmatprep.subr.bf16.mxu1 %v6037_v4  ;;  %v6055_v18 = vld [vmem:[%s7104_s22 + $0x144] ss:$20 sps:$4 sm:$0xff]   ;;  %v6057_v19 = vld [vmem:[%s7104_s22 + $0x140] ss:$20 sps:$4 sm:$0xff]   ;;  %v6064_v24 = vld [vmem:[%s7104_s22 + $0x1bc] ss:$20 sps:$4 sm:$0xff]  }
  0xa8   : > { %2129 = vmatprep.mubr.bf16.mxu0 %v6079_v13  ;;  %2299 = vmatprep.mubr.bf16.mxu1 %v6081_v15  ;;  %v6061_v22 = vld [vmem:[%s7104_s22 + $0x194] ss:$20 sps:$4 sm:$0xff]   ;;  %v6063_v23 = vld [vmem:[%s7104_s22 + $0x190] ss:$20 sps:$4 sm:$0xff]   ;;  %v6066_v25 = vld [vmem:[%s7104_s22 + $0x1b8] ss:$20 sps:$4 sm:$0xff]  }
  0xa9   : > { %v6067_v26 = vld [vmem:[%s7104_s22 + $0x1e4] ss:$20 sps:$4 sm:$0xff]   ;;  %v6069_v27 = vld [vmem:[%s7104_s22 + $0x1e0] ss:$20 sps:$4 sm:$0xff]   ;;  %v6072_v29 = vld [vmem:[%s7104_s22 + $0x208] ss:$20 sps:$4 sm:$0xff]  }
  0xaa   : > { %2102 = vmatpush1.bf16.msra.mxu0 %v6039_v5  ;;  %5526 = vmatpush1.bf16.msra.mxu1 %v6039_v5  ;;  %v6070_v28 = vld [vmem:[%s7104_s22 + $0x20c] ss:$20 sps:$4 sm:$0xff]   ;;  %v6073_v30 = vld [vmem:[%s7104_s22 + $0x234] ss:$20 sps:$4 sm:$0xff]   ;;  %v6075_v31 = vld [vmem:[%s7104_s22 + $0x230] ss:$20 sps:$4 sm:$0xff]  }
  0xab   : > { %2103 = vmatprep.subr.bf16.mxu0 %v6040_v6  ;;  %5511 = vmatprep.subr.bf16.mxu1 %v6040_v6  ;;  %v6076_v32 = vld [vmem:[%s7104_s22 + $0x25c] ss:$20 sps:$4 sm:$0xff]   ;;  %v6078_v33 = vld [vmem:[%s7104_s22 + $0x258] ss:$20 sps:$4 sm:$0xff]   ;;  %v6085_v38 = vld [vmem:[%s7104_s22 + $0x280] ss:$20 sps:$4 sm:$0xff]  }
  0xac   : > { %v6087_v34 = vld [vmem:[%s7104_s22 + $0x284] ss:$20 sps:$4 sm:$0xff]   ;;  %v6150_v35 = vld [vmem:[%s7104_s22 + $0xc] ss:$20 sps:$4 sm:$0xff]   ;;  %v6148_v42 = vld [vmem:[%s7104_s22 + $0x8] ss:$20 sps:$4 sm:$0xff]  }
  0xad   : > { %v7156_v36 = vld [vmem:[#allocation5] ss:$16 sps:$4 sm:$0xff]   ;;  %v7159_v39 = vld [vmem:[#allocation5 + $0x24] ss:$16 sps:$4 sm:$0xff]   ;;  %v6094_v44 = vld [vmem:[%s7104_s22 + $0x2a8] ss:$20 sps:$4 sm:$0xff]  }
  0xae   : > { %2104 = vmatpush1.bf16.msra.mxu0 %v6042_v7  ;;  %5527 = vmatpush1.bf16.msra.mxu1 %v6042_v7  ;;  %v6084_v37 = vld [vmem:[#allocation5 + $0x220] ss:$16 sps:$4 sm:$0xff]   ;;  %v6090_v40 = vld [vmem:[#allocation5 + $0x244] ss:$16 sps:$4 sm:$0xff]   ;;  %v6163_v54 = vld [vmem:[%s7104_s22 + $0x58] ss:$20 sps:$4 sm:$0xff]  }
  0xaf   : > { %2105 = vmatprep.subr.bf16.mxu0 %v6043_v8  ;;  %5512 = vmatprep.subr.bf16.mxu1 %v6043_v8  ;;  %v6096_v41 = vld [vmem:[%s7104_s22 + $0x2ac] ss:$20 sps:$4 sm:$0xff]   ;;  %v6156_v43 = vld [vmem:[%s7104_s22 + $0x34] ss:$20 sps:$4 sm:$0xff]   ;;  %v6154_v48 = vld [vmem:[%s7104_s22 + $0x30] ss:$20 sps:$4 sm:$0xff]  }
  0xb0   : > { %v7167_v45 = vld [vmem:[#allocation5 + $0x20] ss:$16 sps:$4 sm:$0xff]   ;;  %v6105_v47 = vld [vmem:[%s7104_s22 + $0x2d4] ss:$20 sps:$4 sm:$0xff]   ;;  %v6171_v55 = vld [vmem:[%s7104_s22 + $0x84] ss:$20 sps:$4 sm:$0xff]  }
  0xb1   : > { %v6093_v46 = vld [vmem:[#allocation5 + $0x240] ss:$16 sps:$4 sm:$0xff]   ;;  %v7171_v49 = vld [vmem:[#allocation5 + $0x44] ss:$16 sps:$4 sm:$0xff]   ;;  %v6112_v56 = vld [vmem:[%s7104_s22 + $0x2f8] ss:$20 sps:$4 sm:$0xff]  }
  0xb2   : > { %2106 = vmatpush1.bf16.msra.mxu0 %v6045_v9  ;;  %5528 = vmatpush1.bf16.msra.mxu1 %v6045_v9  ;;  %v6099_v50 = vld [vmem:[#allocation5 + $0x264] ss:$16 sps:$4 sm:$0xff]   ;;  %v6114_v52 = vld [vmem:[%s7104_s22 + $0x2fc] ss:$20 sps:$4 sm:$0xff]   ;;  %v6132_v0 = vld [vmem:[%s7104_s22 + $0x34c] ss:$20 sps:$4 sm:$0xff]  }
  0xb3   : > { %2107 = vmatprep.subr.bf16.mxu0 %v6046_v10  ;;  %5513 = vmatprep.subr.bf16.mxu1 %v6046_v10  ;;  %v6103_v51 = vld [vmem:[%s7104_s22 + $0x2d0] ss:$20 sps:$4 sm:$0xff]   ;;  %v6169_v60 = vld [vmem:[%s7104_s22 + $0x80] ss:$20 sps:$4 sm:$0xff]   ;;  %v6178_v2 = vld [vmem:[%s7104_s22 + $0xa8] ss:$20 sps:$4 sm:$0xff]  }
  0xb4   : > { %v6165_v53 = vld [vmem:[%s7104_s22 + $0x5c] ss:$20 sps:$4 sm:$0xff]   ;;  %v6123_v59 = vld [vmem:[%s7104_s22 + $0x324] ss:$20 sps:$4 sm:$0xff]   ;;  %v6121_v63 = vld [vmem:[%s7104_s22 + $0x320] ss:$20 sps:$4 sm:$0xff]  }
  0xb5   : > { %v7181_v57 = vld [vmem:[#allocation5 + $0x40] ss:$16 sps:$4 sm:$0xff]   ;;  %v7185_v61 = vld [vmem:[#allocation5 + $0x64] ss:$16 sps:$4 sm:$0xff]   ;;  %v6130_v6 = vld [vmem:[%s7104_s22 + $0x348] ss:$20 sps:$4 sm:$0xff]  }
  0xb6   : > { %2108 = vmatpush1.bf16.msra.mxu0 %v6048_v11  ;;  %5529 = vmatpush1.bf16.msra.mxu1 %v6048_v11  ;;  %v6102_v58 = vld [vmem:[#allocation5 + $0x260] ss:$16 sps:$4 sm:$0xff]   ;;  %v6108_v62 = vld [vmem:[#allocation5 + $0x284] ss:$16 sps:$4 sm:$0xff]   ;;  %s5035_s26 = sshll.u32 %s301_s24, 4  ;;  %s5461_s5 = sshll.u32 %s6833_s18, 4  ;;  %s8206_s26 = int_to_ptr.vmem [resolvable:$true] %s5035_s26 }
  0xb7   : > { %2109 = vmatprep.subr.bf16.mxu0 %v6049_v12  ;;  %5514 = vmatprep.subr.bf16.mxu1 %v6049_v12  ;;  %v6180_v1 = vld [vmem:[%s7104_s22 + $0xac] ss:$20 sps:$4 sm:$0xff]   ;;  %v6183_v3 = vld [vmem:[%s7104_s22 + $0xd4] ss:$20 sps:$4 sm:$0xff]   ;;  %v6181_v8 = vld [vmem:[%s7104_s22 + $0xd0] ss:$20 sps:$4 sm:$0xff]   ;;  %s8211_s7 = scalar_lea.hbm %s8262_s4, %s5461_s5 }
  0xb8   : > { %v7194_v4 = vld [vmem:[#allocation5 + $0x60] ss:$16 sps:$4 sm:$0xff]   ;;  %v6141_v7 = vld [vmem:[%s7104_s22 + $0x374] ss:$20 sps:$4 sm:$0xff]   ;;  %v6198_v15 = vld [vmem:[%s7104_s22 + $0x124] ss:$20 sps:$4 sm:$0xff]  }
  0xb9   : > { %v6111_v5 = vld [vmem:[#allocation5 + $0x280] ss:$16 sps:$4 sm:$0xff]   ;;  %v7199_v9 = vld [vmem:[#allocation5 + $0x84] ss:$16 sps:$4 sm:$0xff]   ;;  %s5022_s6 = scalar_lea.sflag [#allocation4], %s7100_s2  ;;  %s6751_s13 = scalar_lea.vmem %s8206_s26, 16 }
  0xba   : > { %2110 = vmatpush1.bf16.msra.mxu0 %v6051_v14  ;;  %5530 = vmatpush1.bf16.msra.mxu1 %v6051_v14  ;;  %v6117_v10 = vld [vmem:[#allocation5 + $0x2a4] ss:$16 sps:$4 sm:$0xff]   ;;  %v6153_v12 = vld [vmem:[%s7104_s22 + $0x39c] ss:$20 sps:$4 sm:$0xff]   ;;  %v6193_v14 = vld [vmem:[%s7104_s22 + $0xf8] ss:$20 sps:$4 sm:$0xff]   ;;  %p6752_p10 = scmp.ne.s32.totalorder %s8206_s26, %s6751_s13 }
  0xbb   : > { %2111 = vmatprep.subr.bf16.mxu0 %v6052_v16  ;;  %5515 = vmatprep.subr.bf16.mxu1 %v6052_v16  ;;  %v6139_v11 = vld [vmem:[%s7104_s22 + $0x370] ss:$20 sps:$4 sm:$0xff]   ;;  %v6151_v16 = vld [vmem:[%s7104_s22 + $0x398] ss:$20 sps:$4 sm:$0xff]   ;;  %p8372_p1 = scmp.ne.s32.totalorder %s8281_s27, 0  ;;  %s6852_s10 = smov [#allocation10]  }
  0xbc   : > { %v6195_v13 = vld [vmem:[%s7104_s22 + $0xfc] ss:$20 sps:$4 sm:$0xff]   ;;  %s6755_s18 = sshll.u32 %s6852_s10, 4  ;;  %s6756_s18 = int_to_ptr.vmem [resolvable:$false] %s6755_s18 }
  0xbd   : > { %p6753_p0 = pnand %p6752_p10, %p8372_p1  ;;  %s6757_s14 = scalar_lea.vmem %s6756_s18, 32 }
  0xbe   : > { %2112 = vmatpush1.bf16.msra.mxu0 %v6054_v17  ;;  %5531 = vmatpush1.bf16.msra.mxu1 %v6054_v17  ;;  %v7209_v17 = vld [vmem:[#allocation5 + $0x80] ss:$16 sps:$4 sm:$0xff]   ;;  %p6758_p5 = scmp.lt.s32.totalorder %s8206_s26, %s6756_s18  ;;  %p6759_p2 = scmp.lt.s32.totalorder %s6757_s14, %s6751_s13 }
  0xbf   : > { %2113 = vmatprep.subr.bf16.mxu0 %v6055_v18  ;;  %5516 = vmatprep.subr.bf16.mxu1 %v6055_v18  ;;  %v6120_v18 = vld [vmem:[#allocation5 + $0x2a0] ss:$16 sps:$4 sm:$0xff]   ;;  %p6754_p11 = pneg %p6753_p0 }
  0xc0   : > { %p6760_p6 = por %p6759_p2, %p6758_p5 }
  0xc2   : > { %2114 = vmatpush1.bf16.msra.mxu0 %v6057_v19  ;;  %5532 = vmatpush1.bf16.msra.mxu1 %v6057_v19  ;;  %v6168_v19 = vld [vmem:[%s7104_s22 + $0x3c4] ss:$20 sps:$4 sm:$0xff]   ;;  %p6761_p13 = pnand %p6760_p6, %p6754_p11 }
  0xc3   : > { %2115 = vmatprep.subr.bf16.mxu0 %v6058_v20  ;;  %5517 = vmatprep.subr.bf16.mxu1 %v6058_v20  ;;  %v6196_v20 = vld [vmem:[%s7104_s22 + $0x120] ss:$20 sps:$4 sm:$0xff]  }
  0xc6   : > { %2116 = vmatpush1.bf16.msra.mxu0 %v6060_v21  ;;  %5533 = vmatpush1.bf16.msra.mxu1 %v6060_v21  ;;  %v7213_v21 = vld [vmem:[#allocation5 + $0xa4] ss:$16 sps:$4 sm:$0xff]  }
  0xc7   : > { %2117 = vmatprep.subr.bf16.mxu0 %v6061_v22  ;;  %5518 = vmatprep.subr.bf16.mxu1 %v6061_v22  ;;  %v6126_v22 = vld [vmem:[#allocation5 + $0x2c4] ss:$16 sps:$4 sm:$0xff]  }
  0xca   : > { %2118 = vmatpush1.bf16.msra.mxu0 %v6063_v23  ;;  %5534 = vmatpush1.bf16.msra.mxu1 %v6063_v23  ;;  %v6166_v23 = vld [vmem:[%s7104_s22 + $0x3c0] ss:$20 sps:$4 sm:$0xff]  }
  0xcb   : > { %2119 = vmatprep.subr.bf16.mxu0 %v6064_v24  ;;  %5519 = vmatprep.subr.bf16.mxu1 %v6064_v24  ;;  %v6210_v24 = vld [vmem:[%s7104_s22 + $0x14c] ss:$20 sps:$4 sm:$0xff]  }
  0xce   : > { %2120 = vmatpush1.bf16.msra.mxu0 %v6066_v25  ;;  %5535 = vmatpush1.bf16.msra.mxu1 %v6066_v25  ;;  %v6186_v25 = vld [vmem:[%s7104_s22 + $0x3ec] ss:$20 sps:$4 sm:$0xff]  }
  0xcf   : > { %2121 = vmatprep.subr.bf16.mxu0 %v6067_v26  ;;  %5520 = vmatprep.subr.bf16.mxu1 %v6067_v26  ;;  %v6208_v26 = vld [vmem:[%s7104_s22 + $0x148] ss:$20 sps:$4 sm:$0xff]  }
  0xd2   : > { %2122 = vmatpush1.bf16.msra.mxu0 %v6069_v27  ;;  %5536 = vmatpush1.bf16.msra.mxu1 %v6069_v27  ;;  %v6213_v27 = vld [vmem:[%s7104_s22 + $0x174] ss:$20 sps:$4 sm:$0xff]  }
  0xd3   : > { %2123 = vmatprep.subr.bf16.mxu0 %v6070_v28  ;;  %5521 = vmatprep.subr.bf16.mxu1 %v6070_v28  ;;  %v6184_v28 = vld [vmem:[%s7104_s22 + $0x3e8] ss:$20 sps:$4 sm:$0xff]  }
  0xd6   : > { %2124 = vmatpush1.bf16.msra.mxu0 %v6072_v29  ;;  %5537 = vmatpush1.bf16.msra.mxu1 %v6072_v29  ;;  %v7223_v29 = vld [vmem:[#allocation5 + $0xa0] ss:$16 sps:$4 sm:$0xff]  }
  0xd7   : > { %2125 = vmatprep.subr.bf16.mxu0 %v6073_v30  ;;  %5522 = vmatprep.subr.bf16.mxu1 %v6073_v30  ;;  %v6129_v30 = vld [vmem:[#allocation5 + $0x2c0] ss:$16 sps:$4 sm:$0xff]  }
  0xda   : > { %2126 = vmatpush1.bf16.msra.mxu0 %v6075_v31  ;;  %5538 = vmatpush1.bf16.msra.mxu1 %v6075_v31  ;;  %v6201_v31 = vld [vmem:[%s7104_s22 + $0x414] ss:$20 sps:$4 sm:$0xff]  }
  0xdb   : > { %2127 = vmatprep.subr.bf16.mxu0 %v6076_v32  ;;  %5523 = vmatprep.subr.bf16.mxu1 %v6076_v32  ;;  %v6211_v32 = vld [vmem:[%s7104_s22 + $0x170] ss:$20 sps:$4 sm:$0xff]  }
  0xde   : > { %2128 = vmatpush1.bf16.msra.mxu0 %v6078_v33  ;;  %5539 = vmatpush1.bf16.msra.mxu1 %v6078_v33  ;;  %v7227_v33 = vld [vmem:[#allocation5 + $0xc4] ss:$16 sps:$4 sm:$0xff]  }
  0xdf   : > { %2450 = vmatprep.subr.bf16.mxu0 %v6087_v34  ;;  %2803 = vmatprep.subr.bf16.mxu1 %v6150_v35  ;;  %v6135_v34 = vld [vmem:[#allocation5 + $0x2e4] ss:$16 sps:$4 sm:$0xff]  }
  0xe0   : > { %v6199_v35 = vld [vmem:[%s7104_s22 + $0x410] ss:$20 sps:$4 sm:$0xff]  }
  0xe1   : > { %2130 = vmatmul.mubr.bf16.vlgmr.msra.gmra.mrb[0].mxu0 %v7156_v36  ;;  %2300 = vmatmul.mubr.bf16.vlgmr.msra.gmra.mrb[0].mxu1 %v6084_v37  ;;  %v6216_v37 = vld [vmem:[%s7104_s22 + $0x43c] ss:$20 sps:$4 sm:$0xff]  }
  0xe2   : > { %2451 = vmatpush1.bf16.msra.mxu0 %v6085_v38  ;;  %2139 = vmatprep.mubr.bf16.mxu0 %v7159_v39  ;;  %v6225_v38 = vld [vmem:[%s7104_s22 + $0x19c] ss:$20 sps:$4 sm:$0xff]  }
  0xe3   : > { %2309 = vmatprep.mubr.bf16.mxu1 %v6090_v40  ;;  %2452 = vmatprep.subr.bf16.mxu0 %v6096_v41  ;;  %v6223_v40 = vld [vmem:[%s7104_s22 + $0x198] ss:$20 sps:$4 sm:$0xff]  }
  0xe4   : > { %2804 = vmatpush1.bf16.msra.mxu1 %v6148_v42  ;;  %v6228_v41 = vld [vmem:[%s7104_s22 + $0x1c4] ss:$20 sps:$4 sm:$0xff]  }
  0xe5   : > { %2805 = vmatprep.subr.bf16.mxu1 %v6156_v43  ;;  %v6214_v42 = vld [vmem:[%s7104_s22 + $0x438] ss:$20 sps:$4 sm:$0xff]   ;;  %v7237_v43 = vld [vmem:[#allocation5 + $0xc0] ss:$16 sps:$4 sm:$0xff]  }
  0xe6   : > { %2453 = vmatpush1.bf16.msra.mxu0 %v6094_v44  ;;  %v6138_v44 = vld [vmem:[#allocation5 + $0x2e0] ss:$16 sps:$4 sm:$0xff]  }
  0xe7   : > { %2454 = vmatprep.subr.bf16.mxu0 %v6105_v47  ;;  %v6231_v47 = vld [vmem:[%s7104_s22 + $0x464] ss:$20 sps:$4 sm:$0xff]  }
  0xe8   : > { %2806 = vmatpush1.bf16.msra.mxu1 %v6154_v48  ;;  %v7241_v48 = vld [vmem:[#allocation5 + $0xe4] ss:$16 sps:$4 sm:$0xff]  }
  0xe9   : > { %2140 = vmatmul.mubr.bf16.gmra.mrb[4].mxu0 %v7167_v45  ;;  %2310 = vmatmul.mubr.bf16.gmra.mrb[4].mxu1 %v6093_v46  ;;  %v6226_v46 = vld [vmem:[%s7104_s22 + $0x1c0] ss:$20 sps:$4 sm:$0xff]  }
  0xea   : > { %2149 = vmatprep.mubr.bf16.mxu0 %v7171_v49  ;;  %2319 = vmatprep.mubr.bf16.mxu1 %v6099_v50  ;;  %v6144_v50 = vld [vmem:[#allocation5 + $0x304] ss:$16 sps:$4 sm:$0xff]  }
  0xeb   : > { %2455 = vmatpush1.bf16.msra.mxu0 %v6103_v51  ;;  %2807 = vmatprep.subr.bf16.mxu1 %v6165_v53  ;;  %v6229_v51 = vld [vmem:[%s7104_s22 + $0x460] ss:$20 sps:$4 sm:$0xff]   ;;  %v6238_v53 = vld [vmem:[%s7104_s22 + $0x1e8] ss:$20 sps:$4 sm:$0xff]  }
  0xec   : > { %2456 = vmatprep.subr.bf16.mxu0 %v6114_v52  ;;  %2808 = vmatpush1.bf16.msra.mxu1 %v6163_v54  ;;  %v6240_v52 = vld [vmem:[%s7104_s22 + $0x1ec] ss:$20 sps:$4 sm:$0xff]  }
  0xed   : > { %2809 = vmatprep.subr.bf16.mxu1 %v6171_v55  ;;  %v6250_v54 = vld [vmem:[%s7104_s22 + $0x48c] ss:$20 sps:$4 sm:$0xff]   ;;  %v6243_v55 = vld [vmem:[%s7104_s22 + $0x214] ss:$20 sps:$4 sm:$0xff]  }
  0xef   : > { %2457 = vmatpush1.bf16.msra.mxu0 %v6112_v56  ;;  %v7250_v56 = vld [vmem:[#allocation5 + $0xe0] ss:$16 sps:$4 sm:$0xff]  }
  0xf0   : > { %2458 = vmatprep.subr.bf16.mxu0 %v6123_v59  ;;  %2810 = vmatpush1.bf16.msra.mxu1 %v6169_v60  ;;  %v6248_v59 = vld [vmem:[%s7104_s22 + $0x488] ss:$20 sps:$4 sm:$0xff]   ;;  %v7255_v60 = vld [vmem:[#allocation5 + $0x104] ss:$16 sps:$4 sm:$0xff]  }
  0xf1   : > { %2150 = vmatmul.mubr.bf16.gmra.mrb[8].mxu0 %v7181_v57  ;;  %2320 = vmatmul.mubr.bf16.gmra.mrb[8].mxu1 %v6102_v58  ;;  %v7252_v58 = vld [vmem:[#allocation5 + $0x300] ss:$16 sps:$4 sm:$0xff]  }
  0xf2   : > { %2159 = vmatprep.mubr.bf16.mxu0 %v7185_v61  ;;  %2329 = vmatprep.mubr.bf16.mxu1 %v6108_v62  ;;  %v7257_v62 = vld [vmem:[#allocation5 + $0x324] ss:$16 sps:$4 sm:$0xff]  }
  0xf3   : > { %2459 = vmatpush1.bf16.msra.mxu0 %v6121_v63  ;;  %2811 = vmatprep.subr.bf16.mxu1 %v6180_v1  ;;  %v6241_v63 = vld [vmem:[%s7104_s22 + $0x210] ss:$20 sps:$4 sm:$0xff]  }
  0xf4   : > { %2460 = vmatprep.subr.bf16.mxu0 %v6132_v0  ;;  %2812 = vmatpush1.bf16.msra.mxu1 %v6178_v2  ;;  %v6263_v0 = vld [vmem:[%s7104_s22 + $0x4b4] ss:$20 sps:$4 sm:$0xff]   ;;  %v6255_v1 = vld [vmem:[%s7104_s22 + $0x23c] ss:$20 sps:$4 sm:$0xff]  }
  0xf5   : > { %2813 = vmatprep.subr.bf16.mxu1 %v6183_v3  ;;  %v6261_v2 = vld [vmem:[%s7104_s22 + $0x4b0] ss:$20 sps:$4 sm:$0xff]   ;;  %v6253_v3 = vld [vmem:[%s7104_s22 + $0x238] ss:$20 sps:$4 sm:$0xff]  }
  0xf7   : > { %2461 = vmatpush1.bf16.msra.mxu0 %v6130_v6  ;;  %v6258_v6 = vld [vmem:[%s7104_s22 + $0x264] ss:$20 sps:$4 sm:$0xff]  }
  0xf8   : > { %2462 = vmatprep.subr.bf16.mxu0 %v6141_v7  ;;  %2814 = vmatpush1.bf16.msra.mxu1 %v6181_v8  ;;  %v6256_v7 = vld [vmem:[%s7104_s22 + $0x260] ss:$20 sps:$4 sm:$0xff]   ;;  %v6268_v8 = vld [vmem:[%s7104_s22 + $0x4d8] ss:$20 sps:$4 sm:$0xff]  }
  0xf9   : > { %2160 = vmatmul.mubr.bf16.gmra.mrb[12].mxu0 %v7194_v4  ;;  %2330 = vmatmul.mubr.bf16.gmra.mrb[12].mxu1 %v6111_v5  ;;  %v6270_v5 = vld [vmem:[%s7104_s22 + $0x4dc] ss:$20 sps:$4 sm:$0xff]  }
  0xfa   : > { %2169 = vmatprep.mubr.bf16.mxu0 %v7199_v9  ;;  %2339 = vmatprep.mubr.bf16.mxu1 %v6117_v10  ;;  %v7272_v10 = vld [vmem:[#allocation5 + $0x100] ss:$16 sps:$4 sm:$0xff]  }
  0xfb   : > { %2463 = vmatpush1.bf16.msra.mxu0 %v6139_v11  ;;  %2815 = vmatprep.subr.bf16.mxu1 %v6195_v13  ;;  %v7274_v11 = vld [vmem:[#allocation5 + $0x320] ss:$16 sps:$4 sm:$0xff]   ;;  %v7278_v13 = vld [vmem:[#allocation5 + $0x344] ss:$16 sps:$4 sm:$0xff]  }
  0xfc   : > { %2464 = vmatprep.subr.bf16.mxu0 %v6153_v12  ;;  %2816 = vmatpush1.bf16.msra.mxu1 %v6193_v14  ;;  %v7276_v12 = vld [vmem:[#allocation5 + $0x124] ss:$16 sps:$4 sm:$0xff]   ;;  %v8268_v14 = vmov 0  }
  0xfd   : > { %2817 = vmatprep.subr.bf16.mxu1 %v6198_v15  ;;  %v7285_v15 = vld [vmem:[#allocation5 + $0x120] ss:$16 sps:$4 sm:$0xff]  }
  0xff   : > { %2465 = vmatpush1.bf16.msra.mxu0 %v6151_v16  ;;  %v7287_v16 = vld [vmem:[#allocation5 + $0x340] ss:$16 sps:$4 sm:$0xff]  }
 0x100   : > { %2466 = vmatprep.subr.bf16.mxu0 %v6168_v19  ;;  %2818 = vmatpush1.bf16.msra.mxu1 %v6196_v20  ;;  %v7291_v19 = vld [vmem:[#allocation5 + $0x364] ss:$16 sps:$4 sm:$0xff]   ;;  %v7297_v20 = vld [vmem:[#allocation5 + $0x140] ss:$16 sps:$4 sm:$0xff]  }
 0x101   : > { %2170 = vmatmul.mubr.bf16.gmra.mrb[16].mxu0 %v7209_v17  ;;  %2340 = vmatmul.mubr.bf16.gmra.mrb[16].mxu1 %v6120_v18  ;;  %v7289_v18 = vld [vmem:[#allocation5 + $0x144] ss:$16 sps:$4 sm:$0xff]  }
 0x102   : > { %2179 = vmatprep.mubr.bf16.mxu0 %v7213_v21  ;;  %2349 = vmatprep.mubr.bf16.mxu1 %v6126_v22  ;;  %v7299_v22 = vld [vmem:[#allocation5 + $0x360] ss:$16 sps:$4 sm:$0xff]  }
 0x103   : > { %2467 = vmatpush1.bf16.msra.mxu0 %v6166_v23  ;;  %2819 = vmatprep.subr.bf16.mxu1 %v6210_v24  ;;  %v7301_v23 = vld [vmem:[#allocation5 + $0x164] ss:$16 sps:$4 sm:$0xff]  }
 0x104   : > { %2468 = vmatprep.subr.bf16.mxu0 %v6186_v25  ;;  %2820 = vmatpush1.bf16.msra.mxu1 %v6208_v26  ;;  %v7303_v24 = vld [vmem:[#allocation5 + $0x384] ss:$16 sps:$4 sm:$0xff]   ;;  %v7309_v25 = vld [vmem:[#allocation5 + $0x160] ss:$16 sps:$4 sm:$0xff]  }
 0x105   : > { %2821 = vmatprep.subr.bf16.mxu1 %v6213_v27  ;;  %v7311_v26 = vld [vmem:[#allocation5 + $0x380] ss:$16 sps:$4 sm:$0xff]   ;;  %v7313_v27 = vld [vmem:[#allocation5 + $0x184] ss:$16 sps:$4 sm:$0xff]  }
 0x107   : > { %2469 = vmatpush1.bf16.msra.mxu0 %v6184_v28  ;;  %v7315_v28 = vld [vmem:[#allocation5 + $0x3a4] ss:$16 sps:$4 sm:$0xff]  }
 0x108   : > { %2470 = vmatprep.subr.bf16.mxu0 %v6201_v31  ;;  %2822 = vmatpush1.bf16.msra.mxu1 %v6211_v32  ;;  %v7323_v31 = vld [vmem:[#allocation5 + $0x3a0] ss:$16 sps:$4 sm:$0xff]   ;;  %v7325_v32 = vld [vmem:[#allocation5 + $0x1a4] ss:$16 sps:$4 sm:$0xff]  }
 0x109   : > { %2180 = vmatmul.mubr.bf16.gmra.mrb[20].mxu0 %v7223_v29  ;;  %2350 = vmatmul.mubr.bf16.gmra.mrb[20].mxu1 %v6129_v30  ;;  %v7321_v30 = vld [vmem:[#allocation5 + $0x180] ss:$16 sps:$4 sm:$0xff]  }
 0x10a   : > { %2189 = vmatprep.mubr.bf16.mxu0 %v7227_v33  ;;  %2359 = vmatprep.mubr.bf16.mxu1 %v6135_v34  ;;  %v7327_v34 = vld [vmem:[#allocation5 + $0x3c4] ss:$16 sps:$4 sm:$0xff]  }
 0x10b   : > { %2471 = vmatpush1.bf16.msra.mxu0 %v6199_v35  ;;  %2823 = vmatprep.subr.bf16.mxu1 %v6225_v38  ;;  %v7333_v35 = vld [vmem:[#allocation5 + $0x1a0] ss:$16 sps:$4 sm:$0xff]   ;;  %v7337_v38 = vld [vmem:[#allocation5 + $0x1c4] ss:$16 sps:$4 sm:$0xff]  }
 0x10c   : > { %2472 = vmatprep.subr.bf16.mxu0 %v6216_v37  ;;  %2824 = vmatpush1.bf16.msra.mxu1 %v6223_v40  ;;  %v7335_v37 = vld [vmem:[#allocation5 + $0x3c0] ss:$16 sps:$4 sm:$0xff]   ;;  %v7339_v40 = vld [vmem:[#allocation5 + $0x3e4] ss:$16 sps:$4 sm:$0xff]  }
 0x10d   : > { %2825 = vmatprep.subr.bf16.mxu1 %v6228_v41  ;;  %v7345_v41 = vld [vmem:[#allocation5 + $0x1c0] ss:$16 sps:$4 sm:$0xff]  }
 0x10f   : > { %2473 = vmatpush1.bf16.msra.mxu0 %v6214_v42  ;;  %v7347_v42 = vld [vmem:[#allocation5 + $0x3e0] ss:$16 sps:$4 sm:$0xff]  }
 0x110   : > { %2826 = vmatpush1.bf16.msra.mxu1 %v6226_v46  ;;  %2474 = vmatprep.subr.bf16.mxu0 %v6231_v47  ;;  %v7354_v46 = vld [vmem:[#allocation5 + $0x4] ss:$16 sps:$4 sm:$0xff]   ;;  %v7357_v47 = vld [vmem:[#allocation5 + $0x1e0] ss:$16 sps:$4 sm:$0xff]  }
 0x111   : > { %2190 = vmatmul.mubr.bf16.gmra.mrb[24].mxu0 %v7237_v43  ;;  %2360 = vmatmul.mubr.bf16.gmra.mrb[24].mxu1 %v6138_v44  ;;  %v7349_v44 = vld [vmem:[#allocation5 + $0x1e4] ss:$16 sps:$4 sm:$0xff]  }
 0x112   : > { %2199 = vmatprep.mubr.bf16.mxu0 %v7241_v48  ;;  %2369 = vmatprep.mubr.bf16.mxu1 %v6144_v50  ;;  %v7359_v50 = vld [vmem:[#allocation5 + $0x204] ss:$16 sps:$4 sm:$0xff]  }
 0x113   : > { %2475 = vmatpush1.bf16.msra.mxu0 %v6229_v51  ;;  %2827 = vmatprep.subr.bf16.mxu1 %v6240_v52  ;;  %v7365_v51 = vld [vmem:[#allocation5 + $0x200] ss:$16 sps:$4 sm:$0xff]   ;;  %v7367_v52 = vld [vmem:[#allocation5 + $0xc] ss:$16 sps:$4 sm:$0xff]  }
 0x114   : > { %2828 = vmatpush1.bf16.msra.mxu1 %v6238_v53  ;;  %2476 = vmatprep.subr.bf16.mxu0 %v6250_v54  ;;  %v7373_v53 = vld [vmem:[#allocation5 + $0x8] ss:$16 sps:$4 sm:$0xff]   ;;  %v7376_v54 = vld [vmem:[#allocation5 + $0x2c] ss:$16 sps:$4 sm:$0xff]  }
 0x115   : > { %2829 = vmatprep.subr.bf16.mxu1 %v6243_v55  ;;  %v6288_v55 = vld [vmem:[%s7104_s22 + $0x60] ss:$20 sps:$4 sm:$0xff]  }
 0x117   : > { %2477 = vmatpush1.bf16.msra.mxu0 %v6248_v59  ;;  %v7398_v59 = vld [vmem:[#allocation5 + $0x6c] ss:$16 sps:$4 sm:$0xff]  }
 0x118   : > { %2830 = vmatpush1.bf16.msra.mxu1 %v6241_v63  ;;  %2478 = vmatprep.subr.bf16.mxu0 %v6263_v0  ;;  %v6302_v63 = vld [vmem:[%s7104_s22 + $0xb0] ss:$20 sps:$4 sm:$0xff]   ;;  %v7410_v0 = vld [vmem:[#allocation5 + $0x8c] ss:$16 sps:$4 sm:$0xff]  }
 0x119   : > { %2200 = vmatmul.mubr.bf16.gmra.mrb[28].mxu0 %v7250_v56  ;;  %2370 = vmatmul.mubr.bf16.gmra.mrb[28].mxu1 %v7252_v58 }
 0x11a   : > { %2209 = vmatprep.mubr.bf16.mxu0 %v7255_v60  ;;  %2379 = vmatprep.mubr.bf16.mxu1 %v7257_v62 }
 0x11b   : > { %2831 = vmatprep.subr.bf16.mxu1 %v6255_v1  ;;  %2479 = vmatpush1.bf16.msra.mxu0 %v6261_v2  ;;  %v6316_v1 = vld [vmem:[%s7104_s22 + $0x100] ss:$20 sps:$4 sm:$0xff]   ;;  %v6323_v2 = vld [vmem:[%s7104_s22 + $0x128] ss:$20 sps:$4 sm:$0xff]  }
 0x11c   : > { %2832 = vmatpush1.bf16.msra.mxu1 %v6253_v3  ;;  %2480 = vmatprep.subr.bf16.mxu0 %v6270_v5  ;;  %v7422_v3 = vld [vmem:[#allocation5 + $0x88] ss:$16 sps:$4 sm:$0xff]   ;;  %v7424_v5 = vld [vmem:[#allocation5 + $0xac] ss:$16 sps:$4 sm:$0xff]  }
 0x11d   : > { %2833 = vmatprep.subr.bf16.mxu1 %v6258_v6  ;;  %v6349_v6 = vld [vmem:[%s7104_s22 + $0x2b4] ss:$20 sps:$4 sm:$0xff]  }
 0x11f   : > { %2481 = vmatpush1.bf16.msra.mxu0 %v6268_v8  ;;  %v6337_v8 = vld [vmem:[%s7104_s22 + $0x178] ss:$20 sps:$4 sm:$0xff]  }
 0x120   : > { %2834 = vmatpush1.bf16.msra.mxu1 %v6256_v7  ;;  %3509 = vmatprep.subr.bf16.mxu0 %v8268_v14  ;;  %v6353_v7 = vld [vmem:[%s7104_s22 + $0x2dc] ss:$20 sps:$4 sm:$0xff]  }
 0x121   : > { %2210 = vmatmul.mubr.bf16.gmra.mrb[32].mxu0 %v7272_v10  ;;  %2380 = vmatmul.mubr.bf16.gmra.mrb[32].mxu1 %v7274_v11 }
 0x122   : > { %2219 = vmatprep.mubr.bf16.mxu0 %v7276_v12  ;;  %2389 = vmatprep.mubr.bf16.mxu1 %v7278_v13 }
 0x129   : > { %2220 = vmatmul.mubr.bf16.gmra.mrb[36].mxu0 %v7285_v15  ;;  %2390 = vmatmul.mubr.bf16.gmra.mrb[36].mxu1 %v7287_v16 }
 0x12a   : > { %2229 = vmatprep.mubr.bf16.mxu0 %v7289_v18  ;;  %2399 = vmatprep.mubr.bf16.mxu1 %v7291_v19 }
 0x131   : > { %2230 = vmatmul.mubr.bf16.gmra.mrb[40].mxu0 %v7297_v20  ;;  %2400 = vmatmul.mubr.bf16.gmra.mrb[40].mxu1 %v7299_v22 }
 0x132   : > { %2239 = vmatprep.mubr.bf16.mxu0 %v7301_v23  ;;  %2409 = vmatprep.mubr.bf16.mxu1 %v7303_v24 }
 0x139   : > { %2240 = vmatmul.mubr.bf16.gmra.mrb[44].mxu0 %v7309_v25  ;;  %2410 = vmatmul.mubr.bf16.gmra.mrb[44].mxu1 %v7311_v26 }
 0x13a   : > { %2249 = vmatprep.mubr.bf16.mxu0 %v7313_v27  ;;  %2419 = vmatprep.mubr.bf16.mxu1 %v7315_v28 }
 0x141   : > { %2250 = vmatmul.mubr.bf16.gmra.mrb[48].mxu0 %v7321_v30  ;;  %2420 = vmatmul.mubr.bf16.gmra.mrb[48].mxu1 %v7323_v31 }
 0x142   : > { %2259 = vmatprep.mubr.bf16.mxu0 %v7325_v32  ;;  %2429 = vmatprep.mubr.bf16.mxu1 %v7327_v34 }
 0x149   : > { %2260 = vmatmul.mubr.bf16.gmra.mrb[52].mxu0 %v7333_v35  ;;  %2430 = vmatmul.mubr.bf16.gmra.mrb[52].mxu1 %v7335_v37 }
 0x14a   : > { %2269 = vmatprep.mubr.bf16.mxu0 %v7337_v38  ;;  %2439 = vmatprep.mubr.bf16.mxu1 %v7339_v40 }
 0x151   : > { %2270 = vmatmul.mubr.bf16.gmra.mrb[56].mxu0 %v7345_v41  ;;  %2440 = vmatmul.mubr.bf16.gmra.mrb[56].mxu1 %v7347_v42 }
 0x152   : > { %2279 = vmatprep.mubr.bf16.mxu0 %v7349_v44  ;;  %2835 = vmatprep.mubr.bf16.mxu1 %v7354_v46 }
 0x159   : > { %2280 = vmatmul.mubr.bf16.gmra.mrb[60].mxu0 %v7357_v47  ;;  %2836 = vmatmul.mubr.bf16.vlgmr.msra.gmra.mrb[60].mxu1 %v7156_v36  ;;  %v6274_v36 = vld [vmem:[%s7104_s22 + $0x10] ss:$20 sps:$4 sm:$0xff]  }
 0x15a   : > { %2289 = vmatprep.mubr.bf16.mxu0 %v7359_v50  ;;  %2845 = vmatprep.mubr.bf16.mxu1 %v7159_v39  ;;  %v6281_v39 = vld [vmem:[%s7104_s22 + $0x38] ss:$20 sps:$4 sm:$0xff]  }
 0x161   : > { %2290 = vmatmul.mubr.bf16.gmra.mrb[64].mxu0 %v7365_v51  ;;  %2846 = vmatmul.mubr.bf16.gmra.mrb[64].mxu1 %v7167_v45  ;;  %v7384_v45 = vld [vmem:[#allocation5 + $0x28] ss:$16 sps:$4 sm:$0xff]  }
 0x162   : > { %2482 = vmatprep.mubr.bf16.mxu0 %v7367_v52  ;;  %2855 = vmatprep.mubr.bf16.mxu1 %v7171_v49  ;;  %v7386_v49 = vld [vmem:[#allocation5 + $0x4c] ss:$16 sps:$4 sm:$0xff]  }
 0x169   : > { %2483 = vmatmul.mubr.bf16.vlgmr.msra.gmra.mrb[0].mxu0 %v7373_v53  ;;  %2856 = vmatmul.mubr.bf16.gmra.mrb[68].mxu1 %v7181_v57  ;;  %v6295_v57 = vld [vmem:[%s7104_s22 + $0x88] ss:$20 sps:$4 sm:$0xff]  }
 0x16a   : > { %3510 = vmatpush1.bf16.msra.mxu0 %v6274_v36  ;;  %2492 = vmatprep.mubr.bf16.mxu0 %v7376_v54  ;;  %v6351_v36 = vld [vmem:[%s7104_s22 + $0x2d8] ss:$20 sps:$4 sm:$0xff]  }
 0x16b   : > { %2865 = vmatprep.mubr.bf16.mxu1 %v7185_v61  ;;  %3511 = vmatprep.subr.bf16.mxu0 %v8268_v14  ;;  %v7396_v61 = vld [vmem:[#allocation5 + $0x48] ss:$16 sps:$4 sm:$0xff]  }
 0x16e   : > { %3512 = vmatpush1.bf16.msra.mxu0 %v6281_v39  ;;  %v7438_v39 = vld [vmem:[#allocation5 + $0xa8] ss:$16 sps:$4 sm:$0xff]  }
 0x16f   : > { %3513 = vmatprep.subr.bf16.mxu0 %v8268_v14 }
 0x171   : > { %2493 = vmatmul.mubr.bf16.gmra.mrb[4].mxu0 %v7384_v45  ;;  %2866 = vmatmul.mubr.bf16.gmra.mrb[72].mxu1 %v7194_v4  ;;  %v6309_v4 = vld [vmem:[%s7104_s22 + $0xd8] ss:$20 sps:$4 sm:$0xff]  }
 0x172   : > { %2502 = vmatprep.mubr.bf16.mxu0 %v7386_v49  ;;  %2875 = vmatprep.mubr.bf16.mxu1 %v7199_v9  ;;  %v7408_v9 = vld [vmem:[#allocation5 + $0x68] ss:$16 sps:$4 sm:$0xff]  }
 0x173   : > { %3514 = vmatpush1.bf16.msra.mxu0 %v6288_v55  ;;  %v6350_v55 = vld [vmem:[%s7104_s22 + $0x1a0] ss:$20 sps:$4 sm:$0xff]  }
 0x174   : > { %3515 = vmatprep.subr.bf16.mxu0 %v8268_v14 }
 0x177   : > { %3516 = vmatpush1.bf16.msra.mxu0 %v6295_v57  ;;  %v6357_v57 = vld [vmem:[%s7104_s22 + $0x300] ss:$20 sps:$4 sm:$0xff]  }
 0x178   : > { %3517 = vmatprep.subr.bf16.mxu0 %v8268_v14 }
 0x179   : > { %2503 = vmatmul.mubr.bf16.gmra.mrb[8].mxu0 %v7396_v61  ;;  %2876 = vmatmul.mubr.bf16.gmra.mrb[76].mxu1 %v7209_v17  ;;  %v6341_v17 = vld [vmem:[%s7104_s22 + $0x288] ss:$20 sps:$4 sm:$0xff]  }
 0x17a   : > { %2512 = vmatprep.mubr.bf16.mxu0 %v7398_v59  ;;  %2885 = vmatprep.mubr.bf16.mxu1 %v7213_v21  ;;  %v6343_v21 = vld [vmem:[%s7104_s22 + $0x28c] ss:$20 sps:$4 sm:$0xff]  }
 0x17b   : > { %3518 = vmatpush1.bf16.msra.mxu0 %v6302_v63  ;;  %3156 = vmatprep.subr.bf16.mxu1 %v6343_v21  ;;  %v6362_v63 = vld [vmem:[%s7104_s22 + $0x32c] ss:$20 sps:$4 sm:$0xff]   ;;  %v6369_v21 = vld [vmem:[%s7104_s22 + $0x1c8] ss:$20 sps:$4 sm:$0xff]  }
 0x17c   : > { %3519 = vmatprep.subr.bf16.mxu0 %v8268_v14  ;;  %3157 = vmatpush1.bf16.msra.mxu1 %v6341_v17  ;;  %v6368_v17 = vld [vmem:[%s7104_s22 + $0x354] ss:$20 sps:$4 sm:$0xff]  }
 0x17d   : > { %3158 = vmatprep.subr.bf16.mxu1 %v6349_v6  ;;  %v7467_v6 = vld [vmem:[#allocation5 + $0xe8] ss:$16 sps:$4 sm:$0xff]  }
 0x17f   : > { %3520 = vmatpush1.bf16.msra.mxu0 %v6309_v4  ;;  %v6360_v4 = vld [vmem:[%s7104_s22 + $0x328] ss:$20 sps:$4 sm:$0xff]  }
 0x180   : > { %3521 = vmatprep.subr.bf16.mxu0 %v8268_v14 }
 0x181   : > { %2513 = vmatmul.mubr.bf16.gmra.mrb[12].mxu0 %v7408_v9  ;;  %2886 = vmatmul.mubr.bf16.gmra.mrb[80].mxu1 %v7223_v29  ;;  %v6330_v29 = vld [vmem:[%s7104_s22 + $0x150] ss:$20 sps:$4 sm:$0xff]  }
 0x182   : > { %2522 = vmatprep.mubr.bf16.mxu0 %v7410_v0  ;;  %2895 = vmatprep.mubr.bf16.mxu1 %v7227_v33  ;;  %v6347_v33 = vld [vmem:[%s7104_s22 + $0x2b0] ss:$20 sps:$4 sm:$0xff]  }
 0x183   : > { %3522 = vmatpush1.bf16.msra.mxu0 %v6316_v1  ;;  %3159 = vmatpush1.bf16.msra.mxu1 %v6347_v33  ;;  %v7453_v1 = vld [vmem:[#allocation5 + $0xc8] ss:$16 sps:$4 sm:$0xff]  }
 0x184   : > { %3523 = vmatprep.subr.bf16.mxu0 %v8268_v14  ;;  %3160 = vmatprep.subr.bf16.mxu1 %v6353_v7  ;;  %v6378_v33 = vld [vmem:[%s7104_s22 + $0x3a4] ss:$20 sps:$4 sm:$0xff]   ;;  %v6381_v7 = vld [vmem:[%s7104_s22 + $0x3cc] ss:$20 sps:$4 sm:$0xff]  }
 0x187   : > { %3524 = vmatpush1.bf16.msra.mxu0 %v6323_v2  ;;  %3161 = vmatpush1.bf16.msra.mxu1 %v6351_v36  ;;  %v6372_v2 = vld [vmem:[%s7104_s22 + $0x37c] ss:$20 sps:$4 sm:$0xff]   ;;  %v7479_v36 = vld [vmem:[#allocation5 + $0x108] ss:$16 sps:$4 sm:$0xff]  }
 0x188   : > { %3525 = vmatprep.subr.bf16.mxu0 %v8268_v14 }
 0x189   : > { %2523 = vmatmul.mubr.bf16.gmra.mrb[16].mxu0 %v7422_v3  ;;  %2896 = vmatmul.mubr.bf16.gmra.mrb[84].mxu1 %v7237_v43  ;;  %v7440_v43 = vld [vmem:[#allocation5 + $0xcc] ss:$16 sps:$4 sm:$0xff]  }
 0x18a   : > { %2532 = vmatprep.mubr.bf16.mxu0 %v7424_v5  ;;  %2905 = vmatprep.mubr.bf16.mxu1 %v7241_v48  ;;  %v6359_v48 = vld [vmem:[%s7104_s22 + $0x304] ss:$20 sps:$4 sm:$0xff]  }
 0x18b   : > { %3526 = vmatpush1.bf16.msra.mxu0 %v6330_v29  ;;  %3162 = vmatprep.subr.bf16.mxu1 %v6359_v48  ;;  %v6370_v29 = vld [vmem:[%s7104_s22 + $0x378] ss:$20 sps:$4 sm:$0xff]   ;;  %v6387_v48 = vld [vmem:[%s7104_s22 + $0x3f4] ss:$20 sps:$4 sm:$0xff]  }
 0x18c   : > { %3527 = vmatprep.subr.bf16.mxu0 %v8268_v14  ;;  %3163 = vmatpush1.bf16.msra.mxu1 %v6357_v57  ;;  %v6388_v57 = vld [vmem:[%s7104_s22 + $0x1f0] ss:$20 sps:$4 sm:$0xff]  }
 0x18d   : > { %3164 = vmatprep.subr.bf16.mxu1 %v6362_v63  ;;  %v6389_v63 = vld [vmem:[%s7104_s22 + $0x418] ss:$20 sps:$4 sm:$0xff]  }
 0x18f   : > { %3528 = vmatpush1.bf16.msra.mxu0 %v6337_v8  ;;  %v6379_v8 = vld [vmem:[%s7104_s22 + $0x3c8] ss:$20 sps:$4 sm:$0xff]  }
 0x190   : > { %3529 = vmatprep.subr.bf16.mxu0 %v8268_v14  ;;  %3165 = vmatpush1.bf16.msra.mxu1 %v6360_v4  ;;  %v7493_v4 = vld [vmem:[#allocation5 + $0x128] ss:$16 sps:$4 sm:$0xff]  }
 0x191   : > { %2533 = vmatmul.mubr.bf16.gmra.mrb[20].mxu0 %v7438_v39  ;;  %2906 = vmatmul.mubr.bf16.gmra.mrb[88].mxu1 %v7250_v56  ;;  %v7455_v56 = vld [vmem:[#allocation5 + $0xec] ss:$16 sps:$4 sm:$0xff]  }
 0x192   : > { %2542 = vmatprep.mubr.bf16.mxu0 %v7440_v43  ;;  %2915 = vmatprep.mubr.bf16.mxu1 %v7255_v60  ;;  %v6366_v60 = vld [vmem:[%s7104_s22 + $0x350] ss:$20 sps:$4 sm:$0xff]  }
 0x193   : > { %3530 = vmatpush1.bf16.msra.mxu0 %v6350_v55  ;;  %3166 = vmatprep.subr.bf16.mxu1 %v6368_v17  ;;  %v7481_v55 = vld [vmem:[#allocation5 + $0x12c] ss:$16 sps:$4 sm:$0xff]   ;;  %v6397_v17 = vld [vmem:[%s7104_s22 + $0x444] ss:$20 sps:$4 sm:$0xff]  }
 0x194   : > { %3531 = vmatprep.subr.bf16.mxu0 %v8268_v14  ;;  %3167 = vmatpush1.bf16.msra.mxu1 %v6366_v60  ;;  %v6400_v60 = vld [vmem:[%s7104_s22 + $0x46c] ss:$20 sps:$4 sm:$0xff]  }
 0x195   : > { %3168 = vmatprep.subr.bf16.mxu1 %v6372_v2  ;;  %v7505_v2 = vld [vmem:[#allocation5 + $0x148] ss:$16 sps:$4 sm:$0xff]  }
 0x197   : > { %3532 = vmatpush1.bf16.msra.mxu0 %v6369_v21  ;;  %v6398_v21 = vld [vmem:[%s7104_s22 + $0x468] ss:$20 sps:$4 sm:$0xff]  }
 0x198   : > { %3533 = vmatprep.subr.bf16.mxu0 %v8268_v14  ;;  %3169 = vmatpush1.bf16.msra.mxu1 %v6370_v29  ;;  %v7507_v29 = vld [vmem:[#allocation5 + $0x16c] ss:$16 sps:$4 sm:$0xff]  }
 0x199   : > { %2543 = vmatmul.mubr.bf16.gmra.mrb[24].mxu0 %v7453_v1  ;;  %2916 = vmatmul.mubr.bf16.gmra.mrb[92].mxu1 %v7272_v10  ;;  %v7469_v10 = vld [vmem:[#allocation5 + $0x10c] ss:$16 sps:$4 sm:$0xff]  }
 0x19a   : > { %2552 = vmatprep.mubr.bf16.mxu0 %v7455_v56  ;;  %2925 = vmatprep.mubr.bf16.mxu1 %v7276_v12  ;;  %v6376_v12 = vld [vmem:[%s7104_s22 + $0x3a0] ss:$20 sps:$4 sm:$0xff]  }
 0x19b   : > { %3170 = vmatprep.subr.bf16.mxu1 %v6378_v33  ;;  %3534 = vmatpush1.bf16.msra.mxu0 %v6388_v57  ;;  %v6406_v33 = vld [vmem:[%s7104_s22 + $0x494] ss:$20 sps:$4 sm:$0xff]   ;;  %v7531_v57 = vld [vmem:[#allocation5 + $0x1ac] ss:$16 sps:$4 sm:$0xff]  }
 0x19c   : > { %3171 = vmatpush1.bf16.msra.mxu1 %v6376_v12  ;;  %3535 = vmatprep.subr.bf16.mxu0 %v8268_v14  ;;  %v6407_v12 = vld [vmem:[%s7104_s22 + $0x218] ss:$20 sps:$4 sm:$0xff]  }
 0x19d   : > { %3172 = vmatprep.subr.bf16.mxu1 %v6381_v7  ;;  %v7518_v7 = vld [vmem:[#allocation5 + $0x168] ss:$16 sps:$4 sm:$0xff]  }
 0x19f   : > { %3536 = vmatpush1.bf16.msra.mxu0 %v6407_v12  ;;  %v7568_v12 = vld [vmem:[#allocation5 + $0x228] ss:$16 sps:$4 sm:$0xff]  }
 0x1a0   : > { %3173 = vmatpush1.bf16.msra.mxu1 %v6379_v8  ;;  %3537 = vmatprep.subr.bf16.mxu0 %v8268_v14  ;;  %v6408_v8 = vld [vmem:[%s7104_s22 + $0x4b8] ss:$20 sps:$4 sm:$0xff]   ;;  %8299 = vst [vmem:[#allocation19_spill] sm:$0xff] %v7568_v12 }
 0x1a1   : > { %2553 = vmatmul.mubr.bf16.gmra.mrb[28].mxu0 %v7467_v6  ;;  %2926 = vmatmul.mubr.bf16.gmra.mrb[96].mxu1 %v7285_v15  ;;  %v6385_v15 = vld [vmem:[%s7104_s22 + $0x3f0] ss:$20 sps:$4 sm:$0xff]  }
 0x1a2   : > { %2562 = vmatprep.mubr.bf16.mxu0 %v7469_v10  ;;  %2935 = vmatprep.mubr.bf16.mxu1 %v7289_v18  ;;  %v6391_v18 = vld [vmem:[%s7104_s22 + $0x41c] ss:$20 sps:$4 sm:$0xff]  }
 0x1a3   : > { %3174 = vmatprep.subr.bf16.mxu1 %v6387_v48  ;;  %v7521_v48 = vld [vmem:[#allocation5 + $0x18c] ss:$16 sps:$4 sm:$0xff]  }
 0x1a4   : > { %3175 = vmatpush1.bf16.msra.mxu1 %v6385_v15  ;;  %v7529_v15 = vld [vmem:[#allocation5 + $0x188] ss:$16 sps:$4 sm:$0xff]  }
 0x1a5   : > { %3176 = vmatprep.subr.bf16.mxu1 %v6391_v18  ;;  %v7538_v18 = vld [vmem:[#allocation5 + $0x1a8] ss:$16 sps:$4 sm:$0xff]  }
 0x1a8   : > { %3177 = vmatpush1.bf16.msra.mxu1 %v6389_v63  ;;  %v6472_v63 = vld [vmem:[#allocation5 + $0x224] ss:$16 sps:$4 sm:$0xff]  }
 0x1a9   : > { %2563 = vmatmul.mubr.bf16.gmra.mrb[32].mxu0 %v7479_v36  ;;  %2936 = vmatmul.mubr.bf16.gmra.mrb[100].mxu1 %v7297_v20  ;;  %v7495_v20 = vld [vmem:[#allocation5 + $0x14c] ss:$16 sps:$4 sm:$0xff]  }
 0x1aa   : > { %2572 = vmatprep.mubr.bf16.mxu0 %v7481_v55  ;;  %2945 = vmatprep.mubr.bf16.mxu1 %v7301_v23  ;;  %v6395_v23 = vld [vmem:[%s7104_s22 + $0x440] ss:$20 sps:$4 sm:$0xff]  }
 0x1ab   : > { %3178 = vmatprep.subr.bf16.mxu1 %v6397_v17  ;;  %v6427_v17 = vld [vmem:[%s7104_s22 + $0x268] ss:$20 sps:$4 sm:$0xff]  }
 0x1ac   : > { %3179 = vmatpush1.bf16.msra.mxu1 %v6395_v23  ;;  %v7555_v23 = vld [vmem:[#allocation5 + $0x1e8] ss:$16 sps:$4 sm:$0xff]  }
 0x1ad   : > { %3180 = vmatprep.subr.bf16.mxu1 %v6400_v60  ;;  %8295 = vst [vmem:[#allocation15_spill] sm:$0xff] %v7555_v23  ;;  %v6474_v60 = vld [vmem:[#allocation5 + $0x244] ss:$16 sps:$4 sm:$0xff]  }
 0x1b0   : > { %3181 = vmatpush1.bf16.msra.mxu1 %v6398_v21  ;;  %v7564_v21 = vld [vmem:[#allocation5 + $0x22c] ss:$16 sps:$4 sm:$0xff]  }
 0x1b1   : > { %2573 = vmatmul.mubr.bf16.gmra.mrb[36].mxu0 %v7493_v4  ;;  %2946 = vmatmul.mubr.bf16.gmra.mrb[104].mxu1 %v7309_v25  ;;  %v6404_v25 = vld [vmem:[%s7104_s22 + $0x490] ss:$20 sps:$4 sm:$0xff]   ;;  %8298 = vst [vmem:[#allocation18_spill] sm:$0xff] %v7564_v21 }
 0x1b2   : > { %2582 = vmatprep.mubr.bf16.mxu0 %v7495_v20  ;;  %2955 = vmatprep.mubr.bf16.mxu1 %v7313_v27  ;;  %v6410_v27 = vld [vmem:[%s7104_s22 + $0x4bc] ss:$20 sps:$4 sm:$0xff]  }
 0x1b3   : > { %3182 = vmatprep.subr.bf16.mxu1 %v6406_v33  ;;  %v6475_v33 = vld [vmem:[#allocation5 + $0x240] ss:$16 sps:$4 sm:$0xff]  }
 0x1b4   : > { %3183 = vmatpush1.bf16.msra.mxu1 %v6404_v25  ;;  %v6476_v25 = vld [vmem:[#allocation5 + $0x264] ss:$16 sps:$4 sm:$0xff]  }
 0x1b5   : > { %3184 = vmatprep.subr.bf16.mxu1 %v6410_v27  ;;  %v6334_v27 = vld [vmem:[#allocation5 + $0x24c] ss:$16 sps:$4 sm:$0xff]  }
 0x1b8   : > { %3185 = vmatpush1.bf16.msra.mxu1 %v6408_v8  ;;  %v6477_v8 = vld [vmem:[#allocation5 + $0x260] ss:$16 sps:$4 sm:$0xff]  }
 0x1b9   : > { %2583 = vmatmul.mubr.bf16.gmra.mrb[40].mxu0 %v7505_v2  ;;  %2956 = vmatmul.mubr.bf16.gmra.mrb[108].mxu1 %v7321_v30  ;;  %v6416_v30 = vld [vmem:[%s7104_s22 + $0x4e4] ss:$20 sps:$4 sm:$0xff]  }
 0x1ba   : > { %2592 = vmatprep.mubr.bf16.mxu0 %v7507_v29  ;;  %2965 = vmatprep.mubr.bf16.mxu1 %v7325_v32  ;;  %v6414_v32 = vld [vmem:[%s7104_s22 + $0x4e0] ss:$20 sps:$4 sm:$0xff]  }
 0x1bb   : > { %3186 = vmatprep.subr.bf16.mxu1 %v6416_v30  ;;  %v6478_v30 = vld [vmem:[#allocation5 + $0x284] ss:$16 sps:$4 sm:$0xff]  }
 0x1bc   : > { %3187 = vmatpush1.bf16.msra.mxu1 %v6414_v32  ;;  %v6336_v32 = vld [vmem:[#allocation5 + $0x248] ss:$16 sps:$4 sm:$0xff]  }
 0x1c1   : > { %2593 = vmatmul.mubr.bf16.gmra.mrb[44].mxu0 %v7518_v7  ;;  %2966 = vmatmul.mubr.bf16.gmra.mrb[112].mxu1 %v7333_v35  ;;  %v6420_v35 = vld [vmem:[%s7104_s22 + $0x240] ss:$20 sps:$4 sm:$0xff]  }
 0x1c2   : > { %2602 = vmatprep.mubr.bf16.mxu0 %v7521_v48  ;;  %2975 = vmatprep.mubr.bf16.mxu1 %v7337_v38  ;;  %v7541_v38 = vld [vmem:[#allocation5 + $0x1cc] ss:$16 sps:$4 sm:$0xff]  }
 0x1c3   : > { %3538 = vmatpush1.bf16.msra.mxu0 %v6420_v35  ;;  %v6338_v35 = vld [vmem:[#allocation5 + $0x26c] ss:$16 sps:$4 sm:$0xff]  }
 0x1c4   : > { %3539 = vmatprep.subr.bf16.mxu0 %v8268_v14 }
 0x1c7   : > { %3540 = vmatpush1.bf16.msra.mxu0 %v6427_v17  ;;  %v6480_v17 = vld [vmem:[#allocation5 + $0x2a4] ss:$16 sps:$4 sm:$0xff]  }
 0x1c8   : > { %3798 = vmatprep.subr.bf16.mxu0 %v8268_v14 }
 0x1c9   : > { %2603 = vmatmul.mubr.bf16.gmra.mrb[48].mxu0 %v7529_v15  ;;  %2976 = vmatmul.mubr.bf16.gmra.mrb[116].mxu1 %v7345_v41  ;;  %v7547_v41 = vld [vmem:[#allocation5 + $0x1c8] ss:$16 sps:$4 sm:$0xff]  }
 0x1ca   : > { %2612 = vmatprep.mubr.bf16.mxu0 %v7531_v57  ;;  %2985 = vmatprep.mubr.bf16.mxu1 %v7349_v44  ;;  %v7549_v44 = vld [vmem:[#allocation5 + $0x1ec] ss:$16 sps:$4 sm:$0xff]  }
 0x1d1   : > { %2613 = vmatmul.mubr.bf16.gmra.mrb[52].mxu0 %v7538_v18  ;;  %2986 = vmatmul.mubr.bf16.gmra.mrb[120].mxu1 %v7357_v47  ;;  %v7558_v47 = vld [vmem:[#allocation5 + $0x20c] ss:$16 sps:$4 sm:$0xff]  }
 0x1d2   : > { %2622 = vmatprep.mubr.bf16.mxu0 %v7541_v38  ;;  %2995 = vmatprep.mubr.bf16.mxu1 %v7359_v50  ;;  %8296 = vst [vmem:[#allocation16_spill] sm:$0xff] %v7558_v47  ;;  %v6473_v50 = vld [vmem:[#allocation5 + $0x220] ss:$16 sps:$4 sm:$0xff]  }
 0x1d9   : > { %2623 = vmatmul.mubr.bf16.gmra.mrb[56].mxu0 %v7547_v41  ;;  %2996 = vmatmul.mubr.bf16.gmra.mrb[124].mxu1 %v7365_v51  ;;  %v7562_v51 = vld [vmem:[#allocation5 + $0x208] ss:$16 sps:$4 sm:$0xff]  }
 0x1da   : > { %2632 = vmatprep.mubr.bf16.mxu0 %v7549_v44  ;;  %3005 = vmatprep.mubr.bf16.mxu1 %v6472_v63  ;;  %8297 = vst [vmem:[#allocation17_spill] sm:$0xff] %v7562_v51  ;;  %v6479_v63 = vld [vmem:[#allocation5 + $0x280] ss:$16 sps:$4 sm:$0xff]  }
 0x1e1   : > { %2633 = vmatmul.mubr.bf16.gmra.mrb[60].mxu0 %v7555_v23  ;;  %3006 = vmatmul.mubr.bf16.gmra.mrb[128].mxu1 %v6473_v50  ;;  %v6340_v50 = vld [vmem:[#allocation5 + $0x268] ss:$16 sps:$4 sm:$0xff]  }
 0x1e2   : > { %2642 = vmatprep.mubr.bf16.mxu0 %v7558_v47  ;;  %3015 = vmatprep.mubr.bf16.mxu1 %v6474_v60  ;;  %v6344_v60 = vld [vmem:[#allocation5 + $0x28c] ss:$16 sps:$4 sm:$0xff]   ;;  %v6365_v23 = vld [vmem:[#allocation5 + $0x2c8] ss:$16 sps:$4 sm:$0xff]  }
 0x1e9   : > { %2643 = vmatmul.mubr.bf16.gmra.mrb[64].mxu0 %v7562_v51  ;;  %3016 = vmatmul.mubr.bf16.gmra.mrb[132].mxu1 %v6475_v33  ;;  %v6481_v33 = vld [vmem:[#allocation5 + $0x2a0] ss:$16 sps:$4 sm:$0xff]  }
 0x1ea   : > { %2652 = vmatprep.mubr.bf16.mxu0 %v7564_v21  ;;  %3025 = vmatprep.mubr.bf16.mxu1 %v6476_v25  ;;  %v7571_v25 = vpop.f32.mrb[0].mxu1  ;;  %v6363_v21 = vld [vmem:[#allocation5 + $0x2cc] ss:$16 sps:$4 sm:$0xff]   ;;  %v6485_v51 = vld [vmem:[#allocation5 + $0x2e0] ss:$16 sps:$4 sm:$0xff]  }
 0x1f1   : > { %2653 = vmatmul.mubr.bf16.gmra.mrb[68].mxu0 %v7568_v12  ;;  %3026 = vmatmul.mubr.bf16.gmra.mrb[136].mxu1 %v6477_v8  ;;  %v6482_v8 = vld [vmem:[#allocation5 + $0x2c4] ss:$16 sps:$4 sm:$0xff]   ;;  %v6356_v12 = vld [vmem:[#allocation5 + $0x2a8] ss:$16 sps:$4 sm:$0xff]  }
 0x1f2   : > { %2662 = vmatprep.mubr.bf16.mxu0 %v6334_v27  ;;  %3035 = vmatprep.mubr.bf16.mxu1 %v6478_v30  ;;  %v7573_v27 = vpop.f32.mrb[1].mxu1 }
 0x1f3   : > { %v7575_v30 = vpop.f32.mrb[2].mxu1 }
 0x1f9   : > { %2663 = vmatmul.mubr.bf16.gmra.mrb[72].mxu0 %v6336_v32  ;;  %3036 = vmatmul.mubr.bf16.gmra.mrb[140].mxu1 %v6479_v63  ;;  %v7577_v32 = vpop.f32.mrb[3].mxu1  ;;  %v6346_v63 = vld [vmem:[#allocation5 + $0x288] ss:$16 sps:$4 sm:$0xff]  }
 0x1fa   : > { %2672 = vmatprep.mubr.bf16.mxu0 %v6338_v35  ;;  %3045 = vmatprep.mubr.bf16.mxu1 %v6480_v17  ;;  %v6354_v35 = vld [vmem:[#allocation5 + $0x2ac] ss:$16 sps:$4 sm:$0xff]   ;;  %v6483_v17 = vld [vmem:[#allocation5 + $0x2c0] ss:$16 sps:$4 sm:$0xff]   ;;  %v7579_v14 = vpop.f32.mrb[4].mxu1 }
 0x201   : > { %2673 = vmatmul.mubr.bf16.gmra.mrb[76].mxu0 %v6340_v50  ;;  %3046 = vmatmul.mubr.bf16.gmra.mrb[144].mxu1 %v6481_v33  ;;  %v6484_v50 = vld [vmem:[#allocation5 + $0x2e4] ss:$16 sps:$4 sm:$0xff]   ;;  %v7581_v33 = vpop.f32.mrb[5].mxu1 }
 0x202   : > { %2682 = vmatprep.mubr.bf16.mxu0 %v6344_v60  ;;  %3055 = vmatprep.mubr.bf16.mxu1 %v6482_v8  ;;  %v7583_v60 = vpop.f32.mrb[6].mxu1 }
 0x203   : > { %8300 = vst [vmem:[#allocation20_spill] sm:$0xff] %v7583_v60  ;;  %v7585_v8 = vpop.f32.mrb[7].mxu1  ;;  %v6373_v60 = vld [vmem:[#allocation5 + $0x2ec] ss:$16 sps:$4 sm:$0xff]  }
 0x204   : > { %8301 = vst [vmem:[#allocation21_spill] sm:$0xff] %v7585_v8  ;;  %v7587_v47 = vpop.f32.mrb[8].mxu1 }
 0x209   : > { %2683 = vmatmul.mubr.bf16.gmra.mrb[80].mxu0 %v6346_v63  ;;  %3056 = vmatmul.mubr.bf16.gmra.mrb[148].mxu1 %v6483_v17  ;;  %v6486_v63 = vld [vmem:[#allocation5 + $0x304] ss:$16 sps:$4 sm:$0xff]   ;;  %v7589_v17 = vpop.f32.mrb[9].mxu1 }
 0x20a   : > { %2692 = vmatprep.mubr.bf16.mxu0 %v6354_v35  ;;  %3065 = vmatprep.mubr.bf16.mxu1 %v6484_v50  ;;  %v7591_v35 = vpop.f32.mrb[10].mxu1 }
 0x20b   : > { %8302 = vst [vmem:[#allocation22_spill] sm:$0xff] %v7591_v35  ;;  %v7593_v50 = vpop.f32.mrb[11].mxu1  ;;  %v6382_v35 = vld [vmem:[#allocation5 + $0x30c] ss:$16 sps:$4 sm:$0xff]  }
 0x20c   : > { %8303 = vst [vmem:[#allocation23_spill] sm:$0xff] %v7593_v50  ;;  %v7596_v8 = vpop.f32.mrb[12].mxu1 }
 0x211   : > { %2693 = vmatmul.mubr.bf16.gmra.mrb[84].mxu0 %v6356_v12  ;;  %3066 = vmatmul.mubr.bf16.gmra.mrb[152].mxu1 %v6485_v51  ;;  %v7599_v51 = vpop.f32.mrb[13].mxu1 }
 0x212   : > { %2702 = vmatprep.mubr.bf16.mxu0 %v6363_v21  ;;  %3075 = vmatprep.mubr.bf16.mxu1 %v6486_v63  ;;  %v7601_v21 = vpop.f32.mrb[14].mxu1  ;;  %v6375_v63 = vld [vmem:[#allocation5 + $0x2e8] ss:$16 sps:$4 sm:$0xff]  }
 0x213   : > { %8304 = vst [vmem:[#allocation24_spill] sm:$0xff] %v7601_v21  ;;  %v7603_v12 = vpop.f32.mrb[15].mxu1  ;;  %v6392_v21 = vld [vmem:[#allocation5 + $0x32c] ss:$16 sps:$4 sm:$0xff]  }
 0x214   : > { %8305 = vst [vmem:[#allocation25_spill] sm:$0xff] %v7603_v12  ;;  %v7606_v50 = vpop.f32.mrb[16].mxu1 }
 0x219   : > { %2703 = vmatmul.mubr.bf16.gmra.mrb[88].mxu0 %v6365_v23  ;;  %3076 = vmatmul.mubr.bf16.gmra.mrb[156].mxu1 %v7252_v58  ;;  %v7609_v58 = vpop.f32.mrb[17].mxu1 }
 0x21a   : > { %2712 = vmatprep.mubr.bf16.mxu0 %v6373_v60  ;;  %3085 = vmatprep.mubr.bf16.mxu1 %v7257_v62  ;;  %8306 = vst [vmem:[#allocation26_spill] sm:$0xff] %v7609_v58  ;;  %v7611_v23 = vpop.f32.mrb[18].mxu1  ;;  %v6384_v60 = vld [vmem:[#allocation5 + $0x308] ss:$16 sps:$4 sm:$0xff]  }
 0x21b   : > { %8307 = vst [vmem:[#allocation27_spill] sm:$0xff] %v7611_v23  ;;  %v7613_v62 = vpop.f32.mrb[19].mxu1  ;;  %v6401_v23 = vld [vmem:[#allocation5 + $0x34c] ss:$16 sps:$4 sm:$0xff]  }
 0x21c   : > { %8308 = vst [vmem:[#allocation28_spill] sm:$0xff] %v7613_v62  ;;  %v7616_v12 = vpop.f32.mrb[20].mxu1 }
 0x21d   : > { %8309 = vst [vmem:[#allocation29_spill] sm:$0xff] %v7616_v12 }
 0x221   : > { %2713 = vmatmul.mubr.bf16.gmra.mrb[92].mxu0 %v6375_v63  ;;  %3086 = vmatmul.mubr.bf16.gmra.mrb[160].mxu1 %v7274_v11  ;;  %v7619_v11 = vpop.f32.mrb[21].mxu1  ;;  %v6394_v63 = vld [vmem:[#allocation5 + $0x328] ss:$16 sps:$4 sm:$0xff]  }
 0x222   : > { %2722 = vmatprep.mubr.bf16.mxu0 %v6382_v35  ;;  %3095 = vmatprep.mubr.bf16.mxu1 %v7278_v13  ;;  %8310 = vst [vmem:[#allocation30_spill] sm:$0xff] %v7619_v11  ;;  %v7621_v35 = vpop.f32.mrb[22].mxu1 }
 0x223   : > { %8311 = vst [vmem:[#allocation31_spill] sm:$0xff] %v7621_v35  ;;  %v7623_v13 = vpop.f32.mrb[23].mxu1  ;;  %v6411_v35 = vld [vmem:[#allocation5 + $0x36c] ss:$16 sps:$4 sm:$0xff]  }
 0x224   : > { %8312 = vst [vmem:[#allocation32_spill] sm:$0xff] %v7623_v13  ;;  %v7626_v62 = vpop.f32.mrb[24].mxu1 }
 0x225   : > { %8313 = vst [vmem:[#allocation33_spill] sm:$0xff] %v7626_v62  ;;  %v6417_v62 = vld [vmem:[#allocation5 + $0x38c] ss:$16 sps:$4 sm:$0xff]  }
 0x229   : > { %2723 = vmatmul.mubr.bf16.gmra.mrb[96].mxu0 %v6384_v60  ;;  %3096 = vmatmul.mubr.bf16.gmra.mrb[164].mxu1 %v7287_v16  ;;  %v7629_v16 = vpop.f32.mrb[25].mxu1  ;;  %v6403_v60 = vld [vmem:[#allocation5 + $0x348] ss:$16 sps:$4 sm:$0xff]  }
 0x22a   : > { %2732 = vmatprep.mubr.bf16.mxu0 %v6392_v21  ;;  %3105 = vmatprep.mubr.bf16.mxu1 %v7291_v19  ;;  %8314 = vst [vmem:[#allocation34_spill] sm:$0xff] %v7629_v16  ;;  %v7631_v21 = vpop.f32.mrb[26].mxu1  ;;  %v6413_v16 = vld [vmem:[#allocation5 + $0x368] ss:$16 sps:$4 sm:$0xff]  }
 0x22b   : > { %8315 = vst [vmem:[#allocation35_spill] sm:$0xff] %v7631_v21  ;;  %v7633_v19 = vpop.f32.mrb[27].mxu1 }
 0x22c   : > { %8316 = vst [vmem:[#allocation36_spill] sm:$0xff] %v7633_v19  ;;  %v7636_v13 = vpop.f32.mrb[28].mxu1 }
 0x22d   : > { %8317 = vst [vmem:[#allocation37_spill] sm:$0xff] %v7636_v13 }
 0x231   : > { %2733 = vmatmul.mubr.bf16.gmra.mrb[100].mxu0 %v6394_v63  ;;  %3106 = vmatmul.mubr.bf16.gmra.mrb[168].mxu1 %v7299_v22  ;;  %v7639_v22 = vpop.f32.mrb[29].mxu1 }
 0x232   : > { %2742 = vmatprep.mubr.bf16.mxu0 %v6401_v23  ;;  %3115 = vmatprep.mubr.bf16.mxu1 %v7303_v24  ;;  %8318 = vst [vmem:[#allocation38_spill] sm:$0xff] %v7639_v22  ;;  %v7641_v23 = vpop.f32.mrb[30].mxu1 }
 0x233   : > { %8319 = vst [vmem:[#allocation39_spill] sm:$0xff] %v7641_v23  ;;  %v7643_v63 = vpop.f32.mrb[31].mxu1 }
 0x234   : > { %8320 = vst [vmem:[#allocation40_spill] sm:$0xff] %v7643_v63 }
 0x239   : > { %2743 = vmatmul.mubr.bf16.gmra.mrb[104].mxu0 %v6403_v60  ;;  %3116 = vmatmul.mubr.bf16.gmra.mrb[172].mxu1 %v7311_v26 }
 0x23a   : > { %2752 = vmatprep.mubr.bf16.mxu0 %v6411_v35  ;;  %3125 = vmatprep.mubr.bf16.mxu1 %v7315_v28  ;;  %v7648_v28 = vpop.f32.mrb[32].mxu1 }
 0x23b   : > { %8321 = vst [vmem:[#allocation41_spill] sm:$0xff] %v7648_v28  ;;  %v7651_v63 = vpop.f32.mrb[33].mxu1 }
 0x23c   : > { %v2484_v24 = vpop.f32.mrb[0].mxu0  ;;  %8322 = vst [vmem:[#allocation42_spill] sm:$0xff] %v7651_v63  ;;  %v7653_v23 = vpop.f32.mrb[34].mxu1 }
 0x23d   : > { %v2486_v21 = vpop.f32.mrb[1].mxu0  ;;  %v4087_v11 = vmax.f32 %v2484_v24, 0.0  ;;  %8323 = vst [vmem:[#allocation43_spill] sm:$0xff] %v7653_v23 }
 0x23e   : > { %v2488_v19 = vpop.f32.mrb[2].mxu0  ;;  %v4088_v26 = vmax.f32 %v2486_v21, 0.0 }
 0x23f   : > { %v4092_v60 = vmax.f32 %v2488_v19, 0.0  ;;  %v2490_v12 = vpop.f32.mrb[3].mxu0  ;;  %v7655_v19 = vpop.f32.mrb[35].mxu1 }
 0x240   : > { %v4093_v58 = vmax.f32 %v2490_v12, 0.0  ;;  %8324 = vst [vmem:[#allocation44_spill] sm:$0xff] %v7655_v19 }
 0x241   : > { %v7645_v13 = vpack.c.bf16 %v4092_v60, %v4087_v11  ;;  %2753 = vmatmul.mubr.bf16.gmra.mrb[108].mxu0 %v6413_v16  ;;  %3126 = vmatmul.mubr.bf16.gmra.mrb[176].mxu1 %v7323_v31  ;;  %v6419_v11 = vld [vmem:[#allocation5 + $0x388] ss:$16 sps:$4 sm:$0xff]   ;;  %v6421_v16 = vld [vmem:[#allocation5 + $0x3ac] ss:$16 sps:$4 sm:$0xff]  }
 0x242   : > { %v4408_v35 = vpack.c.bf16 %v4093_v58, %v4088_v26  ;;  %2762 = vmatprep.mubr.bf16.mxu0 %v6417_v62  ;;  %3135 = vmatprep.mubr.bf16.mxu1 %v7327_v34  ;;  %v7658_v34 = vpop.f32.mrb[36].mxu1 }
 0x243   : > { %8325 = vst [vmem:[#allocation45_spill] sm:$0xff] %v7658_v34 }
 0x244   : > { %v2494_v24 = vpop.f32.mrb[4].mxu0  ;;  %4583 = vmatprep.subr.bf16.mxu1 %v4408_v35  ;;  %v7661_v35 = vpop.f32.mrb[37].mxu1 }
 0x245   : > { %v2496_v12 = vpop.f32.mrb[5].mxu0  ;;  %v4097_v60 = vmax.f32 %v2494_v24, 0.0  ;;  %8326 = vst [vmem:[#allocation46_spill] sm:$0xff] %v7661_v35  ;;  %v7663_v19 = vpop.f32.mrb[38].mxu1 }
 0x246   : > { %v2498_v21 = vpop.f32.mrb[6].mxu0  ;;  %v4098_v28 = vmax.f32 %v2496_v12, 0.0  ;;  %8327 = vst [vmem:[#allocation47_spill] sm:$0xff] %v7663_v19  ;;  %v7665_v24 = vpop.f32.mrb[39].mxu1  ;;  %v6423_v12 = vld [vmem:[#allocation5 + $0x3a8] ss:$16 sps:$4 sm:$0xff]  }
 0x247   : > { %v4102_v31 = vmax.f32 %v2498_v21, 0.0  ;;  %v2500_v22 = vpop.f32.mrb[7].mxu0  ;;  %8328 = vst [vmem:[#allocation48_spill] sm:$0xff] %v7665_v24 }
 0x248   : > { %v4103_v58 = vmax.f32 %v2500_v22, 0.0 }
 0x249   : > { %v4412_v62 = vpack.c.bf16 %v4102_v31, %v4097_v60  ;;  %2763 = vmatmul.mubr.bf16.gmra.mrb[112].mxu0 %v6419_v11  ;;  %3136 = vmatmul.mubr.bf16.gmra.mrb[180].mxu1 %v7335_v37  ;;  %v6424_v60 = vld [vmem:[#allocation5 + $0x3cc] ss:$16 sps:$4 sm:$0xff]  }
 0x24a   : > { %v4413_v26 = vpack.c.bf16 %v4103_v58, %v4098_v28  ;;  %2772 = vmatprep.mubr.bf16.mxu0 %v6421_v16  ;;  %3145 = vmatprep.mubr.bf16.mxu1 %v7339_v40  ;;  %v7668_v40 = vpop.f32.mrb[40].mxu1 }
 0x24b   : > { %8329 = vst [vmem:[#allocation49_spill] sm:$0xff] %v7668_v40  ;;  %v7671_v58 = vpop.f32.mrb[41].mxu1 }
 0x24c   : > { %v2504_v23 = vpop.f32.mrb[8].mxu0  ;;  %v7673_v24 = vpop.f32.mrb[42].mxu1 }
 0x24d   : > { %v2506_v21 = vpop.f32.mrb[9].mxu0  ;;  %v4107_v11 = vmax.f32 %v2504_v23, 0.0  ;;  %v7675_v23 = vpop.f32.mrb[43].mxu1 }
 0x24e   : > { %v2508_v22 = vpop.f32.mrb[10].mxu0  ;;  %v4108_v63 = vmax.f32 %v2506_v21, 0.0  ;;  %v6426_v21 = vld [vmem:[#allocation5 + $0x3c8] ss:$16 sps:$4 sm:$0xff]  }
 0x24f   : > { %v4112_v31 = vmax.f32 %v2508_v22, 0.0  ;;  %v2510_v37 = vpop.f32.mrb[11].mxu0 }
 0x250   : > { %v4113_v34 = vmax.f32 %v2510_v37, 0.0 }
 0x251   : > { %v4417_v28 = vpack.c.bf16 %v4112_v31, %v4107_v11  ;;  %2773 = vmatmul.mubr.bf16.gmra.mrb[116].mxu0 %v6423_v12  ;;  %3146 = vmatmul.mubr.bf16.gmra.mrb[184].mxu1 %v7347_v42  ;;  %v6428_v11 = vld [vmem:[#allocation5 + $0x3ec] ss:$16 sps:$4 sm:$0xff]  }
 0x252   : > { %v4418_v16 = vpack.c.bf16 %v4113_v34, %v4108_v63  ;;  %2782 = vmatprep.mubr.bf16.mxu0 %v6424_v60  ;;  %3188 = vmatprep.mubr.bf16.mxu1 %v7367_v52  ;;  %v7678_v52 = vpop.f32.mrb[44].mxu1 }
 0x253   : > { %v7681_v60 = vpop.f32.mrb[45].mxu1 }
 0x254   : > { %v2514_v19 = vpop.f32.mrb[12].mxu0 }
 0x255   : > { %v2516_v22 = vpop.f32.mrb[13].mxu0  ;;  %v4117_v12 = vmax.f32 %v2514_v19, 0.0  ;;  %v7684_v19 = vpop.f32.mrb[46].mxu1 }
 0x256   : > { %v2518_v37 = vpop.f32.mrb[14].mxu0  ;;  %v4118_v35 = vmax.f32 %v2516_v22, 0.0  ;;  %v7686_v22 = vpop.f32.mrb[47].mxu1 }
 0x257   : > { %v4122_v31 = vmax.f32 %v2518_v37, 0.0  ;;  %v2520_v42 = vpop.f32.mrb[15].mxu0  ;;  %8330 = vst [vmem:[#allocation50_spill] sm:$0xff] %v7686_v22 }
 0x258   : > { %v4123_v40 = vmax.f32 %v2520_v42, 0.0 }
 0x259   : > { %v4422_v63 = vpack.c.bf16 %v4122_v31, %v4117_v12  ;;  %2783 = vmatmul.mubr.bf16.gmra.mrb[120].mxu0 %v6426_v21  ;;  %3189 = vmatmul.mubr.bf16.vlgmr.msra.gmra.mrb[60].mxu1 %v7373_v53  ;;  %v6430_v21 = vld [vmem:[#allocation5 + $0x3e8] ss:$16 sps:$4 sm:$0xff]  }
 0x25a   : > { %v4423_v34 = vpack.c.bf16 %v4123_v40, %v4118_v35  ;;  %4584 = vmatpush1.bf16.msra.mxu1 %v7645_v13  ;;  %2792 = vmatprep.mubr.bf16.mxu0 %v6428_v11 }
 0x25b   : > { %4585 = vmatprep.subr.bf16.mxu1 %v4413_v26  ;;  %3198 = vmatprep.mubr.bf16.mxu1 %v7376_v54  ;;  %v7689_v54 = vpop.f32.mrb[48].mxu1 }
 0x25c   : > { %v2524_v37 = vpop.f32.mrb[16].mxu0  ;;  %v7692_v22 = vpop.f32.mrb[49].mxu1 }
 0x25d   : > { %v2526_v12 = vpop.f32.mrb[17].mxu0  ;;  %v4127_v31 = vmax.f32 %v2524_v37, 0.0 }
 0x25e   : > { %4586 = vmatpush1.bf16.msra.mxu1 %v4412_v62  ;;  %v2528_v53 = vpop.f32.mrb[18].mxu0  ;;  %v4128_v13 = vmax.f32 %v2526_v12, 0.0  ;;  %v7695_v62 = vpop.f32.mrb[50].mxu1 }
 0x25f   : > { %v4132_v42 = vmax.f32 %v2528_v53, 0.0  ;;  %4587 = vmatprep.subr.bf16.mxu1 %v4418_v16  ;;  %v2530_v35 = vpop.f32.mrb[19].mxu0  ;;  %v7697_v37 = vpop.f32.mrb[51].mxu1 }
 0x260   : > { %v4133_v40 = vmax.f32 %v2530_v35, 0.0 }
 0x261   : > { %v4427_v11 = vpack.c.bf16 %v4132_v42, %v4127_v31  ;;  %2793 = vmatmul.mubr.bf16.gmra.mrb[124].mxu0 %v6430_v21  ;;  %3199 = vmatmul.mubr.bf16.gmra.mrb[64].mxu1 %v7384_v45  ;;  %v6431_v45 = vld [vmem:[%s7104_s22 + $0x290] ss:$20 sps:$4 sm:$0xff]  }
 0x262   : > { %v4428_v26 = vpack.c.bf16 %v4133_v40, %v4128_v13  ;;  %4588 = vmatpush1.bf16.msra.mxu1 %v4417_v28  ;;  %3208 = vmatprep.mubr.bf16.mxu1 %v7386_v49 }
 0x263   : > { %4589 = vmatprep.subr.bf16.mxu1 %v4423_v34  ;;  %3541 = vmatprep.mubr.bf16.mxu0 %v7354_v46  ;;  %v6487_v46 = vld [vmem:[#allocation5] ss:$16 sps:$4 sm:$0xff]   ;;  %v7701_v34 = vpop.f32.mrb[52].mxu1 }
 0x264   : > { %v2534_v16 = vpop.f32.mrb[20].mxu0  ;;  %v7704_v40 = vpop.f32.mrb[53].mxu1 }
 0x265   : > { %v2536_v12 = vpop.f32.mrb[21].mxu0  ;;  %v4137_v53 = vmax.f32 %v2534_v16, 0.0  ;;  %v7707_v16 = vpop.f32.mrb[54].mxu1 }
 0x266   : > { %4590 = vmatpush1.bf16.msra.mxu1 %v4422_v63  ;;  %v2538_v21 = vpop.f32.mrb[22].mxu0  ;;  %v4138_v49 = vmax.f32 %v2536_v12, 0.0  ;;  %v6432_v63 = vld [vmem:[%s7104_s22 + $0x2b8] ss:$20 sps:$4 sm:$0xff]  }
 0x267   : > { %v4142_v31 = vmax.f32 %v2538_v21, 0.0  ;;  %4591 = vmatprep.subr.bf16.mxu1 %v4428_v26  ;;  %v2540_v28 = vpop.f32.mrb[23].mxu0  ;;  %v6488_v26 = vld [vmem:[#allocation5 + $0x24] ss:$16 sps:$4 sm:$0xff]   ;;  %v7710_v21 = vpop.f32.mrb[55].mxu1 }
 0x268   : > { %v4143_v42 = vmax.f32 %v2540_v28, 0.0  ;;  %8332 = vst [vmem:[#allocation51_spill] sm:$0xff] %v7710_v21 }
 0x269   : > { %v4432_v35 = vpack.c.bf16 %v4142_v31, %v4137_v53  ;;  %3209 = vmatmul.mubr.bf16.gmra.mrb[68].mxu1 %v7396_v61  ;;  %3542 = vmatmul.mubr.bf16.vlgmr.msra.gmra.mrb[128].mxu0 %v6487_v46  ;;  %v8331_v61 = vmov 0  }
 0x26a   : > { %v4433_v13 = vpack.c.bf16 %v4143_v42, %v4138_v49  ;;  %4592 = vmatpush1.bf16.msra.mxu1 %v4427_v11  ;;  %3799 = vmatpush1.bf16.msra.mxu0 %v6431_v45 }
 0x26b   : > { %3218 = vmatprep.mubr.bf16.mxu1 %v7398_v59  ;;  %3549 = vmatprep.mubr.bf16.mxu0 %v6488_v26  ;;  %v6433_v59 = vld [vmem:[%s7104_s22 + $0x2e0] ss:$20 sps:$4 sm:$0xff]   ;;  %v7715_v26 = vpop.f32.mrb[56].mxu1 }
 0x26c   : > { %v2544_v12 = vpop.f32.mrb[24].mxu0  ;;  %4593 = vmatprep.subr.bf16.mxu1 %v4433_v13  ;;  %3800 = vmatprep.subr.bf16.mxu0 %v8331_v61  ;;  %v6489_v13 = vld [vmem:[#allocation5 + $0x20] ss:$16 sps:$4 sm:$0xff]  }
 0x26d   : > { %v2546_v53 = vpop.f32.mrb[25].mxu0  ;;  %v4147_v45 = vmax.f32 %v2544_v12, 0.0  ;;  %v6434_v12 = vld [vmem:[%s7104_s22 + $0x308] ss:$20 sps:$4 sm:$0xff]  }
 0x26e   : > { %4594 = vmatpush1.bf16.msra.mxu1 %v4432_v35  ;;  %v2548_v11 = vpop.f32.mrb[26].mxu0  ;;  %3801 = vmatpush1.bf16.msra.mxu0 %v6432_v63  ;;  %v4148_v49 = vmax.f32 %v2546_v53, 0.0  ;;  %v6490_v35 = vld [vmem:[#allocation5 + $0x44] ss:$16 sps:$4 sm:$0xff]   ;;  %v7718_v63 = vpop.f32.mrb[57].mxu1 }
 0x26f   : > { %v4152_v31 = vmax.f32 %v2548_v11, 0.0  ;;  %v2550_v28 = vpop.f32.mrb[27].mxu0  ;;  %3802 = vmatprep.subr.bf16.mxu0 %v8331_v61  ;;  %v7721_v11 = vpop.f32.mrb[58].mxu1 }
 0x270   : > { %v4153_v42 = vmax.f32 %v2550_v28, 0.0  ;;  %8333 = vst [vmem:[#allocation52_spill] sm:$0xff] %v7721_v11 }
 0x271   : > { %v4437_v46 = vpack.c.bf16 %v4152_v31, %v4147_v45  ;;  %3219 = vmatmul.mubr.bf16.gmra.mrb[72].mxu1 %v7408_v9  ;;  %3550 = vmatmul.mubr.bf16.gmra.mrb[132].mxu0 %v6489_v13  ;;  %v7724_v9 = vpop.f32.mrb[59].mxu1 }
 0x272   : > { %v4438_v21 = vpack.c.bf16 %v4153_v42, %v4148_v49  ;;  %3228 = vmatprep.mubr.bf16.mxu1 %v7410_v0  ;;  %3557 = vmatprep.mubr.bf16.mxu0 %v6490_v35  ;;  %v6435_v42 = vld [vmem:[%s7104_s22 + $0x330] ss:$20 sps:$4 sm:$0xff]  }
 0x273   : > { %3803 = vmatpush1.bf16.msra.mxu0 %v6433_v59 }
 0x274   : > { %v2554_v53 = vpop.f32.mrb[28].mxu0  ;;  %4595 = vmatprep.subr.bf16.mxu1 %v4438_v21  ;;  %3804 = vmatprep.subr.bf16.mxu0 %v8331_v61  ;;  %v6491_v21 = vld [vmem:[#allocation5 + $0x40] ss:$16 sps:$4 sm:$0xff]  }
 0x275   : > { %v2556_v45 = vpop.f32.mrb[29].mxu0  ;;  %4596 = vmatpush1.bf16.msra.mxu1 %v4437_v46  ;;  %v4157_v28 = vmax.f32 %v2554_v53, 0.0  ;;  %v6492_v46 = vld [vmem:[#allocation5 + $0x64] ss:$16 sps:$4 sm:$0xff]   ;;  %v6436_v53 = vld [vmem:[%s7104_s22 + $0x358] ss:$20 sps:$4 sm:$0xff]  }
 0x276   : > { %v2558_v31 = vpop.f32.mrb[30].mxu0  ;;  %v4158_v13 = vmax.f32 %v2556_v45, 0.0 }
 0x277   : > { %v4162_v0 = vmax.f32 %v2558_v31, 0.0  ;;  %v2560_v49 = vpop.f32.mrb[31].mxu0  ;;  %3805 = vmatpush1.bf16.msra.mxu0 %v6434_v12 }
 0x278   : > { %v4163_v59 = vmax.f32 %v2560_v49, 0.0  ;;  %3806 = vmatprep.subr.bf16.mxu0 %v8331_v61  ;;  %v6437_v49 = vld [vmem:[%s7104_s22 + $0x380] ss:$20 sps:$4 sm:$0xff]  }
 0x279   : > { %v4442_v35 = vpack.c.bf16 %v4162_v0, %v4157_v28  ;;  %3229 = vmatmul.mubr.bf16.gmra.mrb[76].mxu1 %v7422_v3  ;;  %3558 = vmatmul.mubr.bf16.gmra.mrb[136].mxu0 %v6491_v21  ;;  %v6438_v21 = vld [vmem:[%s7104_s22 + $0x3a8] ss:$20 sps:$4 sm:$0xff]  }
 0x27a   : > { %v4443_v11 = vpack.c.bf16 %v4163_v59, %v4158_v13  ;;  %3238 = vmatprep.mubr.bf16.mxu1 %v7424_v5  ;;  %3565 = vmatprep.mubr.bf16.mxu0 %v6492_v46 }
 0x27b   : > { %3807 = vmatpush1.bf16.msra.mxu0 %v6435_v42  ;;  %v6493_v42 = vld [vmem:[#allocation5 + $0x60] ss:$16 sps:$4 sm:$0xff]  }
 0x27c   : > { %v2564_v31 = vpop.f32.mrb[32].mxu0  ;;  %4597 = vmatprep.subr.bf16.mxu1 %v4443_v11  ;;  %3808 = vmatprep.subr.bf16.mxu0 %v8331_v61 }
 0x27d   : > { %v2566_v12 = vpop.f32.mrb[33].mxu0  ;;  %4598 = vmatpush1.bf16.msra.mxu1 %v4442_v35  ;;  %v4167_v28 = vmax.f32 %v2564_v31, 0.0  ;;  %v6494_v35 = vld [vmem:[#allocation5 + $0x84] ss:$16 sps:$4 sm:$0xff]  }
 0x27e   : > { %v2568_v45 = vpop.f32.mrb[34].mxu0  ;;  %v4168_v13 = vmax.f32 %v2566_v12, 0.0 }
 0x27f   : > { %v4172_v0 = vmax.f32 %v2568_v45, 0.0  ;;  %v2570_v3 = vpop.f32.mrb[35].mxu0  ;;  %3809 = vmatpush1.bf16.msra.mxu0 %v6436_v53 }
 0x280   : > { %v4173_v59 = vmax.f32 %v2570_v3, 0.0  ;;  %3810 = vmatprep.subr.bf16.mxu0 %v8331_v61 }
 0x281   : > { %v4447_v5 = vpack.c.bf16 %v4172_v0, %v4167_v28  ;;  %3239 = vmatmul.mubr.bf16.gmra.mrb[80].mxu1 %v7438_v39  ;;  %3566 = vmatmul.mubr.bf16.gmra.mrb[140].mxu0 %v6493_v42  ;;  %v6439_v28 = vld [vmem:[%s7104_s22 + $0x3d0] ss:$20 sps:$4 sm:$0xff]  }
 0x282   : > { %v4448_v11 = vpack.c.bf16 %v4173_v59, %v4168_v13  ;;  %3248 = vmatprep.mubr.bf16.mxu1 %v7440_v43  ;;  %3573 = vmatprep.mubr.bf16.mxu0 %v6494_v35  ;;  %v6496_v59 = vld [vmem:[#allocation5 + $0xa4] ss:$16 sps:$4 sm:$0xff]  }
 0x283   : > { %3811 = vmatpush1.bf16.msra.mxu0 %v6437_v49  ;;  %v6495_v49 = vld [vmem:[#allocation5 + $0x80] ss:$16 sps:$4 sm:$0xff]  }
 0x284   : > { %v2574_v46 = vpop.f32.mrb[36].mxu0  ;;  %4599 = vmatprep.subr.bf16.mxu1 %v4448_v11  ;;  %3812 = vmatprep.subr.bf16.mxu0 %v8331_v61 }
 0x285   : > { %v2576_v53 = vpop.f32.mrb[37].mxu0  ;;  %4600 = vmatpush1.bf16.msra.mxu1 %v4447_v5  ;;  %v4177_v12 = vmax.f32 %v2574_v46, 0.0  ;;  %v6440_v5 = vld [vmem:[%s7104_s22 + $0x3f8] ss:$20 sps:$4 sm:$0xff]  }
 0x286   : > { %v2578_v31 = vpop.f32.mrb[38].mxu0  ;;  %v4178_v0 = vmax.f32 %v2576_v53, 0.0  ;;  %v6441_v53 = vld [vmem:[%s7104_s22 + $0x420] ss:$20 sps:$4 sm:$0xff]  }
 0x287   : > { %v4182_v45 = vmax.f32 %v2578_v31, 0.0  ;;  %v2580_v39 = vpop.f32.mrb[39].mxu0  ;;  %3813 = vmatpush1.bf16.msra.mxu0 %v6438_v21 }
 0x288   : > { %v4183_v3 = vmax.f32 %v2580_v39, 0.0  ;;  %3814 = vmatprep.subr.bf16.mxu0 %v8331_v61 }
 0x289   : > { %v4452_v43 = vpack.c.bf16 %v4182_v45, %v4177_v12  ;;  %3249 = vmatmul.mubr.bf16.gmra.mrb[84].mxu1 %v7453_v1  ;;  %3574 = vmatmul.mubr.bf16.gmra.mrb[144].mxu0 %v6495_v49  ;;  %v6497_v45 = vld [vmem:[#allocation5 + $0xa0] ss:$16 sps:$4 sm:$0xff]  }
 0x28a   : > { %v4453_v13 = vpack.c.bf16 %v4183_v3, %v4178_v0  ;;  %3258 = vmatprep.mubr.bf16.mxu1 %v7455_v56  ;;  %3581 = vmatprep.mubr.bf16.mxu0 %v6496_v59 }
 0x28b   : > { %3815 = vmatpush1.bf16.msra.mxu0 %v6439_v28  ;;  %v6498_v28 = vld [vmem:[#allocation5 + $0xc4] ss:$16 sps:$4 sm:$0xff]  }
 0x28c   : > { %v2584_v42 = vpop.f32.mrb[40].mxu0  ;;  %4601 = vmatprep.subr.bf16.mxu1 %v4453_v13  ;;  %3816 = vmatprep.subr.bf16.mxu0 %v8331_v61 }
 0x28d   : > { %v2586_v11 = vpop.f32.mrb[41].mxu0  ;;  %4602 = vmatpush1.bf16.msra.mxu1 %v4452_v43  ;;  %v4187_v21 = vmax.f32 %v2584_v42, 0.0 }
 0x28e   : > { %v2588_v35 = vpop.f32.mrb[42].mxu0  ;;  %v4188_v31 = vmax.f32 %v2586_v11, 0.0 }
 0x28f   : > { %v4192_v46 = vmax.f32 %v2588_v35, 0.0  ;;  %v2590_v1 = vpop.f32.mrb[43].mxu0  ;;  %3817 = vmatpush1.bf16.msra.mxu0 %v6440_v5  ;;  %v6500_v35 = vld [vmem:[#allocation5 + $0xe4] ss:$16 sps:$4 sm:$0xff]  }
 0x290   : > { %v4193_v12 = vmax.f32 %v2590_v1, 0.0  ;;  %3818 = vmatprep.subr.bf16.mxu0 %v8331_v61 }
 0x291   : > { %v4457_v56 = vpack.c.bf16 %v4192_v46, %v4187_v21  ;;  %3259 = vmatmul.mubr.bf16.gmra.mrb[88].mxu1 %v7467_v6  ;;  %3582 = vmatmul.mubr.bf16.gmra.mrb[148].mxu0 %v6497_v45  ;;  %v6442_v46 = vld [vmem:[%s7104_s22 + $0x448] ss:$20 sps:$4 sm:$0xff]  }
 0x292   : > { %v4458_v39 = vpack.c.bf16 %v4193_v12, %v4188_v31  ;;  %3268 = vmatprep.mubr.bf16.mxu1 %v7469_v10  ;;  %3589 = vmatprep.mubr.bf16.mxu0 %v6498_v28  ;;  %v6499_v10 = vld [vmem:[#allocation5 + $0xc0] ss:$16 sps:$4 sm:$0xff]  }
 0x293   : > { %3819 = vmatpush1.bf16.msra.mxu0 %v6441_v53 }
 0x294   : > { %v2594_v0 = vpop.f32.mrb[44].mxu0  ;;  %4603 = vmatprep.subr.bf16.mxu1 %v4458_v39  ;;  %3820 = vmatprep.subr.bf16.mxu0 %v8331_v61 }
 0x295   : > { %v2596_v3 = vpop.f32.mrb[45].mxu0  ;;  %4604 = vmatpush1.bf16.msra.mxu1 %v4457_v56  ;;  %v4197_v49 = vmax.f32 %v2594_v0, 0.0  ;;  %v6502_v0 = vld [vmem:[#allocation5 + $0x104] ss:$16 sps:$4 sm:$0xff]  }
 0x296   : > { %v2598_v43 = vpop.f32.mrb[46].mxu0  ;;  %v4198_v6 = vmax.f32 %v2596_v3, 0.0 }
 0x297   : > { %v4202_v13 = vmax.f32 %v2598_v43, 0.0  ;;  %v2600_v59 = vpop.f32.mrb[47].mxu0  ;;  %3821 = vmatpush1.bf16.msra.mxu0 %v6442_v46 }
 0x298   : > { %v4203_v5 = vmax.f32 %v2600_v59, 0.0  ;;  %3822 = vmatprep.subr.bf16.mxu0 %v8331_v61 }
 0x299   : > { %v4462_v42 = vpack.c.bf16 %v4202_v13, %v4197_v49  ;;  %3269 = vmatmul.mubr.bf16.gmra.mrb[92].mxu1 %v7479_v36  ;;  %3590 = vmatmul.mubr.bf16.gmra.mrb[152].mxu0 %v6499_v10 }
 0x29a   : > { %v4463_v11 = vpack.c.bf16 %v4203_v5, %v4198_v6  ;;  %3278 = vmatprep.mubr.bf16.mxu1 %v7481_v55  ;;  %3597 = vmatprep.mubr.bf16.mxu0 %v6500_v35  ;;  %v6501_v55 = vld [vmem:[#allocation5 + $0xe0] ss:$16 sps:$4 sm:$0xff]  }
 0x29c   : > { %v2604_v21 = vpop.f32.mrb[48].mxu0  ;;  %4605 = vmatprep.subr.bf16.mxu1 %v4463_v11 }
 0x29d   : > { %v2606_v1 = vpop.f32.mrb[49].mxu0  ;;  %4606 = vmatpush1.bf16.msra.mxu1 %v4462_v42  ;;  %v4207_v31 = vmax.f32 %v2604_v21, 0.0  ;;  %v6443_v21 = vld [vmem:[%s7104_s22 + $0x470] ss:$20 sps:$4 sm:$0xff]  }
 0x29e   : > { %v2608_v53 = vpop.f32.mrb[50].mxu0  ;;  %v4208_v36 = vmax.f32 %v2606_v1, 0.0  ;;  %3823 = vmatpush1.bf16.msra.mxu0 %v6443_v21 }
 0x29f   : > { %v4212_v12 = vmax.f32 %v2608_v53, 0.0  ;;  %v2610_v56 = vpop.f32.mrb[51].mxu0  ;;  %3824 = vmatprep.subr.bf16.mxu0 %v8331_v61 }
 0x2a0   : > { %v4213_v45 = vmax.f32 %v2610_v56, 0.0 }
 0x2a1   : > { %v4467_v39 = vpack.c.bf16 %v4212_v12, %v4207_v31  ;;  %3279 = vmatmul.mubr.bf16.gmra.mrb[96].mxu1 %v7493_v4  ;;  %3598 = vmatmul.mubr.bf16.gmra.mrb[156].mxu0 %v6501_v55  ;;  %v6503_v4 = vld [vmem:[#allocation5 + $0x100] ss:$16 sps:$4 sm:$0xff]  }
 0x2a2   : > { %v4468_v28 = vpack.c.bf16 %v4213_v45, %v4208_v36  ;;  %3288 = vmatprep.mubr.bf16.mxu1 %v7495_v20  ;;  %3605 = vmatprep.mubr.bf16.mxu0 %v6502_v0  ;;  %v6504_v20 = vld [vmem:[#allocation5 + $0x124] ss:$16 sps:$4 sm:$0xff]  }
 0x2a4   : > { %v2614_v3 = vpop.f32.mrb[52].mxu0  ;;  %4607 = vmatprep.subr.bf16.mxu1 %v4468_v28 }
 0x2a5   : > { %v2616_v43 = vpop.f32.mrb[53].mxu0  ;;  %4608 = vmatpush1.bf16.msra.mxu1 %v4467_v39  ;;  %v4217_v13 = vmax.f32 %v2614_v3, 0.0  ;;  %v6506_v39 = vld [vmem:[#allocation5 + $0x144] ss:$16 sps:$4 sm:$0xff]  }
 0x2a6   : > { %v2618_v49 = vpop.f32.mrb[54].mxu0  ;;  %v4218_v5 = vmax.f32 %v2616_v43, 0.0 }
 0x2a7   : > { %v4222_v59 = vmax.f32 %v2618_v49, 0.0  ;;  %v2620_v6 = vpop.f32.mrb[55].mxu0 }
 0x2a8   : > { %v4223_v42 = vmax.f32 %v2620_v6, 0.0 }
 0x2a9   : > { %v4472_v10 = vpack.c.bf16 %v4222_v59, %v4217_v13  ;;  %3289 = vmatmul.mubr.bf16.gmra.mrb[100].mxu1 %v7505_v2  ;;  %3606 = vmatmul.mubr.bf16.gmra.mrb[160].mxu0 %v6503_v4 }
 0x2aa   : > { %v4473_v11 = vpack.c.bf16 %v4223_v42, %v4218_v5  ;;  %3298 = vmatprep.mubr.bf16.mxu1 %v7507_v29  ;;  %3613 = vmatprep.mubr.bf16.mxu0 %v6504_v20  ;;  %v6505_v29 = vld [vmem:[#allocation5 + $0x120] ss:$16 sps:$4 sm:$0xff]  }
 0x2ac   : > { %v2624_v35 = vpop.f32.mrb[56].mxu0  ;;  %4609 = vmatprep.subr.bf16.mxu1 %v4473_v11 }
 0x2ad   : > { %v2626_v46 = vpop.f32.mrb[57].mxu0  ;;  %4610 = vmatpush1.bf16.msra.mxu1 %v4472_v10  ;;  %v4227_v53 = vmax.f32 %v2624_v35, 0.0  ;;  %v6444_v10 = vld [vmem:[%s7104_s22 + $0x498] ss:$20 sps:$4 sm:$0xff]  }
 0x2ae   : > { %v2628_v1 = vpop.f32.mrb[58].mxu0  ;;  %v4228_v2 = vmax.f32 %v2626_v46, 0.0  ;;  %3825 = vmatpush1.bf16.msra.mxu0 %v6444_v10 }
 0x2af   : > { %v4232_v31 = vmax.f32 %v2628_v1, 0.0  ;;  %v2630_v12 = vpop.f32.mrb[59].mxu0  ;;  %3826 = vmatprep.subr.bf16.mxu0 %v8331_v61 }
 0x2b0   : > { %v4233_v56 = vmax.f32 %v2630_v12, 0.0 }
 0x2b1   : > { %v4477_v36 = vpack.c.bf16 %v4232_v31, %v4227_v53  ;;  %3299 = vmatmul.mubr.bf16.gmra.mrb[104].mxu1 %v7518_v7  ;;  %3614 = vmatmul.mubr.bf16.gmra.mrb[164].mxu0 %v6505_v29  ;;  %v6507_v7 = vld [vmem:[#allocation5 + $0x140] ss:$16 sps:$4 sm:$0xff]   ;;  %v6510_v31 = vld [vmem:[#allocation5 + $0x184] ss:$16 sps:$4 sm:$0xff]  }
 0x2b2   : > { %v4478_v45 = vpack.c.bf16 %v4233_v56, %v4228_v2  ;;  %3308 = vmatprep.mubr.bf16.mxu1 %v7521_v48  ;;  %3621 = vmatprep.mubr.bf16.mxu0 %v6506_v39  ;;  %v6508_v48 = vld [vmem:[#allocation5 + $0x164] ss:$16 sps:$4 sm:$0xff]  }
 0x2b4   : > { %v2634_v55 = vpop.f32.mrb[60].mxu0  ;;  %4611 = vmatprep.subr.bf16.mxu1 %v4478_v45 }
 0x2b5   : > { %v2636_v28 = vpop.f32.mrb[61].mxu0  ;;  %4612 = vmatpush1.bf16.msra.mxu1 %v4477_v36  ;;  %v4237_v3 = vmax.f32 %v2634_v55, 0.0 }
 0x2b6   : > { %v2638_v0 = vpop.f32.mrb[62].mxu0  ;;  %v4238_v13 = vmax.f32 %v2636_v28, 0.0 }
 0x2b7   : > { %v4242_v43 = vmax.f32 %v2638_v0, 0.0  ;;  %v2640_v49 = vpop.f32.mrb[63].mxu0 }
 0x2b8   : > { %v4243_v59 = vmax.f32 %v2640_v49, 0.0 }
 0x2b9   : > { %v4482_v6 = vpack.c.bf16 %v4242_v43, %v4237_v3  ;;  %3309 = vmatmul.mubr.bf16.gmra.mrb[108].mxu1 %v7529_v15  ;;  %3622 = vmatmul.mubr.bf16.gmra.mrb[168].mxu0 %v6507_v7  ;;  %v6445_v43 = vld [vmem:[%s7104_s22 + $0x4c0] ss:$20 sps:$4 sm:$0xff]  }
 0x2ba   : > { %v4483_v5 = vpack.c.bf16 %v4243_v59, %v4238_v13  ;;  %3318 = vmatprep.mubr.bf16.mxu1 %v7531_v57  ;;  %3629 = vmatprep.mubr.bf16.mxu0 %v6508_v48  ;;  %v6509_v57 = vld [vmem:[#allocation5 + $0x160] ss:$16 sps:$4 sm:$0xff]  }
 0x2bb   : > { %3827 = vmatpush1.bf16.msra.mxu0 %v6445_v43 }
 0x2bc   : > { %v2644_v42 = vpop.f32.mrb[64].mxu0  ;;  %4613 = vmatprep.subr.bf16.mxu1 %v4483_v5  ;;  %3828 = vmatprep.subr.bf16.mxu0 %v8331_v61  ;;  %v8335_v5 = vld [vmem:[#allocation21_spill] sm:$0xff] }
 0x2bd   : > { %v2646_v4 = vpop.f32.mrb[65].mxu0  ;;  %4614 = vmatpush1.bf16.msra.mxu1 %v4482_v6  ;;  %v4247_v20 = vmax.f32 %v2644_v42, 0.0  ;;  %v8334_v6 = vld [vmem:[#allocation20_spill] sm:$0xff] }
 0x2be   : > { %v2648_v11 = vpop.f32.mrb[66].mxu0  ;;  %v4248_v15 = vmax.f32 %v2646_v4, 0.0  ;;  %v8336_v4 = vld [vmem:[#allocation15_spill] sm:$0xff] }
 0x2bf   : > { %v4252_v35 = vmax.f32 %v2648_v11, 0.0  ;;  %v2650_v21 = vpop.f32.mrb[67].mxu0  ;;  %v6513_v11 = vld [vmem:[#allocation5 + $0x1a0] ss:$16 sps:$4 sm:$0xff]  }
 0x2c0   : > { %v4253_v46 = vmax.f32 %v2650_v21, 0.0  ;;  %v6514_v21 = vld [vmem:[#allocation5 + $0x1c4] ss:$16 sps:$4 sm:$0xff]  }
 0x2c1   : > { %v7765_v1 = vpack.c.bf16 %v4252_v35, %v4247_v20  ;;  %3319 = vmatmul.mubr.bf16.gmra.mrb[112].mxu1 %v7538_v18  ;;  %3630 = vmatmul.mubr.bf16.gmra.mrb[172].mxu0 %v6509_v57 }
 0x2c2   : > { %v4488_v53 = vpack.c.bf16 %v4253_v46, %v4248_v15  ;;  %3328 = vmatprep.mubr.bf16.mxu1 %v7541_v38  ;;  %3637 = vmatprep.mubr.bf16.mxu0 %v6510_v31  ;;  %v6511_v38 = vld [vmem:[#allocation5 + $0x180] ss:$16 sps:$4 sm:$0xff]  }
 0x2c4   : > { %v2654_v12 = vpop.f32.mrb[68].mxu0  ;;  %4624 = vmatprep.subr.bf16.mxu1 %v4488_v53 }
 0x2c5   : > { %v2655_v2 = vadd.f32 %v2654_v12, %v7571_v25  ;;  %v2656_v56 = vpop.f32.mrb[69].mxu0  ;;  %v6512_v25 = vld [vmem:[#allocation5 + $0x1a4] ss:$16 sps:$4 sm:$0xff]  }
 0x2c6   : > { %v2657_v36 = vadd.f32 %v2656_v56, %v7573_v27  ;;  %v2658_v29 = vpop.f32.mrb[70].mxu0  ;;  %v8338_v12 = vld [vmem:[#allocation22_spill] sm:$0xff] }
 0x2c7   : > { %v2659_v45 = vadd.f32 %v2658_v29, %v7575_v30  ;;  %v2660_v39 = vpop.f32.mrb[71].mxu0  ;;  %v4257_v55 = vmax.f32 %v2655_v2, 0.0 }
 0x2c8   : > { %v2661_v18 = vadd.f32 %v2660_v39, %v7577_v32  ;;  %v4258_v0 = vmax.f32 %v2657_v36, 0.0  ;;  %v8339_v36 = vld [vmem:[#allocation23_spill] sm:$0xff] }
 0x2c9   : > { %v4262_v28 = vmax.f32 %v2659_v45, 0.0  ;;  %3329 = vmatmul.mubr.bf16.gmra.mrb[116].mxu1 %v7547_v41  ;;  %3638 = vmatmul.mubr.bf16.gmra.mrb[176].mxu0 %v6511_v38 }
 0x2ca   : > { %v4263_v3 = vmax.f32 %v2661_v18, 0.0  ;;  %3338 = vmatprep.mubr.bf16.mxu1 %v7549_v44  ;;  %3645 = vmatprep.mubr.bf16.mxu0 %v6512_v25  ;;  %v8340_v18 = vld [vmem:[#allocation17_spill] sm:$0xff] }
 0x2cb   : > { %v7776_v27 = vpack.c.bf16 %v4262_v28, %v4257_v55  ;;  %v6515_v55 = vld [vmem:[#allocation5 + $0x1c0] ss:$16 sps:$4 sm:$0xff]  }
 0x2cc   : > { %v7778_v49 = vpack.c.bf16 %v4263_v3, %v4258_v0  ;;  %v2664_v30 = vpop.f32.mrb[72].mxu0  ;;  %v8341_v0 = vld [vmem:[#allocation18_spill] sm:$0xff]  ;;  %v6448_v3 = vld [vmem:[%s7104_s22 + $0x4e8] ss:$20 sps:$4 sm:$0xff]  }
 0x2cd   : > { %v2665_v32 = vadd.f32 %v2664_v30, %v7579_v14  ;;  %v2666_v13 = vpop.f32.mrb[73].mxu0  ;;  %v8337_v14 = vld [vmem:[#allocation16_spill] sm:$0xff]  ;;  %3829 = vmatpush1.bf16.msra.mxu0 %v6448_v3 }
 0x2ce   : > { %v2667_v41 = vadd.f32 %v2666_v13, %v7581_v33  ;;  %v2668_v59 = vpop.f32.mrb[74].mxu0 }
 0x2cf   : > { %v2669_v7 = vadd.f32 %v2668_v59, %v8334_v6  ;;  %v2670_v44 = vpop.f32.mrb[75].mxu0  ;;  %v4267_v42 = vmax.f32 %v2665_v32, 0.0  ;;  %v8342_v59 = vld [vmem:[#allocation24_spill] sm:$0xff] }
 0x2d0   : > { %v2671_v48 = vadd.f32 %v2670_v44, %v8335_v5  ;;  %v4268_v20 = vmax.f32 %v2667_v41, 0.0  ;;  %v8343_v44 = vld [vmem:[#allocation25_spill] sm:$0xff] }
 0x2d1   : > { %v4272_v10 = vmax.f32 %v2669_v7, 0.0  ;;  %3339 = vmatmul.mubr.bf16.gmra.mrb[120].mxu1 %v8336_v4  ;;  %3646 = vmatmul.mubr.bf16.gmra.mrb[180].mxu0 %v6513_v11  ;;  %v6517_v4 = vld [vmem:[#allocation5 + $0x1e0] ss:$16 sps:$4 sm:$0xff]  }
 0x2d2   : > { %v4273_v35 = vmax.f32 %v2671_v48, 0.0  ;;  %3348 = vmatprep.mubr.bf16.mxu1 %v8337_v14  ;;  %3653 = vmatprep.mubr.bf16.mxu0 %v6514_v21 }
 0x2d3   : > { %v7787_v61 = vpack.c.bf16 %v4272_v10, %v4267_v42  ;;  %v8344_v10 = vld [vmem:[#allocation19_spill] sm:$0xff] }
 0x2d4   : > { %v7789_v33 = vpack.c.bf16 %v4273_v35, %v4268_v20  ;;  %v2674_v15 = vpop.f32.mrb[76].mxu0  ;;  %v6518_v35 = vld [vmem:[#allocation5 + $0x24c] ss:$16 sps:$4 sm:$0xff]  }
 0x2d5   : > { %v2675_v46 = vadd.f32 %v2674_v15, %v7587_v47  ;;  %v2676_v57 = vpop.f32.mrb[77].mxu0  ;;  %v6516_v47 = vld [vmem:[#allocation5 + $0x1e4] ss:$16 sps:$4 sm:$0xff]  }
 0x2d6   : > { %v2677_v53 = vadd.f32 %v2676_v57, %v7589_v17  ;;  %v2678_v31 = vpop.f32.mrb[78].mxu0  ;;  %v8345_v57 = vld [vmem:[#allocation26_spill] sm:$0xff] }
 0x2d7   : > { %v2679_v2 = vadd.f32 %v2678_v31, %v8338_v12  ;;  %v2680_v56 = vpop.f32.mrb[79].mxu0  ;;  %v4277_v45 = vmax.f32 %v2675_v46, 0.0  ;;  %v8346_v12 = vld [vmem:[#allocation27_spill] sm:$0xff] }
 0x2d8   : > { %v2681_v29 = vadd.f32 %v2680_v56, %v8339_v36  ;;  %v4278_v28 = vmax.f32 %v2677_v53, 0.0  ;;  %v8347_v36 = vld [vmem:[#allocation28_spill] sm:$0xff] }
 0x2d9   : > { %v4282_v39 = vmax.f32 %v2679_v2, 0.0  ;;  %3349 = vmatmul.mubr.bf16.gmra.mrb[124].mxu1 %v8340_v18  ;;  %3654 = vmatmul.mubr.bf16.gmra.mrb[184].mxu0 %v6515_v55  ;;  %v6520_v18 = vld [vmem:[#allocation5 + $0x248] ss:$16 sps:$4 sm:$0xff]   ;;  %v6521_v55 = vld [vmem:[#allocation5 + $0x200] ss:$16 sps:$4 sm:$0xff]  }
 0x2da   : > { %v4283_v38 = vmax.f32 %v2681_v29, 0.0  ;;  %3358 = vmatprep.mubr.bf16.mxu1 %v8341_v0  ;;  %3661 = vmatprep.mubr.bf16.mxu0 %v6516_v47  ;;  %v6522_v0 = vld [vmem:[#allocation5 + $0x26c] ss:$16 sps:$4 sm:$0xff]  }
 0x2db   : > { %v7798_v17 = vpack.c.bf16 %v4282_v39, %v4277_v45 }
 0x2dc   : > { %v7800_v25 = vpack.c.bf16 %v4283_v38, %v4278_v28  ;;  %v2684_v43 = vpop.f32.mrb[80].mxu0 }
 0x2dd   : > { %v2685_v30 = vadd.f32 %v2684_v43, %v7596_v8  ;;  %v2686_v32 = vpop.f32.mrb[81].mxu0  ;;  %v6519_v8 = vld [vmem:[#allocation5 + $0x204] ss:$16 sps:$4 sm:$0xff]  }
 0x2de   : > { %v2687_v13 = vadd.f32 %v2686_v32, %v7599_v51  ;;  %v2688_v41 = vpop.f32.mrb[82].mxu0 }
 0x2df   : > { %v2689_v6 = vadd.f32 %v2688_v41, %v8342_v59  ;;  %v2690_v7 = vpop.f32.mrb[83].mxu0  ;;  %v4287_v48 = vmax.f32 %v2685_v30, 0.0  ;;  %v8348_v30 = vld [vmem:[#allocation29_spill] sm:$0xff]  ;;  %v8349_v41 = vld [vmem:[#allocation30_spill] sm:$0xff] }
 0x2e0   : > { %v2691_v5 = vadd.f32 %v2690_v7, %v8343_v44  ;;  %v4288_v11 = vmax.f32 %v2687_v13, 0.0  ;;  %v8350_v7 = vld [vmem:[#allocation31_spill] sm:$0xff] }
 0x2e1   : > { %v4292_v42 = vmax.f32 %v2689_v6, 0.0  ;;  %3359 = vmatmul.mubr.bf16.gmra.mrb[128].mxu1 %v8344_v10  ;;  %3662 = vmatmul.mubr.bf16.gmra.mrb[188].mxu0 %v6517_v4 }
 0x2e2   : > { %v4293_v20 = vmax.f32 %v2691_v5, 0.0  ;;  %3368 = vmatprep.mubr.bf16.mxu1 %v6518_v35  ;;  %3669 = vmatprep.mubr.bf16.mxu0 %v6519_v8 }
 0x2e3   : > { %v7807_v14 = vpack.c.bf16 %v4292_v42, %v4287_v48  ;;  %v8351_v48 = vld [vmem:[#allocation32_spill] sm:$0xff] }
 0x2e4   : > { %v7809_v51 = vpack.c.bf16 %v4293_v20, %v4288_v11  ;;  %v2694_v21 = vpop.f32.mrb[84].mxu0  ;;  %v6524_v11 = vld [vmem:[#allocation5 + $0x268] ss:$16 sps:$4 sm:$0xff]   ;;  %v6525_v20 = vld [vmem:[#allocation5 + $0x220] ss:$16 sps:$4 sm:$0xff]  }
 0x2e5   : > { %v2695_v15 = vadd.f32 %v2694_v21, %v7606_v50  ;;  %v2696_v46 = vpop.f32.mrb[85].mxu0  ;;  %v6523_v50 = vld [vmem:[#allocation5 + $0x224] ss:$16 sps:$4 sm:$0xff]   ;;  %v6526_v21 = vld [vmem:[#allocation5 + $0x28c] ss:$16 sps:$4 sm:$0xff]  }
 0x2e6   : > { %v2697_v53 = vadd.f32 %v2696_v46, %v8345_v57  ;;  %v2698_v31 = vpop.f32.mrb[86].mxu0 }
 0x2e7   : > { %v2699_v2 = vadd.f32 %v2698_v31, %v8346_v12  ;;  %v2700_v56 = vpop.f32.mrb[87].mxu0  ;;  %v4297_v45 = vmax.f32 %v2695_v15, 0.0  ;;  %v6527_v15 = vld [vmem:[#allocation5 + $0x244] ss:$16 sps:$4 sm:$0xff]   ;;  %v8352_v31 = vld [vmem:[#allocation33_spill] sm:$0xff] }
 0x2e8   : > { %v2701_v29 = vadd.f32 %v2700_v56, %v8347_v36  ;;  %v4298_v28 = vmax.f32 %v2697_v53, 0.0  ;;  %v8353_v56 = vld [vmem:[#allocation34_spill] sm:$0xff] }
 0x2e9   : > { %v4302_v39 = vmax.f32 %v2699_v2, 0.0  ;;  %3369 = vmatmul.mubr.bf16.gmra.mrb[132].mxu1 %v6520_v18  ;;  %3670 = vmatmul.mubr.bf16.gmra.mrb[192].mxu0 %v6521_v55  ;;  %v8355_v55 = vld [vmem:[#allocation36_spill] sm:$0xff] }
 0x2ea   : > { %v4303_v38 = vmax.f32 %v2701_v29, 0.0  ;;  %3378 = vmatprep.mubr.bf16.mxu1 %v6522_v0  ;;  %3677 = vmatprep.mubr.bf16.mxu0 %v6523_v50  ;;  %v6528_v50 = vld [vmem:[#allocation5 + $0x288] ss:$16 sps:$4 sm:$0xff]  }
 0x2eb   : > { %v7815_v47 = vpack.c.bf16 %v4302_v39, %v4297_v45  ;;  %v8354_v45 = vld [vmem:[#allocation35_spill] sm:$0xff] }
 0x2ec   : > { %v7817_v3 = vpack.c.bf16 %v4303_v38, %v4298_v28  ;;  %v2704_v43 = vpop.f32.mrb[88].mxu0 }
 0x2ed   : > { %v2705_v32 = vadd.f32 %v2704_v43, %v8348_v30  ;;  %v2706_v13 = vpop.f32.mrb[89].mxu0  ;;  %v6529_v43 = vld [vmem:[#allocation5 + $0x240] ss:$16 sps:$4 sm:$0xff]  }
 0x2ee   : > { %v2707_v59 = vadd.f32 %v2706_v13, %v8349_v41  ;;  %v2708_v6 = vpop.f32.mrb[90].mxu0  ;;  %v6530_v13 = vld [vmem:[#allocation5 + $0x2ac] ss:$16 sps:$4 sm:$0xff]   ;;  %v6531_v41 = vld [vmem:[#allocation5 + $0x264] ss:$16 sps:$4 sm:$0xff]  }
 0x2ef   : > { %v2709_v44 = vadd.f32 %v2708_v6, %v8350_v7  ;;  %v2710_v5 = vpop.f32.mrb[91].mxu0  ;;  %v4307_v10 = vmax.f32 %v2705_v32, 0.0 }
 0x2f0   : > { %v2711_v42 = vadd.f32 %v2710_v5, %v8351_v48  ;;  %v4308_v35 = vmax.f32 %v2707_v59, 0.0 }
 0x2f1   : > { %v4312_v4 = vmax.f32 %v2709_v44, 0.0  ;;  %3379 = vmatmul.mubr.bf16.gmra.mrb[136].mxu1 %v6524_v11  ;;  %3678 = vmatmul.mubr.bf16.gmra.mrb[196].mxu0 %v6525_v20  ;;  %v8356_v44 = vld [vmem:[#allocation37_spill] sm:$0xff]  ;;  %v8358_v11 = vld [vmem:[#allocation39_spill] sm:$0xff] }
 0x2f2   : > { %v4313_v8 = vmax.f32 %v2711_v42, 0.0  ;;  %3388 = vmatprep.mubr.bf16.mxu1 %v6526_v21  ;;  %3685 = vmatprep.mubr.bf16.mxu0 %v6527_v15  ;;  %v8357_v42 = vld [vmem:[#allocation38_spill] sm:$0xff] }
 0x2f3   : > { %v7823_v46 = vpack.c.bf16 %v4312_v4, %v4307_v10 }
 0x2f4   : > { %v7825_v57 = vpack.c.bf16 %v4313_v8, %v4308_v35  ;;  %v2714_v53 = vpop.f32.mrb[92].mxu0  ;;  %v8359_v8 = vld [vmem:[#allocation40_spill] sm:$0xff] }
 0x2f5   : > { %v2715_v12 = vadd.f32 %v2714_v53, %v8352_v31  ;;  %v2716_v2 = vpop.f32.mrb[93].mxu0  ;;  %v6532_v31 = vld [vmem:[#allocation5 + $0x2a8] ss:$16 sps:$4 sm:$0xff]  }
 0x2f6   : > { %v2717_v36 = vadd.f32 %v2716_v2, %v8353_v56  ;;  %v2718_v29 = vpop.f32.mrb[94].mxu0 }
 0x2f7   : > { %v2719_v39 = vadd.f32 %v2718_v29, %v8354_v45  ;;  %v2720_v18 = vpop.f32.mrb[95].mxu0  ;;  %v4317_v38 = vmax.f32 %v2715_v12, 0.0  ;;  %v6533_v12 = vld [vmem:[#allocation5 + $0x260] ss:$16 sps:$4 sm:$0xff]   ;;  %v6535_v29 = vld [vmem:[#allocation5 + $0x284] ss:$16 sps:$4 sm:$0xff]  }
 0x2f8   : > { %v2721_v28 = vadd.f32 %v2720_v18, %v8355_v55  ;;  %v4318_v30 = vmax.f32 %v2717_v36, 0.0  ;;  %v6534_v36 = vld [vmem:[#allocation5 + $0x2cc] ss:$16 sps:$4 sm:$0xff]  }
 0x2f9   : > { %v4322_v0 = vmax.f32 %v2719_v39, 0.0  ;;  %3389 = vmatmul.mubr.bf16.gmra.mrb[140].mxu1 %v6528_v50  ;;  %3686 = vmatmul.mubr.bf16.gmra.mrb[200].mxu0 %v6529_v43  ;;  %v8360_v55 = vld [vmem:[#allocation41_spill] sm:$0xff] }
 0x2fa   : > { %v4323_v32 = vmax.f32 %v2721_v28, 0.0  ;;  %3398 = vmatprep.mubr.bf16.mxu1 %v6530_v13  ;;  %3693 = vmatprep.mubr.bf16.mxu0 %v6531_v41  ;;  %v8363_v41 = vld [vmem:[#allocation44_spill] sm:$0xff] }
 0x2fb   : > { %v7831_v59 = vpack.c.bf16 %v4322_v0, %v4317_v38  ;;  %v8361_v0 = vld [vmem:[#allocation42_spill] sm:$0xff] }
 0x2fc   : > { %v7833_v6 = vpack.c.bf16 %v4323_v32, %v4318_v30  ;;  %v2724_v7 = vpop.f32.mrb[96].mxu0  ;;  %v8362_v30 = vld [vmem:[#allocation43_spill] sm:$0xff] }
 0x2fd   : > { %v2725_v5 = vadd.f32 %v2724_v7, %v8356_v44  ;;  %v2726_v48 = vpop.f32.mrb[97].mxu0 }
 0x2fe   : > { %v2727_v10 = vadd.f32 %v2726_v48, %v8357_v42  ;;  %v2728_v4 = vpop.f32.mrb[98].mxu0  ;;  %v6536_v48 = vld [vmem:[#allocation5 + $0x2c8] ss:$16 sps:$4 sm:$0xff]   ;;  %v6537_v42 = vld [vmem:[#allocation5 + $0x280] ss:$16 sps:$4 sm:$0xff]  }
 0x2ff   : > { %v2729_v20 = vadd.f32 %v2728_v4, %v8358_v11  ;;  %v2730_v35 = vpop.f32.mrb[99].mxu0  ;;  %v4327_v15 = vmax.f32 %v2725_v5, 0.0  ;;  %v6538_v11 = vld [vmem:[#allocation5 + $0x2ec] ss:$16 sps:$4 sm:$0xff]  }
 0x300   : > { %v2731_v21 = vadd.f32 %v2730_v35, %v8359_v8  ;;  %v4328_v2 = vmax.f32 %v2727_v10, 0.0 }
 0x301   : > { %v4332_v53 = vmax.f32 %v2729_v20, 0.0  ;;  %3399 = vmatmul.mubr.bf16.gmra.mrb[144].mxu1 %v6532_v31  ;;  %3694 = vmatmul.mubr.bf16.gmra.mrb[204].mxu0 %v6533_v12  ;;  %v6539_v20 = vld [vmem:[#allocation5 + $0x2a4] ss:$16 sps:$4 sm:$0xff]  }
 0x302   : > { %v4333_v56 = vmax.f32 %v2731_v21, 0.0  ;;  %3408 = vmatprep.mubr.bf16.mxu1 %v6534_v36  ;;  %3701 = vmatprep.mubr.bf16.mxu0 %v6535_v29  ;;  %v8365_v12 = vld [vmem:[#allocation46_spill] sm:$0xff]  ;;  %v8366_v36 = vld [vmem:[#allocation47_spill] sm:$0xff] }
 0x303   : > { %v7839_v45 = vpack.c.bf16 %v4332_v53, %v4327_v15  ;;  %v8364_v15 = vld [vmem:[#allocation45_spill] sm:$0xff] }
 0x304   : > { %v7841_v39 = vpack.c.bf16 %v4333_v56, %v4328_v2  ;;  %v2734_v18 = vpop.f32.mrb[100].mxu0 }
 0x305   : > { %v2735_v28 = vadd.f32 %v2734_v18, %v8360_v55  ;;  %v2736_v38 = vpop.f32.mrb[101].mxu0  ;;  %v8367_v55 = vld [vmem:[#allocation48_spill] sm:$0xff] }
 0x306   : > { %v2737_v50 = vadd.f32 %v2736_v38, %v8361_v0  ;;  %v2738_v43 = vpop.f32.mrb[102].mxu0 }
 0x307   : > { %v2739_v32 = vadd.f32 %v2738_v43, %v8362_v30  ;;  %v2740_v13 = vpop.f32.mrb[103].mxu0  ;;  %v4337_v44 = vmax.f32 %v2735_v28, 0.0  ;;  %v6541_v43 = vld [vmem:[#allocation5 + $0x2a0] ss:$16 sps:$4 sm:$0xff]  }
 0x308   : > { %v2741_v7 = vadd.f32 %v2740_v13, %v8363_v41  ;;  %v4338_v10 = vmax.f32 %v2737_v50, 0.0  ;;  %v6540_v50 = vld [vmem:[#allocation5 + $0x2e8] ss:$16 sps:$4 sm:$0xff]   ;;  %v6542_v13 = vld [vmem:[#allocation5 + $0x30c] ss:$16 sps:$4 sm:$0xff]  }
 0x309   : > { %v4342_v5 = vmax.f32 %v2739_v32, 0.0  ;;  %3409 = vmatmul.mubr.bf16.gmra.mrb[148].mxu1 %v6536_v48  ;;  %3702 = vmatmul.mubr.bf16.gmra.mrb[208].mxu0 %v6537_v42  ;;  %v6543_v41 = vld [vmem:[#allocation5 + $0x2c4] ss:$16 sps:$4 sm:$0xff]   ;;  %v8368_v48 = vld [vmem:[#allocation49_spill] sm:$0xff] }
 0x30a   : > { %v4343_v4 = vmax.f32 %v2741_v7, 0.0  ;;  %3418 = vmatprep.mubr.bf16.mxu1 %v6538_v11  ;;  %3709 = vmatprep.mubr.bf16.mxu0 %v6539_v20 }
 0x30b   : > { %v7847_v35 = vpack.c.bf16 %v4342_v5, %v4337_v44 }
 0x30c   : > { %v7849_v8 = vpack.c.bf16 %v4343_v4, %v4338_v10  ;;  %v2744_v21 = vpop.f32.mrb[104].mxu0 }
 0x30d   : > { %v2745_v53 = vadd.f32 %v2744_v21, %v8364_v15  ;;  %v2746_v31 = vpop.f32.mrb[105].mxu0 }
 0x30e   : > { %v2747_v2 = vadd.f32 %v2746_v31, %v8365_v12  ;;  %v2748_v56 = vpop.f32.mrb[106].mxu0  ;;  %v6544_v12 = vld [vmem:[#allocation5 + $0x308] ss:$16 sps:$4 sm:$0xff]  }
 0x30f   : > { %v2749_v29 = vadd.f32 %v2748_v56, %v8366_v36  ;;  %v2750_v18 = vpop.f32.mrb[107].mxu0  ;;  %v4347_v38 = vmax.f32 %v2745_v53, 0.0 }
 0x310   : > { %v2751_v28 = vadd.f32 %v2750_v18, %v8367_v55  ;;  %v4348_v30 = vmax.f32 %v2747_v2, 0.0  ;;  %v6545_v2 = vld [vmem:[#allocation5 + $0x2c0] ss:$16 sps:$4 sm:$0xff]   ;;  %v6547_v18 = vld [vmem:[#allocation5 + $0x2e4] ss:$16 sps:$4 sm:$0xff]  }
 0x311   : > { %v4352_v0 = vmax.f32 %v2749_v29, 0.0  ;;  %3419 = vmatmul.mubr.bf16.gmra.mrb[152].mxu1 %v6540_v50  ;;  %3710 = vmatmul.mubr.bf16.gmra.mrb[212].mxu0 %v6541_v43  ;;  %v6546_v29 = vld [vmem:[#allocation5 + $0x32c] ss:$16 sps:$4 sm:$0xff]  }
 0x312   : > { %v4353_v32 = vmax.f32 %v2751_v28, 0.0  ;;  %3428 = vmatprep.mubr.bf16.mxu1 %v6542_v13  ;;  %3717 = vmatprep.mubr.bf16.mxu0 %v6543_v41 }
 0x313   : > { %v7855_v7 = vpack.c.bf16 %v4352_v0, %v4347_v38 }
 0x314   : > { %v7857_v44 = vpack.c.bf16 %v4353_v32, %v4348_v30  ;;  %v2754_v5 = vpop.f32.mrb[108].mxu0  ;;  %v8369_v30 = vld [vmem:[#allocation50_spill] sm:$0xff] }
 0x315   : > { %v2755_v42 = vadd.f32 %v2754_v5, %v8368_v48  ;;  %v2756_v10 = vpop.f32.mrb[109].mxu0  ;;  %v6548_v5 = vld [vmem:[#allocation5 + $0x328] ss:$16 sps:$4 sm:$0xff]   ;;  %v6549_v48 = vld [vmem:[#allocation5 + $0x2e0] ss:$16 sps:$4 sm:$0xff]  }
 0x316   : > { %v2757_v4 = vadd.f32 %v2756_v10, %v7671_v58  ;;  %v2758_v11 = vpop.f32.mrb[110].mxu0 }
 0x317   : > { %v2759_v20 = vadd.f32 %v2758_v11, %v7673_v24  ;;  %v2760_v21 = vpop.f32.mrb[111].mxu0  ;;  %v4357_v53 = vmax.f32 %v2755_v42, 0.0 }
 0x318   : > { %v2761_v15 = vadd.f32 %v2760_v21, %v7675_v23  ;;  %v4358_v56 = vmax.f32 %v2757_v4, 0.0  ;;  %v6550_v4 = vld [vmem:[#allocation5 + $0x34c] ss:$16 sps:$4 sm:$0xff]  }
 0x319   : > { %v4362_v31 = vmax.f32 %v2759_v20, 0.0  ;;  %3429 = vmatmul.mubr.bf16.gmra.mrb[156].mxu1 %v6544_v12  ;;  %3718 = vmatmul.mubr.bf16.gmra.mrb[216].mxu0 %v6545_v2 }
 0x31a   : > { %v4363_v36 = vmax.f32 %v2761_v15, 0.0  ;;  %3438 = vmatprep.mubr.bf16.mxu1 %v6546_v29  ;;  %3725 = vmatprep.mubr.bf16.mxu0 %v6547_v18  ;;  %v6552_v29 = vld [vmem:[#allocation5 + $0x348] ss:$16 sps:$4 sm:$0xff]   ;;  %v6553_v18 = vld [vmem:[#allocation5 + $0x300] ss:$16 sps:$4 sm:$0xff]  }
 0x31b   : > { %v7863_v55 = vpack.c.bf16 %v4362_v31, %v4357_v53 }
 0x31c   : > { %v7865_v58 = vpack.c.bf16 %v4363_v36, %v4358_v56  ;;  %v2764_v24 = vpop.f32.mrb[112].mxu0 }
 0x31d   : > { %v2765_v28 = vadd.f32 %v2764_v24, %v7678_v52  ;;  %v2766_v23 = vpop.f32.mrb[113].mxu0  ;;  %v6551_v52 = vld [vmem:[#allocation5 + $0x304] ss:$16 sps:$4 sm:$0xff]  }
 0x31e   : > { %v2767_v38 = vadd.f32 %v2766_v23, %v7681_v60  ;;  %v2768_v0 = vpop.f32.mrb[114].mxu0  ;;  %v6554_v23 = vld [vmem:[#allocation5 + $0x36c] ss:$16 sps:$4 sm:$0xff]  }
 0x31f   : > { %v2769_v50 = vadd.f32 %v2768_v0, %v7684_v19  ;;  %v2770_v43 = vpop.f32.mrb[115].mxu0  ;;  %v4367_v13 = vmax.f32 %v2765_v28, 0.0 }
 0x320   : > { %v2771_v32 = vadd.f32 %v2770_v43, %v8369_v30  ;;  %v4368_v42 = vmax.f32 %v2767_v38, 0.0 }
 0x321   : > { %v4372_v41 = vmax.f32 %v2769_v50, 0.0  ;;  %3439 = vmatmul.mubr.bf16.gmra.mrb[160].mxu1 %v6548_v5  ;;  %3726 = vmatmul.mubr.bf16.gmra.mrb[220].mxu0 %v6549_v48 }
 0x322   : > { %v4373_v10 = vmax.f32 %v2771_v32, 0.0  ;;  %3448 = vmatprep.mubr.bf16.mxu1 %v6550_v4  ;;  %3733 = vmatprep.mubr.bf16.mxu0 %v6551_v52  ;;  %v8370_v52 = vld [vmem:[#allocation51_spill] sm:$0xff] }
 0x323   : > { %v7871_v11 = vpack.c.bf16 %v4372_v41, %v4367_v13 }
 0x324   : > { %v7873_v60 = vpack.c.bf16 %v4373_v10, %v4368_v42  ;;  %v2774_v19 = vpop.f32.mrb[116].mxu0 }
 0x325   : > { %v2775_v20 = vadd.f32 %v2774_v19, %v7689_v54  ;;  %v2776_v21 = vpop.f32.mrb[117].mxu0  ;;  %v6555_v54 = vld [vmem:[#allocation5 + $0x324] ss:$16 sps:$4 sm:$0xff]  }
 0x326   : > { %v2777_v15 = vadd.f32 %v2776_v21, %v7692_v22  ;;  %v2778_v53 = vpop.f32.mrb[118].mxu0 }
 0x327   : > { %v2779_v31 = vadd.f32 %v2778_v53, %v7695_v62  ;;  %v2780_v12 = vpop.f32.mrb[119].mxu0  ;;  %v4377_v56 = vmax.f32 %v2775_v20, 0.0 }
 0x328   : > { %v2781_v2 = vadd.f32 %v2780_v12, %v7697_v37  ;;  %v4378_v24 = vmax.f32 %v2777_v15, 0.0 }
 0x329   : > { %v4382_v36 = vmax.f32 %v2779_v31, 0.0  ;;  %3449 = vmatmul.mubr.bf16.gmra.mrb[164].mxu1 %v6552_v29  ;;  %3734 = vmatmul.mubr.bf16.gmra.mrb[224].mxu0 %v6553_v18  ;;  %v6557_v31 = vld [vmem:[#allocation5 + $0x320] ss:$16 sps:$4 sm:$0xff]  }
 0x32a   : > { %v4383_v28 = vmax.f32 %v2781_v2, 0.0  ;;  %3458 = vmatprep.mubr.bf16.mxu1 %v6554_v23  ;;  %3741 = vmatprep.mubr.bf16.mxu0 %v6555_v54 }
 0x32b   : > { %v7879_v38 = vpack.c.bf16 %v4382_v36, %v4377_v56  ;;  %v6559_v56 = vld [vmem:[#allocation5 + $0x344] ss:$16 sps:$4 sm:$0xff]  }
 0x32c   : > { %v7881_v22 = vpack.c.bf16 %v4383_v28, %v4378_v24  ;;  %v2784_v62 = vpop.f32.mrb[120].mxu0  ;;  %v3190_v0 = vpop.f32.mrb[60].mxu1 }
 0x32d   : > { %v2785_v37 = vadd.f32 %v2784_v62, %v7701_v34  ;;  %v2786_v50 = vpop.f32.mrb[121].mxu0  ;;  %v3192_v43 = vpop.f32.mrb[61].mxu1  ;;  %v4089_v41 = vmax.f32 %v3190_v0, 0.0  ;;  %v6556_v34 = vld [vmem:[#allocation5 + $0x368] ss:$16 sps:$4 sm:$0xff]  }
 0x32e   : > { %v2787_v30 = vadd.f32 %v2786_v50, %v7704_v40  ;;  %v2788_v32 = vpop.f32.mrb[122].mxu0  ;;  %v3194_v13 = vpop.f32.mrb[62].mxu1  ;;  %v4090_v4 = vmax.f32 %v3192_v43, 0.0  ;;  %v8371_v43 = vld [vmem:[#allocation52_spill] sm:$0xff] }
 0x32f   : > { %v2789_v5 = vadd.f32 %v2788_v32, %v7707_v16  ;;  %v4094_v48 = vmax.f32 %v3194_v13, 0.0  ;;  %v2790_v42 = vpop.f32.mrb[123].mxu0  ;;  %v3196_v10 = vpop.f32.mrb[63].mxu1  ;;  %v4387_v21 = vmax.f32 %v2785_v37, 0.0  ;;  %v6558_v16 = vld [vmem:[#allocation5 + $0x38c] ss:$16 sps:$4 sm:$0xff]  }
 0x330   : > { %v2791_v19 = vadd.f32 %v2790_v42, %v8370_v52  ;;  %v4095_v20 = vmax.f32 %v3196_v10, 0.0  ;;  %v4388_v40 = vmax.f32 %v2787_v30, 0.0 }
 0x331   : > { %v4392_v15 = vmax.f32 %v2789_v5, 0.0  ;;  %v7887_v53 = vpack.c.bf16 %v4094_v48, %v4089_v41  ;;  %3459 = vmatmul.mubr.bf16.gmra.mrb[168].mxu1 %v6556_v34  ;;  %3742 = vmatmul.mubr.bf16.gmra.mrb[228].mxu0 %v6557_v31 }
 0x332   : > { %v4393_v12 = vmax.f32 %v2791_v19, 0.0  ;;  %v7889_v2 = vpack.c.bf16 %v4095_v20, %v4090_v4  ;;  %3468 = vmatprep.mubr.bf16.mxu1 %v6558_v16  ;;  %3749 = vmatprep.mubr.bf16.mxu0 %v6559_v56 }
 0x333   : > { %v7891_v36 = vpack.c.bf16 %v4392_v15, %v4387_v21  ;;  %v7906_v15 = vld [vmem:[#allocation5 + $0x3ac] ss:$16 sps:$4 sm:$0xff]  }
 0x334   : > { %v7893_v29 = vpack.c.bf16 %v4393_v12, %v4388_v40  ;;  %v2794_v18 = vpop.f32.mrb[124].mxu0  ;;  %v3200_v24 = vpop.f32.mrb[64].mxu1 }
 0x335   : > { %v2795_v28 = vadd.f32 %v2794_v18, %v7715_v26  ;;  %v2796_v23 = vpop.f32.mrb[125].mxu0  ;;  %v3202_v54 = vpop.f32.mrb[65].mxu1  ;;  %v4099_v50 = vmax.f32 %v3200_v24, 0.0  ;;  %v7901_v26 = vld [vmem:[#allocation5 + $0x388] ss:$16 sps:$4 sm:$0xff]  }
 0x336   : > { %v2797_v62 = vadd.f32 %v2796_v23, %v7718_v63  ;;  %v2798_v0 = vpop.f32.mrb[126].mxu0  ;;  %v3204_v37 = vpop.f32.mrb[66].mxu1  ;;  %v4100_v5 = vmax.f32 %v3202_v54, 0.0  ;;  %v6561_v63 = vld [vmem:[#allocation5 + $0x340] ss:$16 sps:$4 sm:$0xff]  }
 0x337   : > { %v2799_v30 = vadd.f32 %v2798_v0, %v8371_v43  ;;  %v4104_v32 = vmax.f32 %v3204_v37, 0.0  ;;  %v2800_v13 = vpop.f32.mrb[127].mxu0  ;;  %v3206_v41 = vpop.f32.mrb[67].mxu1  ;;  %v4397_v10 = vmax.f32 %v2795_v28, 0.0  ;;  %v6565_v0 = vld [vmem:[#allocation5 + $0x360] ss:$16 sps:$4 sm:$0xff]  }
 0x338   : > { %v2801_v48 = vadd.f32 %v2800_v13, %v7724_v9  ;;  %v4105_v42 = vmax.f32 %v3206_v41, 0.0  ;;  %v4398_v19 = vmax.f32 %v2797_v62, 0.0  ;;  %v6563_v9 = vld [vmem:[#allocation5 + $0x364] ss:$16 sps:$4 sm:$0xff]   ;;  %v7915_v62 = vld [vmem:[#allocation5 + $0x3a8] ss:$16 sps:$4 sm:$0xff]  }
 0x339   : > { %v4402_v4 = vmax.f32 %v2799_v30, 0.0  ;;  %v7899_v52 = vpack.c.bf16 %v4104_v32, %v4099_v50  ;;  %3469 = vmatmul.mubr.bf16.gmra.mrb[172].mxu1 %v7901_v26  ;;  %3750 = vmatmul.mubr.bf16.gmra.mrb[232].mxu0 %v6561_v63  ;;  %v7920_v50 = vld [vmem:[#allocation5 + $0x3cc] ss:$16 sps:$4 sm:$0xff]   ;;  %v6567_v43 = vld [vmem:[#allocation5 + $0x384] ss:$16 sps:$4 sm:$0xff]  }
 0x33a   : > { %v4403_v20 = vmax.f32 %v2801_v48, 0.0  ;;  %v7904_v21 = vpack.c.bf16 %v4105_v42, %v4100_v5  ;;  %3478 = vmatprep.mubr.bf16.mxu1 %v7906_v15  ;;  %3757 = vmatprep.mubr.bf16.mxu0 %v6563_v9  ;;  %v7925_v63 = vld [vmem:[#allocation5 + $0x3c8] ss:$16 sps:$4 sm:$0xff]   ;;  %v7930_v9 = vld [vmem:[#allocation5 + $0x3ec] ss:$16 sps:$4 sm:$0xff]  }
 0x33b   : > { %v7909_v34 = vpack.c.bf16 %v4402_v4, %v4397_v10 }
 0x33c   : > { %v7911_v31 = vpack.c.bf16 %v4403_v20, %v4398_v19  ;;  %v3210_v40 = vpop.f32.mrb[68].mxu1  ;;  %v6569_v19 = vld [vmem:[#allocation5 + $0x380] ss:$16 sps:$4 sm:$0xff]  }
 0x33d   : > { %v3212_v12 = vpop.f32.mrb[69].mxu1  ;;  %v4109_v56 = vmax.f32 %v3210_v40, 0.0  ;;  %v6571_v40 = vld [vmem:[#allocation5 + $0x3a4] ss:$16 sps:$4 sm:$0xff]  }
 0x33e   : > { %v3214_v16 = vpop.f32.mrb[70].mxu1  ;;  %v4110_v28 = vmax.f32 %v3212_v12, 0.0  ;;  %v4567_v12 = vld [vmem:[#allocation7] sm:$0xff] }
 0x33f   : > { %v4114_v18 = vmax.f32 %v3214_v16, 0.0  ;;  %v3216_v24 = vpop.f32.mrb[71].mxu1 }
 0x340   : > { %v4115_v23 = vmax.f32 %v3216_v24, 0.0  ;;  %v7933_v24 = vcombine.high %v4567_v12, %v4567_v12 }
 0x341   : > { %v7913_v54 = vpack.c.bf16 %v4114_v18, %v4109_v56  ;;  %3479 = vmatmul.mubr.bf16.gmra.mrb[176].mxu1 %v7915_v62  ;;  %3758 = vmatmul.mubr.bf16.gmra.mrb[236].mxu0 %v6565_v0 }
 0x342   : > { %v7918_v37 = vpack.c.bf16 %v4115_v23, %v4110_v28  ;;  %3488 = vmatprep.mubr.bf16.mxu1 %v7920_v50  ;;  %3765 = vmatprep.mubr.bf16.mxu0 %v6567_v43 }
 0x344   : > { %v3220_v30 = vpop.f32.mrb[72].mxu1 }
 0x345   : > { %v3222_v32 = vpop.f32.mrb[73].mxu1  ;;  %v4119_v41 = vmax.f32 %v3220_v30, 0.0 }
 0x346   : > { %v3224_v13 = vpop.f32.mrb[74].mxu1  ;;  %v4120_v42 = vmax.f32 %v3222_v32, 0.0 }
 0x347   : > { %v4124_v5 = vmax.f32 %v3224_v13, 0.0  ;;  %v3226_v48 = vpop.f32.mrb[75].mxu1  ;;  %v7937_v13 = vld [vmem:[#allocation5 + $0x3e8] ss:$16 sps:$4 sm:$0xff]  }
 0x348   : > { %v4125_v10 = vmax.f32 %v3226_v48, 0.0  ;;  %v6574_v48 = vld [vmem:[#allocation5 + $0x3c4] ss:$16 sps:$4 sm:$0xff]  }
 0x349   : > { %v7923_v4 = vpack.c.bf16 %v4124_v5, %v4119_v41  ;;  %3489 = vmatmul.mubr.bf16.gmra.mrb[180].mxu1 %v7925_v63  ;;  %3766 = vmatmul.mubr.bf16.gmra.mrb[240].mxu0 %v6569_v19  ;;  %v6573_v41 = vld [vmem:[#allocation5 + $0x3a0] ss:$16 sps:$4 sm:$0xff]  }
 0x34a   : > { %v7928_v20 = vpack.c.bf16 %v4125_v10, %v4120_v42  ;;  %3498 = vmatprep.mubr.bf16.mxu1 %v7930_v9  ;;  %3773 = vmatprep.mubr.bf16.mxu0 %v6571_v40  ;;  %v7943_v10 = vld [vmem:[#allocation7 + $0x8] sm:$0xff]  ;;  %v7945_v40 = vcombine.low %v4567_v12, %v4567_v12  ;;  %v6576_v12 = vld [vmem:[#allocation5 + $0x3e4] ss:$16 sps:$4 sm:$0xff]  }
 0x34c   : > { %v3230_v16 = vpop.f32.mrb[76].mxu1 }
 0x34d   : > { %v3232_v56 = vpop.f32.mrb[77].mxu1  ;;  %v4129_v28 = vmax.f32 %v3230_v16, 0.0 }
 0x34e   : > { %v3234_v18 = vpop.f32.mrb[78].mxu1  ;;  %v4130_v43 = vmax.f32 %v3232_v56, 0.0 }
 0x34f   : > { %v4134_v23 = vmax.f32 %v3234_v18, 0.0  ;;  %v3236_v0 = vpop.f32.mrb[79].mxu1 }
 0x350   : > { %v4135_v30 = vmax.f32 %v3236_v0, 0.0 }
 0x351   : > { %v7935_v32 = vpack.c.bf16 %v4134_v23, %v4129_v28  ;;  %3499 = vmatmul.mubr.bf16.gmra.mrb[184].mxu1 %v7937_v13  ;;  %3774 = vmatmul.mubr.bf16.gmra.mrb[244].mxu0 %v6573_v41  ;;  %v7949_v23 = vcombine.high %v7943_v10, %v7943_v10  ;;  %v6575_v41 = vld [vmem:[#allocation5 + $0x3c0] ss:$16 sps:$4 sm:$0xff]  }
 0x352   : > { %v7940_v5 = vpack.c.bf16 %v4135_v30, %v4130_v43  ;;  %3781 = vmatprep.mubr.bf16.mxu0 %v6574_v48  ;;  %4615 = vmatprep.mubr.bf16.mxu1 %v7933_v24 }
 0x354   : > { %v3240_v42 = vpop.f32.mrb[80].mxu1 }
 0x355   : > { %v3242_v19 = vpop.f32.mrb[81].mxu1  ;;  %v4139_v56 = vmax.f32 %v3240_v42, 0.0 }
 0x356   : > { %v3244_v16 = vpop.f32.mrb[82].mxu1  ;;  %v4140_v0 = vmax.f32 %v3242_v19, 0.0 }
 0x357   : > { %v4144_v18 = vmax.f32 %v3244_v16, 0.0  ;;  %v3246_v28 = vpop.f32.mrb[83].mxu1 }
 0x358   : > { %v4145_v43 = vmax.f32 %v3246_v28, 0.0 }
 0x359   : > { %v7951_v30 = vpack.c.bf16 %v4144_v18, %v4139_v56  ;;  %3782 = vmatmul.mubr.bf16.gmra.mrb[248].mxu0 %v6575_v41  ;;  %4616 = vmatmul.mubr.bf16.vlgmr.msra.gmra.mrb[188].mxu1 %v7945_v40 }
 0x35a   : > { %v7954_v48 = vpack.c.bf16 %v4145_v43, %v4140_v0  ;;  %4625 = vmatpush1.bf16.msra.mxu1 %v7765_v1  ;;  %3789 = vmatprep.mubr.bf16.mxu0 %v6576_v12  ;;  %v6577_v1 = vld [vmem:[#allocation5 + $0x3e0] ss:$16 sps:$4 sm:$0xff]  }
 0x35b   : > { %4626 = vmatprep.subr.bf16.mxu1 %v7778_v49  ;;  %4656 = vmatprep.mubr.bf16.mxu1 %v7949_v23  ;;  %v6578_v49 = vld [vmem:[#allocation5 + $0xc] ss:$16 sps:$4 sm:$0xff]  }
 0x35c   : > { %v3250_v42 = vpop.f32.mrb[84].mxu1 }
 0x35d   : > { %v3252_v16 = vpop.f32.mrb[85].mxu1  ;;  %v4149_v56 = vmax.f32 %v3250_v42, 0.0 }
 0x35e   : > { %4627 = vmatpush1.bf16.msra.mxu1 %v7776_v27  ;;  %v3254_v19 = vpop.f32.mrb[86].mxu1  ;;  %v4150_v0 = vmax.f32 %v3252_v16, 0.0 }
 0x35f   : > { %v4154_v18 = vmax.f32 %v3254_v19, 0.0  ;;  %4628 = vmatprep.subr.bf16.mxu1 %v7789_v33  ;;  %v3256_v28 = vpop.f32.mrb[87].mxu1 }
 0x360   : > { %v4155_v43 = vmax.f32 %v3256_v28, 0.0 }
 0x361   : > { %v7961_v41 = vpack.c.bf16 %v4154_v18, %v4149_v56  ;;  %3790 = vmatmul.mubr.bf16.gmra.mrb[252].mxu0 %v6577_v1 }
 0x362   : > { %v7963_v12 = vpack.c.bf16 %v4155_v43, %v4150_v0  ;;  %4629 = vmatpush1.bf16.msra.mxu1 %v7787_v61  ;;  %3830 = vmatprep.mubr.bf16.mxu0 %v6578_v49  ;;  %v6579_v43 = vld [vmem:[#allocation5 + $0x8] ss:$16 sps:$4 sm:$0xff]  }
 0x363   : > { %4630 = vmatprep.subr.bf16.mxu1 %v7800_v25  ;;  %v6580_v25 = vld [vmem:[#allocation5 + $0x2c] ss:$16 sps:$4 sm:$0xff]  }
 0x364   : > { %v3260_v27 = vpop.f32.mrb[88].mxu1 }
 0x365   : > { %v3262_v42 = vpop.f32.mrb[89].mxu1  ;;  %v4159_v19 = vmax.f32 %v3260_v27, 0.0 }
 0x366   : > { %4631 = vmatpush1.bf16.msra.mxu1 %v7798_v17  ;;  %v3264_v33 = vpop.f32.mrb[90].mxu1  ;;  %v4160_v18 = vmax.f32 %v3262_v42, 0.0 }
 0x367   : > { %v4164_v16 = vmax.f32 %v3264_v33, 0.0  ;;  %4632 = vmatprep.subr.bf16.mxu1 %v7809_v51  ;;  %v3266_v56 = vpop.f32.mrb[91].mxu1 }
 0x368   : > { %v4165_v28 = vmax.f32 %v3266_v56, 0.0  ;;  %v6581_v56 = vld [vmem:[#allocation5 + $0x28] ss:$16 sps:$4 sm:$0xff]  }
 0x369   : > { %v7969_v0 = vpack.c.bf16 %v4164_v16, %v4159_v19  ;;  %3831 = vmatmul.mubr.bf16.vlgmr.msra.gmra.mrb[128].mxu0 %v6579_v43 }
 0x36a   : > { %v7971_v61 = vpack.c.bf16 %v4165_v28, %v4160_v18  ;;  %4633 = vmatpush1.bf16.msra.mxu1 %v7807_v14  ;;  %3838 = vmatprep.mubr.bf16.mxu0 %v6580_v25 }
 0x36b   : > { %4634 = vmatprep.subr.bf16.mxu1 %v7817_v3  ;;  %v6582_v3 = vld [vmem:[#allocation5 + $0x4c] ss:$16 sps:$4 sm:$0xff]  }
 0x36c   : > { %v3270_v17 = vpop.f32.mrb[92].mxu1 }
 0x36d   : > { %v3272_v1 = vpop.f32.mrb[93].mxu1  ;;  %v4169_v49 = vmax.f32 %v3270_v17, 0.0 }
 0x36e   : > { %4635 = vmatpush1.bf16.msra.mxu1 %v7815_v47  ;;  %v3274_v51 = vpop.f32.mrb[94].mxu1  ;;  %v4170_v33 = vmax.f32 %v3272_v1, 0.0 }
 0x36f   : > { %v4174_v27 = vmax.f32 %v3274_v51, 0.0  ;;  %4636 = vmatprep.subr.bf16.mxu1 %v7825_v57  ;;  %v3276_v42 = vpop.f32.mrb[95].mxu1 }
 0x370   : > { %v4175_v19 = vmax.f32 %v3276_v42, 0.0 }
 0x371   : > { %v7977_v16 = vpack.c.bf16 %v4174_v27, %v4169_v49  ;;  %3839 = vmatmul.mubr.bf16.gmra.mrb[132].mxu0 %v6581_v56  ;;  %v6583_v49 = vld [vmem:[#allocation5 + $0x48] ss:$16 sps:$4 sm:$0xff]  }
 0x372   : > { %v7979_v14 = vpack.c.bf16 %v4175_v19, %v4170_v33  ;;  %4637 = vmatpush1.bf16.msra.mxu1 %v7823_v46  ;;  %3846 = vmatprep.mubr.bf16.mxu0 %v6582_v3 }
 0x373   : > { %4638 = vmatprep.subr.bf16.mxu1 %v7833_v6  ;;  %v6584_v6 = vld [vmem:[#allocation5 + $0x6c] ss:$16 sps:$4 sm:$0xff]  }
 0x374   : > { %v3280_v47 = vpop.f32.mrb[96].mxu1 }
 0x375   : > { %v3282_v18 = vpop.f32.mrb[97].mxu1  ;;  %v4179_v28 = vmax.f32 %v3280_v47, 0.0 }
 0x376   : > { %4639 = vmatpush1.bf16.msra.mxu1 %v7831_v59  ;;  %v3284_v57 = vpop.f32.mrb[98].mxu1  ;;  %v4180_v17 = vmax.f32 %v3282_v18, 0.0  ;;  %v6585_v18 = vld [vmem:[#allocation5 + $0x68] ss:$16 sps:$4 sm:$0xff]  }
 0x377   : > { %v4184_v43 = vmax.f32 %v3284_v57, 0.0  ;;  %4640 = vmatprep.subr.bf16.mxu1 %v7841_v39  ;;  %v3286_v25 = vpop.f32.mrb[99].mxu1 }
 0x378   : > { %v4185_v1 = vmax.f32 %v3286_v25, 0.0 }
 0x379   : > { %v7985_v51 = vpack.c.bf16 %v4184_v43, %v4179_v28  ;;  %3847 = vmatmul.mubr.bf16.gmra.mrb[136].mxu0 %v6583_v49 }
 0x37a   : > { %v7987_v46 = vpack.c.bf16 %v4185_v1, %v4180_v17  ;;  %4641 = vmatpush1.bf16.msra.mxu1 %v7839_v45  ;;  %3854 = vmatprep.mubr.bf16.mxu0 %v6584_v6  ;;  %v6587_v6 = vld [vmem:[#allocation5 + $0x88] ss:$16 sps:$4 sm:$0xff]  }
 0x37b   : > { %4642 = vmatprep.subr.bf16.mxu1 %v7849_v8  ;;  %v6586_v8 = vld [vmem:[#allocation5 + $0x8c] ss:$16 sps:$4 sm:$0xff]  }
 0x37c   : > { %v3290_v59 = vpop.f32.mrb[100].mxu1 }
 0x37d   : > { %v3292_v27 = vpop.f32.mrb[101].mxu1  ;;  %v4189_v42 = vmax.f32 %v3290_v59, 0.0 }
 0x37e   : > { %4643 = vmatpush1.bf16.msra.mxu1 %v7847_v35  ;;  %v3294_v39 = vpop.f32.mrb[102].mxu1  ;;  %v4190_v56 = vmax.f32 %v3292_v27, 0.0 }
 0x37f   : > { %v4194_v33 = vmax.f32 %v3294_v39, 0.0  ;;  %4644 = vmatprep.subr.bf16.mxu1 %v7857_v44  ;;  %v3296_v19 = vpop.f32.mrb[103].mxu1 }
 0x380   : > { %v4195_v3 = vmax.f32 %v3296_v19, 0.0 }
 0x381   : > { %v7993_v47 = vpack.c.bf16 %v4194_v33, %v4189_v42  ;;  %3855 = vmatmul.mubr.bf16.gmra.mrb[140].mxu0 %v6585_v18 }
 0x382   : > { %v7995_v45 = vpack.c.bf16 %v4195_v3, %v4190_v56  ;;  %4645 = vmatpush1.bf16.msra.mxu1 %v7855_v7  ;;  %3862 = vmatprep.mubr.bf16.mxu0 %v6586_v8  ;;  %v6589_v3 = vld [vmem:[#allocation5 + $0xa8] ss:$16 sps:$4 sm:$0xff]  }
 0x383   : > { %4646 = vmatprep.subr.bf16.mxu1 %v7865_v58  ;;  %v6588_v58 = vld [vmem:[#allocation5 + $0xac] ss:$16 sps:$4 sm:$0xff]  }
 0x384   : > { %v3300_v35 = vpop.f32.mrb[104].mxu1 }
 0x385   : > { %v3302_v57 = vpop.f32.mrb[105].mxu1  ;;  %v4199_v28 = vmax.f32 %v3300_v35, 0.0 }
 0x386   : > { %4647 = vmatpush1.bf16.msra.mxu1 %v7863_v55  ;;  %v3304_v44 = vpop.f32.mrb[106].mxu1  ;;  %v4200_v17 = vmax.f32 %v3302_v57, 0.0 }
 0x387   : > { %v4204_v43 = vmax.f32 %v3304_v44, 0.0  ;;  %4648 = vmatprep.subr.bf16.mxu1 %v7873_v60  ;;  %v3306_v25 = vpop.f32.mrb[107].mxu1 }
 0x388   : > { %v4205_v1 = vmax.f32 %v3306_v25, 0.0  ;;  %v6591_v25 = vld [vmem:[#allocation5 + $0xc8] ss:$16 sps:$4 sm:$0xff]  }
 0x389   : > { %v8001_v49 = vpack.c.bf16 %v4204_v43, %v4199_v28  ;;  %3863 = vmatmul.mubr.bf16.gmra.mrb[144].mxu0 %v6587_v6 }
 0x38a   : > { %v8003_v7 = vpack.c.bf16 %v4205_v1, %v4200_v17  ;;  %4649 = vmatpush1.bf16.msra.mxu1 %v7871_v11  ;;  %3870 = vmatprep.mubr.bf16.mxu0 %v6588_v58 }
 0x38b   : > { %4650 = vmatprep.subr.bf16.mxu1 %v7881_v22  ;;  %v6590_v22 = vld [vmem:[#allocation5 + $0xcc] ss:$16 sps:$4 sm:$0xff]  }
 0x38c   : > { %v3310_v55 = vpop.f32.mrb[108].mxu1 }
 0x38d   : > { %v3312_v59 = vpop.f32.mrb[109].mxu1  ;;  %v4209_v27 = vmax.f32 %v3310_v55, 0.0 }
 0x38e   : > { %4651 = vmatpush1.bf16.msra.mxu1 %v7879_v38  ;;  %v3314_v60 = vpop.f32.mrb[110].mxu1  ;;  %v4210_v33 = vmax.f32 %v3312_v59, 0.0 }
 0x38f   : > { %v4214_v39 = vmax.f32 %v3314_v60, 0.0  ;;  %4652 = vmatprep.subr.bf16.mxu1 %v7893_v29  ;;  %v3316_v42 = vpop.f32.mrb[111].mxu1  ;;  %v8017_v29 = vcombine.low %v7943_v10, %v7943_v10  ;;  %v6592_v10 = vld [vmem:[#allocation5 + $0xec] ss:$16 sps:$4 sm:$0xff]  }
 0x390   : > { %v4215_v19 = vmax.f32 %v3316_v42, 0.0 }
 0x391   : > { %v8009_v56 = vpack.c.bf16 %v4214_v39, %v4209_v27  ;;  %3871 = vmatmul.mubr.bf16.gmra.mrb[148].mxu0 %v6589_v3 }
 0x392   : > { %v8011_v11 = vpack.c.bf16 %v4215_v19, %v4210_v33  ;;  %4653 = vmatpush1.bf16.msra.mxu1 %v7891_v36  ;;  %3878 = vmatprep.mubr.bf16.mxu0 %v6590_v22 }
 0x393   : > { %4654 = vmatprep.subr.bf16.mxu1 %v7911_v31 }
 0x394   : > { %v3320_v38 = vpop.f32.mrb[112].mxu1 }
 0x395   : > { %v3322_v18 = vpop.f32.mrb[113].mxu1  ;;  %v4219_v35 = vmax.f32 %v3320_v38, 0.0 }
 0x396   : > { %4655 = vmatpush1.bf16.msra.mxu1 %v7909_v34  ;;  %v3324_v8 = vpop.f32.mrb[114].mxu1  ;;  %v4220_v28 = vmax.f32 %v3322_v18, 0.0  ;;  %v6595_v18 = vld [vmem:[#allocation5 + $0x108] ss:$16 sps:$4 sm:$0xff]  }
 0x397   : > { %v4224_v57 = vmax.f32 %v3324_v8, 0.0  ;;  %4665 = vmatprep.subr.bf16.mxu1 %v7889_v2  ;;  %v3326_v44 = vpop.f32.mrb[115].mxu1 }
 0x398   : > { %v4225_v36 = vmax.f32 %v3326_v44, 0.0 }
 0x399   : > { %v8021_v43 = vpack.c.bf16 %v4224_v57, %v4219_v35  ;;  %3879 = vmatmul.mubr.bf16.gmra.mrb[152].mxu0 %v6591_v25  ;;  %4657 = vmatmul.mubr.bf16.vlgmr.msra.gmra.mrb[188].mxu1 %v8017_v29 }
 0x39a   : > { %v8024_v31 = vpack.c.bf16 %v4225_v36, %v4220_v28  ;;  %4666 = vmatpush1.bf16.msra.mxu1 %v7887_v53  ;;  %3886 = vmatprep.mubr.bf16.mxu0 %v6592_v10  ;;  %v6593_v53 = vld [vmem:[#allocation5 + $0xe8] ss:$16 sps:$4 sm:$0xff]  }
 0x39b   : > { %4667 = vmatprep.subr.bf16.mxu1 %v7904_v21  ;;  %4697 = vmatprep.mubr.bf16.mxu1 %v7933_v24  ;;  %v6594_v21 = vld [vmem:[#allocation5 + $0x10c] ss:$16 sps:$4 sm:$0xff]   ;;  %v6597_v10 = vld [vmem:[#allocation5 + $0x128] ss:$16 sps:$4 sm:$0xff]  }
 0x39c   : > { %v3330_v2 = vpop.f32.mrb[116].mxu1 }
 0x39d   : > { %v3332_v34 = vpop.f32.mrb[117].mxu1  ;;  %v4229_v1 = vmax.f32 %v3330_v2, 0.0 }
 0x39e   : > { %4668 = vmatpush1.bf16.msra.mxu1 %v7899_v52  ;;  %v3334_v17 = vpop.f32.mrb[118].mxu1  ;;  %v4230_v55 = vmax.f32 %v3332_v34, 0.0 }
 0x39f   : > { %v4234_v6 = vmax.f32 %v3334_v17, 0.0  ;;  %4669 = vmatprep.subr.bf16.mxu1 %v7918_v37  ;;  %v3336_v58 = vpop.f32.mrb[119].mxu1 }
 0x3a0   : > { %v4235_v59 = vmax.f32 %v3336_v58, 0.0 }
 0x3a1   : > { %v8031_v60 = vpack.c.bf16 %v4234_v6, %v4229_v1  ;;  %3887 = vmatmul.mubr.bf16.gmra.mrb[156].mxu0 %v6593_v53 }
 0x3a2   : > { %v8033_v27 = vpack.c.bf16 %v4235_v59, %v4230_v55  ;;  %4670 = vmatpush1.bf16.msra.mxu1 %v7913_v54  ;;  %3894 = vmatprep.mubr.bf16.mxu0 %v6594_v21  ;;  %v6599_v59 = vld [vmem:[#allocation5 + $0x148] ss:$16 sps:$4 sm:$0xff]  }
 0x3a3   : > { %4671 = vmatprep.subr.bf16.mxu1 %v7928_v20  ;;  %v6596_v20 = vld [vmem:[#allocation5 + $0x12c] ss:$16 sps:$4 sm:$0xff]  }
 0x3a4   : > { %v3340_v52 = vpop.f32.mrb[120].mxu1 }
 0x3a5   : > { %v3342_v39 = vpop.f32.mrb[121].mxu1  ;;  %v4239_v42 = vmax.f32 %v3340_v52, 0.0 }
 0x3a6   : > { %4672 = vmatpush1.bf16.msra.mxu1 %v7923_v4  ;;  %v3344_v37 = vpop.f32.mrb[122].mxu1  ;;  %v4240_v3 = vmax.f32 %v3342_v39, 0.0 }
 0x3a7   : > { %v4244_v33 = vmax.f32 %v3344_v37, 0.0  ;;  %4673 = vmatprep.subr.bf16.mxu1 %v7940_v5  ;;  %v3346_v19 = vpop.f32.mrb[123].mxu1 }
 0x3a8   : > { %v4245_v22 = vmax.f32 %v3346_v19, 0.0  ;;  %v6601_v19 = vld [vmem:[#allocation5 + $0x168] ss:$16 sps:$4 sm:$0xff]  }
 0x3a9   : > { %v8039_v38 = vpack.c.bf16 %v4244_v33, %v4239_v42  ;;  %3895 = vmatmul.mubr.bf16.gmra.mrb[160].mxu0 %v6595_v18 }
 0x3aa   : > { %v8041_v54 = vpack.c.bf16 %v4245_v22, %v4240_v3  ;;  %4674 = vmatpush1.bf16.msra.mxu1 %v7935_v32  ;;  %3902 = vmatprep.mubr.bf16.mxu0 %v6596_v20 }
 0x3ab   : > { %4675 = vmatprep.subr.bf16.mxu1 %v7954_v48  ;;  %v6598_v48 = vld [vmem:[#allocation5 + $0x14c] ss:$16 sps:$4 sm:$0xff]  }
 0x3ac   : > { %v3350_v4 = vpop.f32.mrb[124].mxu1 }
 0x3ad   : > { %v3352_v8 = vpop.f32.mrb[125].mxu1  ;;  %v4249_v35 = vmax.f32 %v3350_v4, 0.0 }
 0x3ae   : > { %4676 = vmatpush1.bf16.msra.mxu1 %v7951_v30  ;;  %v3354_v5 = vpop.f32.mrb[126].mxu1  ;;  %v4250_v28 = vmax.f32 %v3352_v8, 0.0 }
 0x3af   : > { %v4254_v57 = vmax.f32 %v3354_v5, 0.0  ;;  %4677 = vmatprep.subr.bf16.mxu1 %v7963_v12  ;;  %v3356_v44 = vpop.f32.mrb[127].mxu1 }
 0x3b0   : > { %v4255_v36 = vmax.f32 %v3356_v44, 0.0 }
 0x3b1   : > { %v8047_v25 = vpack.c.bf16 %v4254_v57, %v4249_v35  ;;  %3903 = vmatmul.mubr.bf16.gmra.mrb[164].mxu0 %v6597_v10  ;;  %v6603_v35 = vld [vmem:[#allocation5 + $0x188] ss:$16 sps:$4 sm:$0xff]  }
 0x3b2   : > { %v8049_v32 = vpack.c.bf16 %v4255_v36, %v4250_v28  ;;  %4678 = vmatpush1.bf16.msra.mxu1 %v7961_v41  ;;  %3910 = vmatprep.mubr.bf16.mxu0 %v6598_v48 }
 0x3b3   : > { %4679 = vmatprep.subr.bf16.mxu1 %v7971_v61  ;;  %v6600_v61 = vld [vmem:[#allocation5 + $0x16c] ss:$16 sps:$4 sm:$0xff]  }
 0x3b4   : > { %v3360_v30 = vpop.f32.mrb[128].mxu1 }
 0x3b5   : > { %v3362_v2 = vpop.f32.mrb[129].mxu1  ;;  %v4259_v34 = vmax.f32 %v3360_v30, 0.0 }
 0x3b6   : > { %4680 = vmatpush1.bf16.msra.mxu1 %v7969_v0  ;;  %v3364_v12 = vpop.f32.mrb[130].mxu1  ;;  %v4260_v6 = vmax.f32 %v3362_v2, 0.0  ;;  %v6605_v2 = vld [vmem:[#allocation5 + $0x1a8] ss:$16 sps:$4 sm:$0xff]  }
 0x3b7   : > { %v4264_v17 = vmax.f32 %v3364_v12, 0.0  ;;  %4681 = vmatprep.subr.bf16.mxu1 %v7979_v14  ;;  %v3366_v1 = vpop.f32.mrb[131].mxu1  ;;  %v6606_v12 = vld [vmem:[#allocation5 + $0x1cc] ss:$16 sps:$4 sm:$0xff]  }
 0x3b8   : > { %v4265_v58 = vmax.f32 %v3366_v1, 0.0 }
 0x3b9   : > { %v8055_v55 = vpack.c.bf16 %v4264_v17, %v4259_v34  ;;  %3911 = vmatmul.mubr.bf16.gmra.mrb[168].mxu0 %v6599_v59 }
 0x3ba   : > { %v8057_v41 = vpack.c.bf16 %v4265_v58, %v4260_v6  ;;  %4682 = vmatpush1.bf16.msra.mxu1 %v7977_v16  ;;  %3918 = vmatprep.mubr.bf16.mxu0 %v6600_v61  ;;  %v6607_v61 = vld [vmem:[#allocation5 + $0x1c8] ss:$16 sps:$4 sm:$0xff]  }
 0x3bb   : > { %4683 = vmatprep.subr.bf16.mxu1 %v7987_v46  ;;  %v6602_v46 = vld [vmem:[#allocation5 + $0x18c] ss:$16 sps:$4 sm:$0xff]  }
 0x3bc   : > { %v3370_v0 = vpop.f32.mrb[132].mxu1 }
 0x3bd   : > { %v3372_v53 = vpop.f32.mrb[133].mxu1  ;;  %v4269_v21 = vmax.f32 %v3370_v0, 0.0 }
 0x3be   : > { %4684 = vmatpush1.bf16.msra.mxu1 %v7985_v51  ;;  %v3374_v14 = vpop.f32.mrb[134].mxu1  ;;  %v4270_v37 = vmax.f32 %v3372_v53, 0.0 }
 0x3bf   : > { %v4274_v52 = vmax.f32 %v3374_v14, 0.0  ;;  %4685 = vmatprep.subr.bf16.mxu1 %v7995_v45  ;;  %v3376_v39 = vpop.f32.mrb[135].mxu1 }
 0x3c0   : > { %v4275_v42 = vmax.f32 %v3376_v39, 0.0 }
 0x3c1   : > { %v8063_v33 = vpack.c.bf16 %v4274_v52, %v4269_v21  ;;  %3919 = vmatmul.mubr.bf16.gmra.mrb[172].mxu0 %v6601_v19 }
 0x3c2   : > { %v8065_v16 = vpack.c.bf16 %v4275_v42, %v4270_v37  ;;  %4686 = vmatpush1.bf16.msra.mxu1 %v7993_v47  ;;  %3926 = vmatprep.mubr.bf16.mxu0 %v6602_v46 }
 0x3c3   : > { %4687 = vmatprep.subr.bf16.mxu1 %v8003_v7  ;;  %v6604_v7 = vld [vmem:[#allocation5 + $0x1ac] ss:$16 sps:$4 sm:$0xff]  }
 0x3c4   : > { %v3380_v51 = vpop.f32.mrb[136].mxu1 }
 0x3c5   : > { %v3382_v3 = vpop.f32.mrb[137].mxu1  ;;  %v4279_v22 = vmax.f32 %v3380_v51, 0.0 }
 0x3c6   : > { %4688 = vmatpush1.bf16.msra.mxu1 %v8001_v49  ;;  %v3384_v45 = vpop.f32.mrb[138].mxu1  ;;  %v4280_v4 = vmax.f32 %v3382_v3, 0.0 }
 0x3c7   : > { %v4284_v18 = vmax.f32 %v3384_v45, 0.0  ;;  %4689 = vmatprep.subr.bf16.mxu1 %v8011_v11  ;;  %v3386_v20 = vpop.f32.mrb[139].mxu1 }
 0x3c8   : > { %v4285_v8 = vmax.f32 %v3386_v20, 0.0  ;;  %v6611_v20 = vld [vmem:[#allocation5 + $0x208] ss:$16 sps:$4 sm:$0xff]  }
 0x3c9   : > { %v8071_v5 = vpack.c.bf16 %v4284_v18, %v4279_v22  ;;  %3927 = vmatmul.mubr.bf16.gmra.mrb[176].mxu0 %v6603_v35 }
 0x3ca   : > { %v4505_v47 = vpack.c.bf16 %v4285_v8, %v4280_v4  ;;  %4690 = vmatpush1.bf16.msra.mxu1 %v8009_v56  ;;  %3934 = vmatprep.mubr.bf16.mxu0 %v6604_v7 }
 0x3cb   : > { %4691 = vmatprep.subr.bf16.mxu1 %v8024_v31 }
 0x3cc   : > { %v3390_v49 = vpop.f32.mrb[140].mxu1 }
 0x3cd   : > { %v3392_v57 = vpop.f32.mrb[141].mxu1  ;;  %v4289_v11 = vmax.f32 %v3390_v49, 0.0 }
 0x3ce   : > { %4692 = vmatpush1.bf16.msra.mxu1 %v8021_v43  ;;  %v3394_v44 = vpop.f32.mrb[142].mxu1  ;;  %v4290_v10 = vmax.f32 %v3392_v57, 0.0 }
 0x3cf   : > { %v4294_v28 = vmax.f32 %v3394_v44, 0.0  ;;  %4693 = vmatprep.subr.bf16.mxu1 %v8033_v27  ;;  %v3396_v36 = vpop.f32.mrb[143].mxu1 }
 0x3d0   : > { %v4295_v48 = vmax.f32 %v3396_v36, 0.0 }
 0x3d1   : > { %v4509_v30 = vpack.c.bf16 %v4294_v28, %v4289_v11  ;;  %3935 = vmatmul.mubr.bf16.gmra.mrb[180].mxu0 %v6605_v2  ;;  %v6613_v28 = vld [vmem:[#allocation5 + $0x228] ss:$16 sps:$4 sm:$0xff]  }
 0x3d2   : > { %v4510_v56 = vpack.c.bf16 %v4295_v48, %v4290_v10  ;;  %4694 = vmatpush1.bf16.msra.mxu1 %v8031_v60  ;;  %3942 = vmatprep.mubr.bf16.mxu0 %v6606_v12  ;;  %v6614_v10 = vld [vmem:[#allocation5 + $0x24c] ss:$16 sps:$4 sm:$0xff]  }
 0x3d3   : > { %4695 = vmatprep.subr.bf16.mxu1 %v8041_v54  ;;  %v6608_v54 = vld [vmem:[#allocation5 + $0x1ec] ss:$16 sps:$4 sm:$0xff]  }
 0x3d4   : > { %v3400_v31 = vpop.f32.mrb[144].mxu1 }
 0x3d5   : > { %v3402_v43 = vpop.f32.mrb[145].mxu1  ;;  %v4299_v17 = vmax.f32 %v3400_v31, 0.0 }
 0x3d6   : > { %4696 = vmatpush1.bf16.msra.mxu1 %v8039_v38  ;;  %v3404_v34 = vpop.f32.mrb[146].mxu1  ;;  %v4300_v6 = vmax.f32 %v3402_v43, 0.0 }
 0x3d7   : > { %v4304_v27 = vmax.f32 %v3404_v34, 0.0  ;;  %4706 = vmatprep.subr.bf16.mxu1 %v8049_v32  ;;  %v3406_v1 = vpop.f32.mrb[147].mxu1 }
 0x3d8   : > { %v4305_v58 = vmax.f32 %v3406_v1, 0.0 }
 0x3d9   : > { %v4514_v59 = vpack.c.bf16 %v4304_v27, %v4299_v17  ;;  %3943 = vmatmul.mubr.bf16.gmra.mrb[184].mxu0 %v6607_v61  ;;  %4698 = vmatmul.mubr.bf16.vlgmr.msra.gmra.mrb[192].mxu1 %v7945_v40  ;;  %v6615_v27 = vld [vmem:[#allocation5 + $0x248] ss:$16 sps:$4 sm:$0xff]  }
 0x3da   : > { %v4515_v60 = vpack.c.bf16 %v4305_v58, %v4300_v6  ;;  %4707 = vmatpush1.bf16.msra.mxu1 %v8047_v25  ;;  %3950 = vmatprep.mubr.bf16.mxu0 %v6608_v54  ;;  %v6609_v25 = vld [vmem:[#allocation5 + $0x1e8] ss:$16 sps:$4 sm:$0xff]   ;;  %v6616_v6 = vld [vmem:[#allocation5 + $0x26c] ss:$16 sps:$4 sm:$0xff]  }
 0x3db   : > { %4708 = vmatprep.subr.bf16.mxu1 %v8057_v41  ;;  %4738 = vmatprep.mubr.bf16.mxu1 %v7949_v23  ;;  %v6610_v41 = vld [vmem:[#allocation5 + $0x20c] ss:$16 sps:$4 sm:$0xff]  }
 0x3dc   : > { %v3410_v38 = vpop.f32.mrb[148].mxu1 }
 0x3dd   : > { %v3412_v0 = vpop.f32.mrb[149].mxu1  ;;  %v4309_v53 = vmax.f32 %v3410_v38, 0.0 }
 0x3de   : > { %4709 = vmatpush1.bf16.msra.mxu1 %v8055_v55  ;;  %v3414_v32 = vpop.f32.mrb[150].mxu1  ;;  %v4310_v52 = vmax.f32 %v3412_v0, 0.0 }
 0x3df   : > { %v4314_v14 = vmax.f32 %v3414_v32, 0.0  ;;  %4710 = vmatprep.subr.bf16.mxu1 %v8065_v16  ;;  %v3416_v21 = vpop.f32.mrb[151].mxu1 }
 0x3e0   : > { %v4315_v39 = vmax.f32 %v3416_v21, 0.0 }
 0x3e1   : > { %v4519_v37 = vpack.c.bf16 %v4314_v14, %v4309_v53  ;;  %3951 = vmatmul.mubr.bf16.gmra.mrb[188].mxu0 %v6609_v25  ;;  %v6617_v14 = vld [vmem:[#allocation5 + $0x268] ss:$16 sps:$4 sm:$0xff]  }
 0x3e2   : > { %v4520_v42 = vpack.c.bf16 %v4315_v39, %v4310_v52  ;;  %4711 = vmatpush1.bf16.msra.mxu1 %v8063_v33  ;;  %3958 = vmatprep.mubr.bf16.mxu0 %v6610_v41  ;;  %v6612_v33 = vld [vmem:[#allocation5 + $0x22c] ss:$16 sps:$4 sm:$0xff]  }
 0x3e3   : > { %4712 = vmatprep.subr.bf16.mxu1 %v4505_v47  ;;  %v6618_v52 = vld [vmem:[#allocation5 + $0x28c] ss:$16 sps:$4 sm:$0xff]  }
 0x3e4   : > { %v3420_v19 = vpop.f32.mrb[152].mxu1 }
 0x3e5   : > { %v3422_v46 = vpop.f32.mrb[153].mxu1  ;;  %v4319_v51 = vmax.f32 %v3420_v19, 0.0 }
 0x3e6   : > { %4713 = vmatpush1.bf16.msra.mxu1 %v8071_v5  ;;  %v3424_v55 = vpop.f32.mrb[154].mxu1  ;;  %v4320_v45 = vmax.f32 %v3422_v46, 0.0 }
 0x3e7   : > { %v4324_v3 = vmax.f32 %v3424_v55, 0.0  ;;  %4714 = vmatprep.subr.bf16.mxu1 %v4510_v56  ;;  %v3426_v16 = vpop.f32.mrb[155].mxu1 }
 0x3e8   : > { %v4325_v22 = vmax.f32 %v3426_v16, 0.0 }
 0x3e9   : > { %v4524_v18 = vpack.c.bf16 %v4324_v3, %v4319_v51  ;;  %3959 = vmatmul.mubr.bf16.gmra.mrb[192].mxu0 %v6611_v20  ;;  %v6619_v3 = vld [vmem:[#allocation5 + $0x288] ss:$16 sps:$4 sm:$0xff]  }
 0x3ea   : > { %v4525_v4 = vpack.c.bf16 %v4325_v22, %v4320_v45  ;;  %4715 = vmatpush1.bf16.msra.mxu1 %v4509_v30  ;;  %3966 = vmatprep.mubr.bf16.mxu0 %v6612_v33  ;;  %v6620_v45 = vld [vmem:[#allocation5 + $0x2ac] ss:$16 sps:$4 sm:$0xff]  }
 0x3eb   : > { %4716 = vmatprep.subr.bf16.mxu1 %v4515_v60 }
 0x3ec   : > { %v3430_v8 = vpop.f32.mrb[156].mxu1 }
 0x3ed   : > { %v3432_v35 = vpop.f32.mrb[157].mxu1  ;;  %v4329_v5 = vmax.f32 %v3430_v8, 0.0 }
 0x3ee   : > { %4717 = vmatpush1.bf16.msra.mxu1 %v4514_v59  ;;  %v3434_v47 = vpop.f32.mrb[158].mxu1  ;;  %v4330_v57 = vmax.f32 %v3432_v35, 0.0 }
 0x3ef   : > { %v4334_v7 = vmax.f32 %v3434_v47, 0.0  ;;  %4718 = vmatprep.subr.bf16.mxu1 %v4520_v42  ;;  %v3436_v49 = vpop.f32.mrb[159].mxu1 }
 0x3f0   : > { %v4335_v44 = vmax.f32 %v3436_v49, 0.0 }
 0x3f1   : > { %v4529_v11 = vpack.c.bf16 %v4334_v7, %v4329_v5  ;;  %3967 = vmatmul.mubr.bf16.gmra.mrb[196].mxu0 %v6613_v28  ;;  %v6621_v7 = vld [vmem:[#allocation5 + $0x2a8] ss:$16 sps:$4 sm:$0xff]  }
 0x3f2   : > { %v4530_v36 = vpack.c.bf16 %v4335_v44, %v4330_v57  ;;  %4719 = vmatpush1.bf16.msra.mxu1 %v4519_v37  ;;  %3974 = vmatprep.mubr.bf16.mxu0 %v6614_v10  ;;  %v6622_v57 = vld [vmem:[#allocation5 + $0x2cc] ss:$16 sps:$4 sm:$0xff]  }
 0x3f3   : > { %4720 = vmatprep.subr.bf16.mxu1 %v4525_v4 }
 0x3f4   : > { %v3440_v48 = vpop.f32.mrb[160].mxu1 }
 0x3f5   : > { %v3442_v30 = vpop.f32.mrb[161].mxu1  ;;  %v4339_v56 = vmax.f32 %v3440_v48, 0.0 }
 0x3f6   : > { %4721 = vmatpush1.bf16.msra.mxu1 %v4524_v18  ;;  %v3444_v2 = vpop.f32.mrb[162].mxu1  ;;  %v4340_v43 = vmax.f32 %v3442_v30, 0.0 }
 0x3f7   : > { %v4344_v12 = vmax.f32 %v3444_v2, 0.0  ;;  %4722 = vmatprep.subr.bf16.mxu1 %v4530_v36  ;;  %v3446_v31 = vpop.f32.mrb[163].mxu1 }
 0x3f8   : > { %v4345_v34 = vmax.f32 %v3446_v31, 0.0 }
 0x3f9   : > { %v4534_v17 = vpack.c.bf16 %v4344_v12, %v4339_v56  ;;  %3975 = vmatmul.mubr.bf16.gmra.mrb[200].mxu0 %v6615_v27  ;;  %v6623_v12 = vld [vmem:[#allocation5 + $0x2c8] ss:$16 sps:$4 sm:$0xff]  }
 0x3fa   : > { %v4535_v1 = vpack.c.bf16 %v4345_v34, %v4340_v43  ;;  %4723 = vmatpush1.bf16.msra.mxu1 %v4529_v11  ;;  %3982 = vmatprep.mubr.bf16.mxu0 %v6616_v6  ;;  %v6624_v43 = vld [vmem:[#allocation5 + $0x2ec] ss:$16 sps:$4 sm:$0xff]  }
 0x3fc   : > { %v3450_v58 = vpop.f32.mrb[164].mxu1  ;;  %4724 = vmatprep.subr.bf16.mxu1 %v4535_v1 }
 0x3fd   : > { %v3452_v59 = vpop.f32.mrb[165].mxu1  ;;  %v4349_v60 = vmax.f32 %v3450_v58, 0.0 }
 0x3fe   : > { %4725 = vmatpush1.bf16.msra.mxu1 %v4534_v17  ;;  %v3454_v61 = vpop.f32.mrb[166].mxu1  ;;  %v4350_v0 = vmax.f32 %v3452_v59, 0.0 }
 0x3ff   : > { %v4354_v54 = vmax.f32 %v3454_v61, 0.0  ;;  %v3456_v38 = vpop.f32.mrb[167].mxu1 }
 0x400   : > { %v4355_v32 = vmax.f32 %v3456_v38, 0.0 }
 0x401   : > { %v4539_v53 = vpack.c.bf16 %v4354_v54, %v4349_v60  ;;  %3983 = vmatmul.mubr.bf16.gmra.mrb[204].mxu0 %v6617_v14  ;;  %v6625_v54 = vld [vmem:[#allocation5 + $0x2e8] ss:$16 sps:$4 sm:$0xff]  }
 0x402   : > { %v4540_v21 = vpack.c.bf16 %v4355_v32, %v4350_v0  ;;  %3990 = vmatprep.mubr.bf16.mxu0 %v6618_v52  ;;  %v6626_v0 = vld [vmem:[#allocation5 + $0x30c] ss:$16 sps:$4 sm:$0xff]  }
 0x404   : > { %v3460_v39 = vpop.f32.mrb[168].mxu1  ;;  %4726 = vmatprep.subr.bf16.mxu1 %v4540_v21 }
 0x405   : > { %v3462_v37 = vpop.f32.mrb[169].mxu1  ;;  %4727 = vmatpush1.bf16.msra.mxu1 %v4539_v53  ;;  %v4359_v42 = vmax.f32 %v3460_v39, 0.0 }
 0x406   : > { %v3464_v25 = vpop.f32.mrb[170].mxu1  ;;  %v4360_v46 = vmax.f32 %v3462_v37, 0.0 }
 0x407   : > { %v4364_v41 = vmax.f32 %v3464_v25, 0.0  ;;  %v3466_v19 = vpop.f32.mrb[171].mxu1 }
 0x408   : > { %v4365_v55 = vmax.f32 %v3466_v19, 0.0 }
 0x409   : > { %v4544_v51 = vpack.c.bf16 %v4364_v41, %v4359_v42  ;;  %3991 = vmatmul.mubr.bf16.gmra.mrb[208].mxu0 %v6619_v3  ;;  %v6627_v41 = vld [vmem:[#allocation5 + $0x308] ss:$16 sps:$4 sm:$0xff]  }
 0x40a   : > { %v4545_v16 = vpack.c.bf16 %v4365_v55, %v4360_v46  ;;  %3998 = vmatprep.mubr.bf16.mxu0 %v6620_v45  ;;  %v6628_v46 = vld [vmem:[#allocation5 + $0x32c] ss:$16 sps:$4 sm:$0xff]   ;;  %v6629_v55 = vld [vmem:[#allocation5 + $0x328] ss:$16 sps:$4 sm:$0xff]  }
 0x40b   : > { %v6631_v3 = vld [vmem:[#allocation5 + $0x348] ss:$16 sps:$4 sm:$0xff]  }
 0x40c   : > { %v3470_v22 = vpop.f32.mrb[172].mxu1  ;;  %4728 = vmatprep.subr.bf16.mxu1 %v4545_v16  ;;  %v6632_v16 = vld [vmem:[#allocation5 + $0x36c] ss:$16 sps:$4 sm:$0xff]  }
 0x40d   : > { %v3472_v18 = vpop.f32.mrb[173].mxu1  ;;  %4729 = vmatpush1.bf16.msra.mxu1 %v4544_v51  ;;  %v4369_v4 = vmax.f32 %v3470_v22, 0.0  ;;  %v6630_v51 = vld [vmem:[#allocation5 + $0x34c] ss:$16 sps:$4 sm:$0xff]  }
 0x40e   : > { %v3474_v20 = vpop.f32.mrb[174].mxu1  ;;  %v4370_v35 = vmax.f32 %v3472_v18, 0.0 }
 0x40f   : > { %v4374_v33 = vmax.f32 %v3474_v20, 0.0  ;;  %v3476_v8 = vpop.f32.mrb[175].mxu1 }
 0x410   : > { %v4375_v47 = vmax.f32 %v3476_v8, 0.0 }
 0x411   : > { %v4549_v5 = vpack.c.bf16 %v4374_v33, %v4369_v4  ;;  %3999 = vmatmul.mubr.bf16.gmra.mrb[212].mxu0 %v6621_v7 }
 0x412   : > { %v4550_v49 = vpack.c.bf16 %v4375_v47, %v4370_v35  ;;  %4006 = vmatprep.mubr.bf16.mxu0 %v6622_v57  ;;  %v6633_v35 = vld [vmem:[#allocation5 + $0x368] ss:$16 sps:$4 sm:$0xff]   ;;  %v6634_v47 = vld [vmem:[#allocation5 + $0x38c] ss:$16 sps:$4 sm:$0xff]  }
 0x414   : > { %v3480_v44 = vpop.f32.mrb[176].mxu1  ;;  %4730 = vmatprep.subr.bf16.mxu1 %v4550_v49 }
 0x415   : > { %v3482_v11 = vpop.f32.mrb[177].mxu1  ;;  %4731 = vmatpush1.bf16.msra.mxu1 %v4549_v5  ;;  %v4379_v36 = vmax.f32 %v3480_v44, 0.0 }
 0x416   : > { %v3484_v28 = vpop.f32.mrb[178].mxu1  ;;  %v4380_v30 = vmax.f32 %v3482_v11, 0.0 }
 0x417   : > { %v4384_v10 = vmax.f32 %v3484_v28, 0.0  ;;  %v3486_v48 = vpop.f32.mrb[179].mxu1 }
 0x418   : > { %v4385_v2 = vmax.f32 %v3486_v48, 0.0 }
 0x419   : > { %v4554_v56 = vpack.c.bf16 %v4384_v10, %v4379_v36  ;;  %4007 = vmatmul.mubr.bf16.gmra.mrb[216].mxu0 %v6623_v12 }
 0x41a   : > { %v4555_v31 = vpack.c.bf16 %v4385_v2, %v4380_v30  ;;  %4014 = vmatprep.mubr.bf16.mxu0 %v6624_v43 }
 0x41c   : > { %v3490_v34 = vpop.f32.mrb[180].mxu1  ;;  %4732 = vmatprep.subr.bf16.mxu1 %v4555_v31 }
 0x41d   : > { %v3492_v17 = vpop.f32.mrb[181].mxu1  ;;  %4733 = vmatpush1.bf16.msra.mxu1 %v4554_v56  ;;  %v4389_v1 = vmax.f32 %v3490_v34, 0.0 }
 0x41e   : > { %v3494_v27 = vpop.f32.mrb[182].mxu1  ;;  %v4390_v59 = vmax.f32 %v3492_v17, 0.0 }
 0x41f   : > { %v4394_v6 = vmax.f32 %v3494_v27, 0.0  ;;  %v3496_v58 = vpop.f32.mrb[183].mxu1 }
 0x420   : > { %v4395_v61 = vmax.f32 %v3496_v58, 0.0 }
 0x421   : > { %v4559_v60 = vpack.c.bf16 %v4394_v6, %v4389_v1  ;;  %4015 = vmatmul.mubr.bf16.gmra.mrb[220].mxu0 %v6625_v54 }
 0x422   : > { %v4560_v38 = vpack.c.bf16 %v4395_v61, %v4390_v59  ;;  %4022 = vmatprep.mubr.bf16.mxu0 %v6626_v0 }
 0x424   : > { %v3500_v32 = vpop.f32.mrb[184].mxu1  ;;  %4734 = vmatprep.subr.bf16.mxu1 %v4560_v38 }
 0x425   : > { %v3502_v53 = vpop.f32.mrb[185].mxu1  ;;  %4735 = vmatpush1.bf16.msra.mxu1 %v4559_v60  ;;  %v4399_v21 = vmax.f32 %v3500_v32, 0.0 }
 0x426   : > { %v3504_v14 = vpop.f32.mrb[186].mxu1  ;;  %v4400_v37 = vmax.f32 %v3502_v53, 0.0 }
 0x427   : > { %v4404_v52 = vmax.f32 %v3504_v14, 0.0  ;;  %v3506_v39 = vpop.f32.mrb[187].mxu1 }
 0x428   : > { %v4405_v25 = vmax.f32 %v3506_v39, 0.0 }
 0x429   : > { %v4564_v42 = vpack.c.bf16 %v4404_v52, %v4399_v21  ;;  %4023 = vmatmul.mubr.bf16.gmra.mrb[224].mxu0 %v6627_v41 }
 0x42a   : > { %v4565_v19 = vpack.c.bf16 %v4405_v25, %v4400_v37  ;;  %4030 = vmatprep.mubr.bf16.mxu0 %v6628_v46 }
 0x42c   : > { %4736 = vmatprep.subr.bf16.mxu1 %v4565_v19 }
 0x42d   : > { %4737 = vmatpush1.bf16.msra.mxu1 %v4564_v42 }
 0x430   : > { %4739 = vmatmul.mubr.bf16.vlgmr.msra.gmra.mrb[192].mxu1 %v8017_v29 }
 0x431   : > { %4031 = vmatmul.mubr.bf16.gmra.mrb[228].mxu0 %v6629_v55  ;;  %4779 = vmatprep.mubr.bf16.mxu1 %v7933_v24 }
 0x432   : > { %4038 = vmatprep.mubr.bf16.mxu0 %v6630_v51 }
 0x439   : > { %4039 = vmatmul.mubr.bf16.gmra.mrb[232].mxu0 %v6631_v3 }
 0x43a   : > { %4046 = vmatprep.mubr.bf16.mxu0 %v6632_v16 }
 0x43c   : > { %v3832_v45 = vpop.f32.mrb[128].mxu0 }
 0x43d   : > { %v3834_v22 = vpop.f32.mrb[129].mxu0  ;;  %v4091_v20 = vmax.f32 %v3832_v45, 0.0 }
 0x43e   : > { %v3835_v18 = vpop.f32.mrb[130].mxu0 }
 0x43f   : > { %v4096_v4 = vmax.f32 %v3835_v18, 0.0  ;;  %v3837_v33 = vpop.f32.mrb[131].mxu0 }
 0x441   : > { %v8091_v8 = vpack.c.bf16 %v4096_v4, %v4091_v20  ;;  %4047 = vmatmul.mubr.bf16.gmra.mrb[236].mxu0 %v6633_v35 }
 0x442   : > { %4054 = vmatprep.mubr.bf16.mxu0 %v6634_v47 }
 0x444   : > { %v3840_v5 = vpop.f32.mrb[132].mxu0 }
 0x445   : > { %v3842_v24 = vpop.f32.mrb[133].mxu0  ;;  %v4101_v49 = vmax.f32 %v3840_v5, 0.0 }
 0x446   : > { %v3843_v7 = vpop.f32.mrb[134].mxu0 }
 0x447   : > { %v4106_v57 = vmax.f32 %v3843_v7, 0.0  ;;  %v3845_v44 = vpop.f32.mrb[135].mxu0 }
 0x449   : > { %v8093_v11 = vpack.c.bf16 %v4106_v57, %v4101_v49  ;;  %4055 = vmatmul.mubr.bf16.gmra.mrb[240].mxu0 %v7901_v26 }
 0x44a   : > { %4062 = vmatprep.mubr.bf16.mxu0 %v7906_v15 }
 0x44c   : > { %v3848_v28 = vpop.f32.mrb[136].mxu0 }
 0x44d   : > { %v3850_v36 = vpop.f32.mrb[137].mxu0  ;;  %v4111_v48 = vmax.f32 %v3848_v28, 0.0 }
 0x44e   : > { %v3851_v10 = vpop.f32.mrb[138].mxu0 }
 0x44f   : > { %v4116_v30 = vmax.f32 %v3851_v10, 0.0  ;;  %v3853_v2 = vpop.f32.mrb[139].mxu0 }
 0x451   : > { %v8097_v56 = vpack.c.bf16 %v4116_v30, %v4111_v48  ;;  %4063 = vmatmul.mubr.bf16.gmra.mrb[244].mxu0 %v7915_v62 }
 0x452   : > { %4070 = vmatprep.mubr.bf16.mxu0 %v7920_v50  ;;  %v4827_v50 = vlaneseq }
 0x454   : > { %v3856_v12 = vpop.f32.mrb[140].mxu0  ;;  %v8109_v0 = vshrl.u32 %v4827_v50, 7 }
 0x455   : > { %v3858_v31 = vpop.f32.mrb[141].mxu0  ;;  %v4121_v34 = vmax.f32 %v3856_v12, 0.0 }
 0x456   : > { %v3859_v43 = vpop.f32.mrb[142].mxu0  ;;  %vm4829_vm0 = vcmp.lt.s32.totalorder %v8109_v0, 5 }
 0x457   : > { %v4126_v17 = vmax.f32 %v3859_v43, 0.0  ;;  %v3861_v26 = vpop.f32.mrb[143].mxu0 }
 0x459   : > { %v8101_v27 = vpack.c.bf16 %v4126_v17, %v4121_v34  ;;  %4071 = vmatmul.mubr.bf16.gmra.mrb[248].mxu0 %v7925_v63  ;;  %v4928_v17 = vsub.s32 0, %v8109_v0 }
 0x45a   : > { %4078 = vmatprep.mubr.bf16.mxu0 %v7930_v9 }
 0x45c   : > { %v3864_v15 = vpop.f32.mrb[144].mxu0 }
 0x45d   : > { %v3866_v1 = vpop.f32.mrb[145].mxu0  ;;  %v4131_v58 = vmax.f32 %v3864_v15, 0.0 }
 0x45e   : > { %v3867_v6 = vpop.f32.mrb[146].mxu0 }
 0x45f   : > { %v4136_v59 = vmax.f32 %v3867_v6, 0.0  ;;  %v3869_v62 = vpop.f32.mrb[147].mxu0  ;;  %v8130_v6 = vld [vmem:[%s7116_s29] sm:$0x1f] }
 0x460   : > { %v4929_v62 = vrot.slane %v8130_v6, %v4928_v17 }
 0x461   : > { %v8105_v61 = vpack.c.bf16 %v4136_v59, %v4131_v58  ;;  %4079 = vmatmul.mubr.bf16.gmra.mrb[252].mxu0 %v7937_v13  ;;  %v4932_v58 = vsub.s32 1, %v8109_v0 }
 0x462   : > { %vm4946_vm1 = vcmp.eq.s32.totalorder %v8109_v0, %v4929_v62 }
 0x464   : > { %v3872_v60 = vpop.f32.mrb[148].mxu0 }
 0x465   : > { %v3874_v54 = vpop.f32.mrb[149].mxu0  ;;  %v4141_v63 = vmax.f32 %v3872_v60, 0.0  ;;  %v4933_v60 = vrot.slane %v8130_v6, %v4932_v58 }
 0x466   : > { %v3875_v38 = vpop.f32.mrb[150].mxu0 }
 0x467   : > { %v4146_v32 = vmax.f32 %v3875_v38, 0.0  ;;  %v3877_v9 = vpop.f32.mrb[151].mxu0  ;;  %vm4947_vm2 = vcmp.eq.s32.totalorder %v8109_v0, %v4933_v60 }
 0x469   : > { %v8111_v53 = vpack.c.bf16 %v4146_v32, %v4141_v63 }
 0x46c   : > { %v3880_v14 = vpop.f32.mrb[152].mxu0  ;;  %v4658_v21 = vpop.f32.mrb[188].mxu1 }
 0x46d   : > { %v3882_v52 = vpop.f32.mrb[153].mxu0  ;;  %v4830_v13 = vsel %vm4829_vm0, %v4658_v21, -1e+30  ;;  %v4660_v39 = vpop.f32.mrb[189].mxu1  ;;  %v4151_v19 = vmax.f32 %v3880_v14, 0.0 }
 0x46e   : > { %v3883_v37 = vpop.f32.mrb[154].mxu0  ;;  %v4835_v25 = vrot.slane %v4830_v13, 4  ;;  %v4831_v42 = vsel %vm4829_vm0, %v4660_v39, -1e+30  ;;  %v4662_v41 = vpop.f32.mrb[190].mxu1 }
 0x46f   : > { %v4156_v46 = vmax.f32 %v3883_v37, 0.0  ;;  %v3885_v55 = vpop.f32.mrb[155].mxu0  ;;  %v4841_v51 = vrot.slane %v4831_v42, 4  ;;  %v4663_v3 = vpop.f32.mrb[191].mxu1 }
 0x470   : > { %v4836_v16 = vmax.f32 %v4830_v13, %v4835_v25  ;;  %v4951_v25 = vsel %vm4946_vm1, %v4830_v13, 0.0 }
 0x471   : > { %v8118_v45 = vpack.c.bf16 %v4156_v46, %v4151_v19  ;;  %v4842_v22 = vmax.f32 %v4831_v42, %v4841_v51  ;;  %v4952_v19 = vsel %vm4947_vm2, %v4831_v42, 0.0 }
 0x472   : > { %v4837_v18 = vrot.slane %v4836_v16, 2 }
 0x473   : > { %v4843_v20 = vrot.slane %v4842_v22, 2 }
 0x474   : > { %v3888_v4 = vpop.f32.mrb[156].mxu0  ;;  %v4838_v33 = vmax.f32 %v4836_v16, %v4837_v18 }
 0x475   : > { %v3890_v35 = vpop.f32.mrb[157].mxu0  ;;  %v4844_v47 = vmax.f32 %v4842_v22, %v4843_v20  ;;  %v4161_v7 = vmax.f32 %v3888_v4, 0.0  ;;  %v4962_v22 = vrot.slane %v4952_v19, 4 }
 0x476   : > { %v3891_v5 = vpop.f32.mrb[158].mxu0  ;;  %v4839_v24 = vrot.slane %v4838_v33, 1 }
 0x477   : > { %v4166_v49 = vmax.f32 %v3891_v5, 0.0  ;;  %v3893_v57 = vpop.f32.mrb[159].mxu0  ;;  %v4845_v44 = vrot.slane %v4844_v47, 1 }
 0x478   : > { %v8120_v28 = vmax.f32 %v4838_v33, %v4839_v24 }
 0x479   : > { %v8122_v36 = vpack.c.bf16 %v4166_v49, %v4161_v7  ;;  %v8124_v10 = vmax.f32 %v4844_v47, %v4845_v44  ;;  %v4963_v7 = vadd.f32 %v4962_v22, %v4952_v19 }
 0x47a   : > { %v4865_v48 = vsub.f32 %v4830_v13, %v8120_v28 }
 0x47b   : > { %v4866_v30 = vsub.f32 %v4831_v42, %v8124_v10 }
 0x47c   : > { %v3896_v2 = vpop.f32.mrb[160].mxu0  ;;  %v4870_v12 = vmul.f32 1.442695, %v4865_v48 }
 0x47d   : > { %v3898_v31 = vpop.f32.mrb[161].mxu0  ;;  %v4872_v43 = vmul.f32 1.442695, %v4866_v30  ;;  %v4171_v26 = vmax.f32 %v3896_v2, 0.0  ;;  %v4964_v2 = vrot.slane %v4963_v7, 2 }
 0x47e   : > { %v3899_v34 = vpop.f32.mrb[162].mxu0  ;;  %6451 = vpow2.f32 %v4870_v12 }
 0x47f   : > { %v4176_v15 = vmax.f32 %v3899_v34, 0.0  ;;  %v3901_v1 = vpop.f32.mrb[163].mxu0  ;;  %6453 = vpow2.f32 %v4872_v43 }
 0x481   : > { %v4451_v59 = vpack.c.bf16 %v4176_v15, %v4171_v26  ;;  %v4965_v15 = vadd.f32 %v4964_v2, %v4963_v7 }
 0x483   : > { %5464 = vmatprep.subr.bf16.mxu1 %v4451_v59 }
 0x484   : > { %v3904_v54 = vpop.f32.mrb[164].mxu0  ;;  %5465 = vmatpush3.bf16.msra.mxu1 %v8091_v8  ;;  %v4956_v8 = vrot.slane %v4951_v25, 4 }
 0x485   : > { %v3906_v38 = vpop.f32.mrb[165].mxu0  ;;  %v4181_v32 = vmax.f32 %v3904_v54, 0.0 }
 0x486   : > { %v3907_v63 = vpop.f32.mrb[166].mxu0  ;;  %v4957_v5 = vadd.f32 %v4956_v8, %v4951_v25 }
 0x487   : > { %v4186_v9 = vmax.f32 %v3907_v63, 0.0  ;;  %v3909_v14 = vpop.f32.mrb[167].mxu0 }
 0x488   : > { %v6452_v21 = vpop.eup %6451  ;;  %v4958_v44 = vrot.slane %v4957_v5, 2 }
 0x489   : > { %v6454_v52 = vpop.eup %6453  ;;  %v4456_v39 = vpack.c.bf16 %v4186_v9, %v4181_v32  ;;  %v4880_v37 = vrot.slane %v6452_v21, 4 }
 0x48a   : > { %v4886_v41 = vrot.slane %v6454_v52, 4  ;;  %v4959_v17 = vadd.f32 %v4958_v44, %v4957_v5 }
 0x48b   : > { %5466 = vmatprep.subr.bf16.mxu1 %v4456_v39  ;;  %v4881_v46 = vadd.f32 %v6452_v21, %v4880_v37 }
 0x48c   : > { %v3912_v55 = vpop.f32.mrb[168].mxu0  ;;  %5467 = vmatpush3.bf16.msra.mxu1 %v8093_v11  ;;  %v4887_v51 = vadd.f32 %v6454_v52, %v4886_v41  ;;  %v4960_v58 = vrot.slane %v4959_v17, 1 }
 0x48d   : > { %v3914_v3 = vpop.f32.mrb[169].mxu0  ;;  %v4882_v16 = vrot.slane %v4881_v46, 2  ;;  %v4191_v4 = vmax.f32 %v3912_v55, 0.0 }
 0x48e   : > { %v3915_v18 = vpop.f32.mrb[170].mxu0  ;;  %v4888_v20 = vrot.slane %v4887_v51, 2  ;;  %v4961_v14 = vadd.f32 %v4960_v58, %v4959_v17 }
 0x48f   : > { %v4196_v33 = vmax.f32 %v3915_v18, 0.0  ;;  %v3917_v35 = vpop.f32.mrb[171].mxu0  ;;  %v4883_v47 = vadd.f32 %v4882_v16, %v4881_v46 }
 0x490   : > { %v4889_v13 = vadd.f32 %v4888_v20, %v4887_v51 }
 0x491   : > { %v4461_v24 = vpack.c.bf16 %v4196_v33, %v4191_v4  ;;  %v4884_v42 = vrot.slane %v4883_v47, 1 }
 0x492   : > { %v4890_v49 = vrot.slane %v4889_v13, 1 }
 0x493   : > { %5468 = vmatprep.subr.bf16.mxu1 %v4461_v24  ;;  %v4885_v57 = vadd.f32 %v4884_v42, %v4883_v47 }
 0x494   : > { %v3920_v11 = vpop.f32.mrb[172].mxu0  ;;  %5469 = vmatpush3.bf16.msra.mxu1 %v8097_v56  ;;  %v4891_v48 = vadd.f32 %v4890_v49, %v4889_v13  ;;  %v4966_v56 = vrot.slane %v4965_v15, 1 }
 0x495   : > { %v3922_v30 = vpop.f32.mrb[173].mxu0  ;;  %6455 = vlog2.f32 %v4885_v57  ;;  %v4201_v31 = vmax.f32 %v3920_v11, 0.0 }
 0x496   : > { %v3923_v12 = vpop.f32.mrb[174].mxu0  ;;  %6457 = vlog2.f32 %v4891_v48  ;;  %v4967_v39 = vadd.f32 %v4966_v56, %v4965_v15 }
 0x497   : > { %v4206_v43 = vmax.f32 %v3923_v12, 0.0  ;;  %v3925_v34 = vpop.f32.mrb[175].mxu0 }
 0x499   : > { %v4466_v26 = vpack.c.bf16 %v4206_v43, %v4201_v31 }
 0x49b   : > { %5470 = vmatprep.subr.bf16.mxu1 %v4466_v26 }
 0x49c   : > { %v3928_v1 = vpop.f32.mrb[176].mxu0  ;;  %5471 = vmatpush3.bf16.msra.mxu1 %v8101_v27 }
 0x49d   : > { %v3930_v59 = vpop.f32.mrb[177].mxu0  ;;  %v4211_v54 = vmax.f32 %v3928_v1, 0.0 }
 0x49e   : > { %v3931_v62 = vpop.f32.mrb[178].mxu0 }
 0x49f   : > { %v6456_v60 = vpop.eup %6455  ;;  %v4216_v38 = vmax.f32 %v3931_v62, 0.0  ;;  %v3933_v63 = vpop.f32.mrb[179].mxu0 }
 0x4a0   : > { %v6458_v32 = vpop.eup %6457  ;;  %v4911_v9 = vmul.f32 0.6931472, %v6456_v60 }
 0x4a1   : > { %v4471_v21 = vpack.c.bf16 %v4216_v38, %v4211_v54  ;;  %v4913_v52 = vmul.f32 0.6931472, %v6458_v32 }
 0x4a2   : > { %v4920_v37 = vadd.f32 %v4911_v9, %v8120_v28 }
 0x4a3   : > { %5472 = vmatprep.subr.bf16.mxu1 %v4471_v21  ;;  %v4921_v25 = vadd.f32 %v4913_v52, %v8124_v10 }
 0x4a4   : > { %v3936_v27 = vpop.f32.mrb[180].mxu0  ;;  %5473 = vmatpush3.bf16.msra.mxu1 %v8105_v61  ;;  %v5004_v41 = vsub.f32 %v4920_v37, %v4961_v14 }
 0x4a5   : > { %v3938_v19 = vpop.f32.mrb[181].mxu0  ;;  %v5005_v46 = vsub.f32 %v4921_v25, %v4967_v39  ;;  %v4221_v8 = vmax.f32 %v3936_v27, 0.0 }
 0x4a6   : > { %v3939_v55 = vpop.f32.mrb[182].mxu0 }
 0x4a7   : > { %v4226_v51 = vmax.f32 %v3939_v55, 0.0  ;;  %v3941_v3 = vpop.f32.mrb[183].mxu0  ;;  %v8144_v16 = vadd.f32 %v5005_v46, %v5004_v41 }
 0x4a9   : > { %v4476_v22 = vpack.c.bf16 %v4226_v51, %v4221_v8 }
 0x4ab   : > { %5474 = vmatprep.subr.bf16.mxu1 %v4476_v22 }
 0x4ac   : > { %v3944_v18 = vpop.f32.mrb[184].mxu0  ;;  %5475 = vmatpush3.bf16.msra.mxu1 %v8111_v53 }
 0x4ad   : > { %v3946_v28 = vpop.f32.mrb[185].mxu0  ;;  %v4231_v10 = vmax.f32 %v3944_v18, 0.0 }
 0x4ae   : > { %v3947_v20 = vpop.f32.mrb[186].mxu0 }
 0x4af   : > { %v4236_v4 = vmax.f32 %v3947_v20, 0.0  ;;  %v3949_v33 = vpop.f32.mrb[187].mxu0 }
 0x4b1   : > { %v4481_v61 = vpack.c.bf16 %v4236_v4, %v4231_v10 }
 0x4b3   : > { %5476 = vmatprep.subr.bf16.mxu1 %v4481_v61 }
 0x4b4   : > { %v3952_v35 = vpop.f32.mrb[188].mxu0  ;;  %5477 = vmatpush3.bf16.msra.mxu1 %v8118_v45 }
 0x4b5   : > { %v3954_v47 = vpop.f32.mrb[189].mxu0  ;;  %v4241_v13 = vmax.f32 %v3952_v35, 0.0 }
 0x4b6   : > { %v3955_v5 = vpop.f32.mrb[190].mxu0 }
 0x4b7   : > { %v4246_v24 = vmax.f32 %v3955_v5, 0.0  ;;  %v3957_v42 = vpop.f32.mrb[191].mxu0 }
 0x4b9   : > { %v4486_v7 = vpack.c.bf16 %v4246_v24, %v4241_v13 }
 0x4bb   : > { %5478 = vmatprep.subr.bf16.mxu1 %v4486_v7 }
 0x4bc   : > { %v3960_v49 = vpop.f32.mrb[192].mxu0  ;;  %5479 = vmatpush3.bf16.msra.mxu1 %v8122_v36 }
 0x4bd   : > { %v3962_v53 = vpop.f32.mrb[193].mxu0  ;;  %v4251_v11 = vmax.f32 %v3960_v49, 0.0 }
 0x4be   : > { %v3963_v57 = vpop.f32.mrb[194].mxu0 }
 0x4bf   : > { %v4256_v44 = vmax.f32 %v3963_v57, 0.0  ;;  %v3965_v48 = vpop.f32.mrb[195].mxu0  ;;  %4780 = vmatmul.mubr.bf16.vlgmr.msra.gmra.mrb[196].mxu1 %v7945_v40 }
 0x4c0   : > { %4819 = vmatprep.mubr.bf16.mxu1 %v7949_v23 }
 0x4c1   : > { %v4491_v45 = vpack.c.bf16 %v4256_v44, %v4251_v11 }
 0x4c4   : > { %v3968_v30 = vpop.f32.mrb[196].mxu0 }
 0x4c5   : > { %v3970_v2 = vpop.f32.mrb[197].mxu0  ;;  %v4261_v31 = vmax.f32 %v3968_v30, 0.0 }
 0x4c6   : > { %v3971_v12 = vpop.f32.mrb[198].mxu0 }
 0x4c7   : > { %v4266_v43 = vmax.f32 %v3971_v12, 0.0  ;;  %v3973_v34 = vpop.f32.mrb[199].mxu0 }
 0x4c9   : > { %v8151_v17 = vpack.c.bf16 %v4266_v43, %v4261_v31 }
 0x4cc   : > { %v3976_v26 = vpop.f32.mrb[200].mxu0 }
 0x4cd   : > { %v3978_v36 = vpop.f32.mrb[201].mxu0  ;;  %v4271_v1 = vmax.f32 %v3976_v26, 0.0 }
 0x4ce   : > { %v3979_v15 = vpop.f32.mrb[202].mxu0 }
 0x4cf   : > { %v4276_v58 = vmax.f32 %v3979_v15, 0.0  ;;  %v3981_v59 = vpop.f32.mrb[203].mxu0 }
 0x4d1   : > { %v8153_v56 = vpack.c.bf16 %v4276_v58, %v4271_v1 }
 0x4d4   : > { %v3984_v40 = vpop.f32.mrb[204].mxu0 }
 0x4d5   : > { %v3986_v62 = vpop.f32.mrb[205].mxu0  ;;  %v4281_v60 = vmax.f32 %v3984_v40, 0.0 }
 0x4d6   : > { %v3987_v23 = vpop.f32.mrb[206].mxu0 }
 0x4d7   : > { %v4286_v54 = vmax.f32 %v3987_v23, 0.0  ;;  %v3989_v38 = vpop.f32.mrb[207].mxu0 }
 0x4d9   : > { %v8155_v63 = vpack.c.bf16 %v4286_v54, %v4281_v60 }
 0x4dc   : > { %v3992_v32 = vpop.f32.mrb[208].mxu0 }
 0x4dd   : > { %v3994_v9 = vpop.f32.mrb[209].mxu0  ;;  %v4291_v21 = vmax.f32 %v3992_v32, 0.0 }
 0x4de   : > { %v3995_v14 = vpop.f32.mrb[210].mxu0 }
 0x4df   : > { %v4296_v52 = vmax.f32 %v3995_v14, 0.0  ;;  %v3997_v39 = vpop.f32.mrb[211].mxu0 }
 0x4e1   : > { %v8157_v37 = vpack.c.bf16 %v4296_v52, %v4291_v21 }
 0x4e4   : > { %v4000_v25 = vpop.f32.mrb[212].mxu0 }
 0x4e5   : > { %v4002_v27 = vpop.f32.mrb[213].mxu0  ;;  %v4301_v19 = vmax.f32 %v4000_v25, 0.0 }
 0x4e6   : > { %v4003_v41 = vpop.f32.mrb[214].mxu0 }
 0x4e7   : > { %v4306_v46 = vmax.f32 %v4003_v41, 0.0  ;;  %v4005_v55 = vpop.f32.mrb[215].mxu0 }
 0x4e9   : > { %v8159_v8 = vpack.c.bf16 %v4306_v46, %v4301_v19 }
 0x4ec   : > { %v4008_v51 = vpop.f32.mrb[216].mxu0 }
 0x4ed   : > { %v4010_v3 = vpop.f32.mrb[217].mxu0  ;;  %v4311_v18 = vmax.f32 %v4008_v51, 0.0 }
 0x4ee   : > { %v4011_v22 = vpop.f32.mrb[218].mxu0 }
 0x4ef   : > { %v4316_v28 = vmax.f32 %v4011_v22, 0.0  ;;  %v4013_v20 = vpop.f32.mrb[219].mxu0 }
 0x4f0   : > { %v4940_v20 = vsub.s32 3, %v8109_v0 }
 0x4f1   : > { %v8161_v10 = vpack.c.bf16 %v4316_v28, %v4311_v18  ;;  %v4936_v18 = vsub.s32 2, %v8109_v0 }
 0x4f4   : > { %v4016_v4 = vpop.f32.mrb[220].mxu0 }
 0x4f5   : > { %v4018_v33 = vpop.f32.mrb[221].mxu0  ;;  %v4321_v35 = vmax.f32 %v4016_v4, 0.0 }
 0x4f6   : > { %v4019_v61 = vpop.f32.mrb[222].mxu0 }
 0x4f7   : > { %v4326_v47 = vmax.f32 %v4019_v61, 0.0  ;;  %v4021_v5 = vpop.f32.mrb[223].mxu0 }
 0x4f9   : > { %v8163_v13 = vpack.c.bf16 %v4326_v47, %v4321_v35  ;;  %v4937_v47 = vrot.slane %v8130_v6, %v4936_v18 }
 0x4fb   : > { %vm4948_vm3 = vcmp.eq.s32.totalorder %v8109_v0, %v4937_v47 }
 0x4fc   : > { %v4024_v24 = vpop.f32.mrb[224].mxu0 }
 0x4fd   : > { %v4026_v42 = vpop.f32.mrb[225].mxu0  ;;  %v4331_v49 = vmax.f32 %v4024_v24, 0.0  ;;  %v4941_v24 = vrot.slane %v8130_v6, %v4940_v20 }
 0x4fe   : > { %v4027_v7 = vpop.f32.mrb[226].mxu0 }
 0x4ff   : > { %v4336_v53 = vmax.f32 %v4027_v7, 0.0  ;;  %v4029_v57 = vpop.f32.mrb[227].mxu0  ;;  %vm4949_vm4 = vcmp.eq.s32.totalorder %v8109_v0, %v4941_v24 }
 0x501   : > { %v4531_v11 = vpack.c.bf16 %v4336_v53, %v4331_v49 }
 0x503   : > { %v4740_v44 = vpop.f32.mrb[192].mxu1  ;;  %5486 = vmatprep.subr.bf16.mxu1 %v4531_v11 }
 0x504   : > { %v8167_v48 = vsel %vm4829_vm0, %v4740_v44, -1e+30  ;;  %v4032_v30 = vpop.f32.mrb[228].mxu0  ;;  %5487 = vmatpush3.bf16.msra.mxu1 %v4491_v45  ;;  %v4742_v2 = vpop.f32.mrb[193].mxu1 }
 0x505   : > { %v4847_v12 = vrot.slane %v8167_v48, 4  ;;  %v4034_v31 = vpop.f32.mrb[229].mxu0  ;;  %v4833_v43 = vsel %vm4829_vm0, %v4742_v2, -1e+30  ;;  %v4744_v36 = vpop.f32.mrb[194].mxu1  ;;  %v4341_v1 = vmax.f32 %v4032_v30, 0.0 }
 0x506   : > { %v4853_v34 = vrot.slane %v4833_v43, 4  ;;  %v4035_v26 = vpop.f32.mrb[230].mxu0  ;;  %v4745_v40 = vpop.f32.mrb[195].mxu1  ;;  %v4953_v2 = vsel %vm4948_vm3, %v8167_v48, 0.0  ;;  %v4954_v31 = vsel %vm4949_vm4, %v4833_v43, 0.0 }
 0x507   : > { %v4848_v15 = vmax.f32 %v8167_v48, %v4847_v12  ;;  %v4346_v58 = vmax.f32 %v4035_v26, 0.0  ;;  %v4037_v59 = vpop.f32.mrb[231].mxu0  ;;  %v4968_v36 = vrot.slane %v4953_v2, 4 }
 0x508   : > { %v4854_v62 = vmax.f32 %v4833_v43, %v4853_v34 }
 0x509   : > { %v4849_v23 = vrot.slane %v4848_v15, 2  ;;  %v4536_v60 = vpack.c.bf16 %v4346_v58, %v4341_v1 }
 0x50a   : > { %v4855_v45 = vrot.slane %v4854_v62, 2 }
 0x50b   : > { %v4850_v54 = vmax.f32 %v4848_v15, %v4849_v23  ;;  %5488 = vmatprep.subr.bf16.mxu1 %v4536_v60  ;;  %v4974_v15 = vrot.slane %v4954_v31, 4  ;;  %v4969_v60 = vadd.f32 %v4968_v36, %v4953_v2 }
 0x50c   : > { %v4856_v38 = vmax.f32 %v4854_v62, %v4855_v45  ;;  %v4040_v32 = vpop.f32.mrb[232].mxu0  ;;  %5489 = vmatpush3.bf16.msra.mxu1 %v8151_v17 }
 0x50d   : > { %v4851_v9 = vrot.slane %v4850_v54, 1  ;;  %v4042_v14 = vpop.f32.mrb[233].mxu0  ;;  %v4351_v25 = vmax.f32 %v4040_v32, 0.0 }
 0x50e   : > { %v4857_v21 = vrot.slane %v4856_v38, 1  ;;  %v4043_v52 = vpop.f32.mrb[234].mxu0 }
 0x50f   : > { %v8174_v39 = vmax.f32 %v4850_v54, %v4851_v9  ;;  %v4356_v27 = vmax.f32 %v4043_v52, 0.0  ;;  %v4045_v41 = vpop.f32.mrb[235].mxu0  ;;  %v4970_v52 = vrot.slane %v4969_v60, 2 }
 0x510   : > { %v8176_v19 = vmax.f32 %v4856_v38, %v4857_v21 }
 0x511   : > { %v4867_v46 = vsub.f32 %v8167_v48, %v8174_v39  ;;  %v4541_v55 = vpack.c.bf16 %v4356_v27, %v4351_v25 }
 0x512   : > { %v4868_v51 = vsub.f32 %v4833_v43, %v8176_v19  ;;  %v4975_v43 = vadd.f32 %v4974_v15, %v4954_v31 }
 0x513   : > { %v4874_v3 = vmul.f32 1.442695, %v4867_v46  ;;  %5490 = vmatprep.subr.bf16.mxu1 %v4541_v55  ;;  %v4971_v55 = vadd.f32 %v4970_v52, %v4969_v60 }
 0x514   : > { %v4876_v17 = vmul.f32 1.442695, %v4868_v51  ;;  %v4048_v22 = vpop.f32.mrb[236].mxu0  ;;  %5491 = vmatpush3.bf16.msra.mxu1 %v8153_v56  ;;  %v4976_v27 = vrot.slane %v4975_v43, 2 }
 0x515   : > { %6459 = vpow2.f32 %v4874_v3  ;;  %v4050_v28 = vpop.f32.mrb[237].mxu0  ;;  %v4361_v33 = vmax.f32 %v4048_v22, 0.0 }
 0x516   : > { %6461 = vpow2.f32 %v4876_v17  ;;  %v4051_v4 = vpop.f32.mrb[238].mxu0  ;;  %v4977_v22 = vadd.f32 %v4976_v27, %v4975_v43  ;;  %v4972_v28 = vrot.slane %v4971_v55, 1 }
 0x517   : > { %v4366_v61 = vmax.f32 %v4051_v4, 0.0  ;;  %v4053_v35 = vpop.f32.mrb[239].mxu0 }
 0x518   : > { %v4978_v4 = vrot.slane %v4977_v22, 1 }
 0x519   : > { %v4546_v5 = vpack.c.bf16 %v4366_v61, %v4361_v33 }
 0x51b   : > { %5492 = vmatprep.subr.bf16.mxu1 %v4546_v5 }
 0x51c   : > { %v4056_v42 = vpop.f32.mrb[240].mxu0  ;;  %5493 = vmatpush3.bf16.msra.mxu1 %v8155_v63 }
 0x51d   : > { %v4058_v56 = vpop.f32.mrb[241].mxu0  ;;  %v4371_v53 = vmax.f32 %v4056_v42, 0.0 }
 0x51e   : > { %v4059_v7 = vpop.f32.mrb[242].mxu0  ;;  %v4973_v56 = vadd.f32 %v4972_v28, %v4971_v55  ;;  %v4987_v55 = vand.u32 127, %v4827_v50 }
 0x51f   : > { %v6460_v49 = vpop.eup %6459  ;;  %v4376_v57 = vmax.f32 %v4059_v7, 0.0  ;;  %v4061_v11 = vpop.f32.mrb[243].mxu0 }
 0x520   : > { %v6462_v44 = vpop.eup %6461  ;;  %v4892_v30 = vrot.slane %v6460_v49, 4 }
 0x521   : > { %v4898_v12 = vrot.slane %v6462_v44, 4  ;;  %v4551_v34 = vpack.c.bf16 %v4376_v57, %v4371_v53 }
 0x522   : > { %v4893_v26 = vadd.f32 %v6460_v49, %v4892_v30  ;;  %v4979_v49 = vadd.f32 %v4978_v4, %v4977_v22 }
 0x523   : > { %5494 = vmatprep.subr.bf16.mxu1 %v4551_v34  ;;  %v4899_v63 = vadd.f32 %v6462_v44, %v4898_v12 }
 0x524   : > { %v4064_v1 = vpop.f32.mrb[244].mxu0  ;;  %5495 = vmatpush3.bf16.msra.mxu1 %v8157_v37  ;;  %v4894_v58 = vrot.slane %v4893_v26, 2 }
 0x525   : > { %v4066_v59 = vpop.f32.mrb[245].mxu0  ;;  %v4900_v40 = vrot.slane %v4899_v63, 2  ;;  %v4381_v45 = vmax.f32 %v4064_v1, 0.0 }
 0x526   : > { %v4067_v62 = vpop.f32.mrb[246].mxu0  ;;  %v4895_v23 = vadd.f32 %v4894_v58, %v4893_v26 }
 0x527   : > { %v4386_v54 = vmax.f32 %v4067_v62, 0.0  ;;  %v4069_v48 = vpop.f32.mrb[247].mxu0  ;;  %v4901_v38 = vadd.f32 %v4900_v40, %v4899_v63 }
 0x528   : > { %v4896_v32 = vrot.slane %v4895_v23, 1 }
 0x529   : > { %v4556_v9 = vpack.c.bf16 %v4386_v54, %v4381_v45  ;;  %v4902_v14 = vrot.slane %v4901_v38, 1  ;;  %v4944_v54 = vsub.s32 4, %v8109_v0 }
 0x52a   : > { %v4897_v21 = vadd.f32 %v4896_v32, %v4895_v23 }
 0x52b   : > { %5496 = vmatprep.subr.bf16.mxu1 %v4556_v9  ;;  %v4903_v25 = vadd.f32 %v4902_v14, %v4901_v38  ;;  %v4945_v48 = vrot.slane %v8130_v6, %v4944_v54 }
 0x52c   : > { %v4072_v37 = vpop.f32.mrb[248].mxu0  ;;  %5497 = vmatpush3.bf16.msra.mxu1 %v8159_v8  ;;  %6463 = vlog2.f32 %v4897_v21 }
 0x52d   : > { %v4074_v41 = vpop.f32.mrb[249].mxu0  ;;  %6465 = vlog2.f32 %v4903_v25  ;;  %v4391_v51 = vmax.f32 %v4072_v37, 0.0  ;;  %vm4950_vm5 = vcmp.eq.s32.totalorder %v8109_v0, %v4945_v48 }
 0x52e   : > { %v4075_v46 = vpop.f32.mrb[250].mxu0 }
 0x52f   : > { %v4396_v3 = vmax.f32 %v4075_v46, 0.0  ;;  %v4077_v17 = vpop.f32.mrb[251].mxu0 }
 0x531   : > { %v4561_v18 = vpack.c.bf16 %v4396_v3, %v4391_v51  ;;  %v4991_v3 = vadd.s32 512, %v4987_v55 }
 0x533   : > { %5498 = vmatprep.subr.bf16.mxu1 %v4561_v18  ;;  %vm5003_vm6 = vcmp.lt.s32.totalorder %v4991_v3, 529 }
 0x534   : > { %v4080_v20 = vpop.f32.mrb[252].mxu0  ;;  %5499 = vmatpush3.bf16.msra.mxu1 %v8161_v10 }
 0x535   : > { %v4082_v33 = vpop.f32.mrb[253].mxu0  ;;  %v4401_v47 = vmax.f32 %v4080_v20, 0.0 }
 0x536   : > { %v6464_v61 = vpop.eup %6463  ;;  %v4083_v35 = vpop.f32.mrb[254].mxu0 }
 0x537   : > { %v6466_v8 = vpop.eup %6465  ;;  %v4406_v5 = vmax.f32 %v4083_v35, 0.0  ;;  %v4085_v24 = vpop.f32.mrb[255].mxu0  ;;  %v4915_v42 = vmul.f32 0.6931472, %v6464_v61 }
 0x538   : > { %v4917_v7 = vmul.f32 0.6931472, %v6466_v8 }
 0x539   : > { %v4566_v53 = vpack.c.bf16 %v4406_v5, %v4401_v47  ;;  %v4922_v57 = vadd.f32 %v4915_v42, %v8174_v39 }
 0x53a   : > { %v4923_v11 = vadd.f32 %v4917_v7, %v8176_v19 }
 0x53b   : > { %5500 = vmatprep.subr.bf16.mxu1 %v4566_v53  ;;  %v5006_v44 = vsub.f32 %v4922_v57, %v4973_v56 }
 0x53c   : > { %5501 = vmatpush3.bf16.msra.mxu1 %v8163_v13  ;;  %v5007_v10 = vsub.f32 %v4923_v11, %v4979_v49 }
 0x53d   : > { %v5015_v30 = vadd.f32 %v8144_v16, %v5006_v44 }
 0x53f   : > { %4820 = vmatmul.mubr.bf16.vlgmr.msra.gmra.mrb[200].mxu1 %v8017_v29  ;;  %v5016_v2 = vadd.f32 %v5015_v30, %v5007_v10 }
 0x592   : > { %v5480_v12 = vpop.f32.mrb[196].mxu1 }
 0x593   : > { %v5481_v31 = vpop.f32.mrb[197].mxu1 }
 0x594   : > { %v5482_v34 = vadd.f32 %v5481_v31, %v5480_v12  ;;  %v5483_v26 = vpop.f32.mrb[198].mxu1 }
 0x595   : > { %v5484_v36 = vpop.f32.mrb[199].mxu1 }
 0x612   : > { %v5502_v63 = vpop.f32.mrb[200].mxu1 }
 0x613   : > { %v5503_v15 = vpop.f32.mrb[201].mxu1 }
 0x614   : > { %v5504_v39 = vadd.f32 %v5503_v15, %v5502_v63  ;;  %v5505_v1 = vpop.f32.mrb[202].mxu1 }
 0x615   : > { %v5506_v19 = vpop.f32.mrb[203].mxu1 }
 0x616   : > { %v4822_v58 = vadd.f32 %v5504_v39, %v5482_v34 }
 0x618   : > { %v4834_v13 = vsel %vm4829_vm0, %v4822_v58, -1e+30 }
 0x619   : > { %v4859_v59 = vrot.slane %v4834_v13, 4  ;;  %v4955_v32 = vsel %vm4950_vm5, %v4834_v13, 0.0 }
 0x61a   : > { %v4980_v21 = vrot.slane %v4955_v32, 4 }
 0x61b   : > { %v4860_v40 = vmax.f32 %v4834_v13, %v4859_v59 }
 0x61c   : > { %v4981_v27 = vadd.f32 %v4980_v21, %v4955_v32 }
 0x61d   : > { %v4861_v16 = vrot.slane %v4860_v40, 2 }
 0x61e   : > { %v4982_v41 = vrot.slane %v4981_v27, 2 }
 0x61f   : > { %v4862_v62 = vmax.f32 %v4860_v40, %v4861_v16 }
 0x620   : > { %v4983_v46 = vadd.f32 %v4982_v41, %v4981_v27 }
 0x621   : > { %v4863_v29 = vrot.slane %v4862_v62, 1 }
 0x622   : > { %v4984_v6 = vrot.slane %v4983_v46, 1 }
 0x623   : > { %v4864_v23 = vmax.f32 %v4862_v62, %v4863_v29 }
 0x624   : > { %v4985_v22 = vadd.f32 %v4984_v6, %v4983_v46 }
 0x625   : > { %v4869_v60 = vsub.f32 %v4834_v13, %v4864_v23 }
 0x627   : > { %v4878_v45 = vmul.f32 1.442695, %v4869_v60 }
 0x629   : > { %6467 = vpow2.f32 %v4878_v45 }
 0x633   : > { %v6468_v38 = vpop.eup %6467 }
 0x634   : > { %v4904_v43 = vrot.slane %v6468_v38, 4 }
 0x636   : > { %v4905_v9 = vadd.f32 %v6468_v38, %v4904_v43 }
 0x638   : > { %v4906_v14 = vrot.slane %v4905_v9, 2 }
 0x63a   : > { %v4907_v52 = vadd.f32 %v4906_v14, %v4905_v9 }
 0x63c   : > { %v4908_v25 = vrot.slane %v4907_v52, 1 }
 0x63e   : > { %v4909_v37 = vadd.f32 %v4908_v25, %v4907_v52 }
 0x640   : > { %6469 = vlog2.f32 %v4909_v37 }
 0x64a   : > { %v6470_v51 = vpop.eup %6469 }
 0x64b   : > { %v4919_v0 = vmul.f32 0.6931472, %v6470_v51 }
 0x64d   : > { %v4924_v17 = vadd.f32 %v4919_v0, %v4864_v23 }
 0x64f   : > { %v5008_v18 = vsub.f32 %v4924_v17, %v4985_v22 }
 0x651   : > { %v5013_v28 = vsel %vm5003_vm6, %v5008_v18, 0.0 }
 0x652   : > { %v5017_v20 = vadd.f32 %v5016_v2, %v5013_v28 }
 0x654   : > { %5018 = vadd.xlane.f32.xlu0 %v5017_v20 }
 0x6e1   : > { %v5019_v50 = vpop.xlane.xlu0 %5018 }
 0x6e2   : > { %5020 = vst [vmem:[%s301_s24] sm:$0x1] %v5019_v50 }
 0x6e3   : > { %6764 = shalt.err (!%p6761_p13)
}
 0x6e4   : > { %s6765_s21 = scalar_lea.hbm %s8211_s7, 16  ;;  %s6769_s8 = scalar_lea.hbm %s8262_s4, 32 }
 0x6e5   : > { %p6766_p3 = scmp.ne.s32.totalorder %s8211_s7, %s6765_s21  ;;  %p6770_p7 = scmp.lt.u32.totalorder %s8211_s7, %s8262_s4 }
 0x6e6   : > { %p6771_p12 = scmp.lt.u32.totalorder %s6769_s8, %s6765_s21  ;;  %p6773_p10 = scmp.lt.u32.totalorder %s6765_s21, %s8211_s7 }
 0x6e7   : > { %p6767_p4 = pnand %p6766_p3, %p8372_p1 }
 0x6e8   : > { %p6772_p9 = por %p6771_p12, %p6770_p7 }
 0x6e9   : > { %p6768_p8 = pneg %p6767_p4 }
 0x6ea   : > { %p6774_p0 = por %p6773_p10, %p6772_p9 }
 0x6ec   : > { %p6775_p11 = pnand %p6774_p0, %p6768_p8 }
 0x6ee   : > { %6778 = shalt.err (!%p6775_p11)
}
 0x6ef   : > { %5950 = dma.vmem_to_hbm [thread:$0]  (%p8372_p1), %s8206_s26, 16, %s8211_s7, %s5022_s6  }
 0x6f0 PF: > { %s5047_s0 = sand.u32 1, %s6821_s15   ;;  %p8373_p5 = scmp.ne.s32.totalorder %s8282_s28, 0 }
 0x6f1   : > { %p8374_p2 = scmp.ge.s32.totalorder %s6841_s20, 2  ;;  %s5048_s1 = scalar_lea.sflag [#allocation4], %s5047_s0 }
 0x6f3   : > { %p5967_p6 = pnand %p8374_p2, %p8373_p5 }
 0x6f5   : > { %6816 = dma.done.wait (!%p5967_p6), %s5048_s1, 16  }
 0x6f6   : > { %6818 = vsyncadd (!%p5967_p6), %s5048_s1, 4294967280  ;;  %s24_s20 = sadd.s32 1, %s6841_s20   ;;  %s8375_s15 = smov %s6825_s16 }
 0x6f7   : > { %p21_p13 = scmp.ge.s32.totalorder %s24_s20, 4   ;;  %s8376_s16 = smov %s6829_s17 }
 0x6f8   : > { %s8377_s17 = smov %s7038_s9  ;;  %s8378_s18 = smov %s6837_s19 }
 0x6f9   : > { %s8379_s19 = smov %s8381_s11  ;;  %23 = sbr.rel (!%p21_p13) target bundleno = 13 (0xd), region = 102 }
 0x700   :  { %5052 = vsyncpa [#allocation3], 1 }
 0x701   :  { %5054 = vsyncpa [#allocation3 + $0x1], 1 }
 0x702   :  { %5055 = vsyncpa [#allocation6], 1 }
 0x703   :  { %5056 = vsyncpa [#allocation9], 1 }
 0x704   :  { %5058 = vsyncpa [#allocation9 + $0x1], 1 }
 0x705   :  { %5059 = vsyncpa [#allocation4], 1 }
 0x706   :  { %5061 = vsyncpa [#allocation4 + $0x1], 1 }

</bundles_post_ra>
